<compile_context>
chip_gen: v6e
topology: v6e:2x2x1
jax: 0.10.0
libtpu: 0.0.40
codegen_flags: <defaults>
</compile_context>

<pallas_src>
import functools
import math
import numpy as np
import jax
import jax.numpy as jnp
from jax import lax
from jax.experimental import pallas as pl
from jax.experimental.pallas import tpu as pltpu


# ----------------------------------------------------------------------------
# Tokenizer / biological mappings (host-side, pure python, replicates PyTorch)
# ----------------------------------------------------------------------------
SPECIAL = ['[START]', '[END]', '[PAD]', '[UNK]', '[SEG]']
AMINO_ACIDS = ['A', 'R', 'S', 'I', 'L', 'G', 'V', 'T', 'P', 'N', 'D', 'C', 'Q',
               'E', 'H', 'K', 'F', 'Y', 'M', 'W', '*']
CODONS = [''.join([n1, n2, n3]) for n1 in 'UCAG' for n2 in 'UCAG' for n3 in 'UCAG']
TOKENS = SPECIAL + AMINO_ACIDS + CODONS
TOKEN_TO_ID = {t: i for i, t in enumerate(TOKENS)}
PAD_IDX = TOKEN_TO_ID['[PAD]']
UNK_IDX = TOKEN_TO_ID['[UNK]']
VOCAB_SIZE = len(TOKENS)  # 90

LANE = 128
V_PAD = ((VOCAB_SIZE + LANE - 1) // LANE) * LANE  # 128 (lane-dense output stores)

AA_TO_CODON = {
    'A': ['GCU', 'GCC', 'GCA', 'GCG'], 'R': ['CGU', 'CGC', 'CGA', 'CGG', 'AGA', 'AGG'],
    'S': ['UCU', 'UCC', 'UCA', 'UCG', 'AGU', 'AGC'], 'I': ['AUU', 'AUC', 'AUA'],
    'L': ['UUA', 'UUG', 'CUU', 'CUC', 'CUA', 'CUG'], 'G': ['GGU', 'GGC', 'GGA', 'GGG'],
    'V': ['GUU', 'GUC', 'GUA', 'GUG'], 'T': ['ACU', 'ACC', 'ACA', 'ACG'],
    'P': ['CCU', 'CCC', 'CCA', 'CCG'], 'N': ['AAU', 'AAC'], 'D': ['GAU', 'GAC'],
    'C': ['UGU', 'UGC'], 'Q': ['CAA', 'CAG'], 'E': ['GAA', 'GAG'], 'H': ['CAU', 'CAC'],
    'K': ['AAA', 'AAG'], 'F': ['UUU', 'UUC'], 'Y': ['UAU', 'UAC'], 'M': ['AUG'],
    'W': ['UGG'], '*': ['UAG', 'UGA', 'UAA'],
}


def build_aa_to_codon_mask_table() -> np.ndarray:
    """Row t is the (128-lane padded) codon-mask for token id t."""
    table = np.zeros((VOCAB_SIZE, V_PAD), dtype=np.float32)
    for aa, codons in AA_TO_CODON.items():
        aa_id = TOKEN_TO_ID.get(aa, UNK_IDX)
        for codon in codons:
            cid = TOKEN_TO_ID.get(codon, UNK_IDX)
            if cid != UNK_IDX:
                table[aa_id, cid] = 1.0
    return table


# ----------------------------------------------------------------------------
# Small helpers
# ----------------------------------------------------------------------------
def _tile(n, cap=256):
    """Largest multiple-of-8 divisor of n that is <= cap (falls back to full n)."""
    best = None
    t = 8
    while t <= min(n, cap):
        if n % t == 0:
            best = t
        t += 8
    return best if best is not None else n


def _lane_tile(n, cap=512):
    """Largest multiple-of-128 divisor of n that is <= cap, else the full n.

    Used for tile sizes that land on the *last* dim of a BlockSpec (so the block is either
    lane-tile aligned or the full array dim)."""
    best = n
    t = LANE
    while t <= min(n, cap):
        if n % t == 0:
            best = t
        t += LANE
    return best


def _vmem_limit_bytes():
    """~7/8 of physical VMEM: ≈56 MiB on v7x (64 MiB), ≈112 MiB on v5e/v6e (128 MiB)."""
    try:
        cap = pltpu.get_tpu_info().vmem_capacity_bytes
    except Exception:
        cap = 64 * 1024 * 1024  # conservative fallback (safe on every generation)
    return int(cap * 7 // 8)


def _cparams(dims):
    return pltpu.CompilerParams(dimension_semantics=dims,
                                vmem_limit_bytes=_vmem_limit_bytes())


# ----------------------------------------------------------------------------
# Single-buffering of constant-index operands (probed once, outside jit)
# ----------------------------------------------------------------------------
_BUFFERED1_OK = None


def _probe_single_buffering():
    """Check (eagerly, once) whether pipeline_mode=pl.Buffered(1) works on this JAX/TPU."""
    global _BUFFERED1_OK
    if _BUFFERED1_OK is not None:
        return _BUFFERED1_OK
    try:
        def _k(x_ref, w_ref, o_ref):
            o_ref[...] = x_ref[...] + w_ref[...]

        const = pl.BlockSpec((8, 128), lambda i: (0, 0), pipeline_mode=pl.Buffered(1))
        f = pl.pallas_call(
            _k,
            out_shape=jax.ShapeDtypeStruct((16, 128), jnp.float32),
            grid=(2,),
            in_specs=[pl.BlockSpec((8, 128), lambda i: (i, 0)), const],
            out_specs=pl.BlockSpec((8, 128), lambda i: (i, 0)),
        )
        x = jnp.arange(16 * 128, dtype=jnp.float32).reshape(16, 128)
        w = jnp.ones((8, 128), jnp.float32)
        out = jax.block_until_ready(f(x, w))
        _BUFFERED1_OK = bool(jnp.allclose(out, x + 1.0))
    except Exception:
        _BUFFERED1_OK = False
    return _BUFFERED1_OK


def _const_spec(shape, index_map):
    """BlockSpec for operands whose block index never changes: single-buffered when
    supported (the second pipeline buffer is pure VMEM waste for constants)."""
    if _BUFFERED1_OK:
        return pl.BlockSpec(shape, index_map, pipeline_mode=pl.Buffered(1))
    return pl.BlockSpec(shape, index_map)


# ----------------------------------------------------------------------------
# Kernel 1: row-tiled linear (dim_trans) -> bf16 activations
# ----------------------------------------------------------------------------
def _linear_kernel(x_ref, w_ref, b_ref, o_ref):
    o_ref[...] = (jnp.dot(x_ref[...].astype(jnp.bfloat16), w_ref[...],
                          preferred_element_type=jnp.float32)
                  + b_ref[...]).astype(o_ref.dtype)


def dim_trans(x, w_bf, b):
    n, d_in = x.shape
    d_out = w_bf.shape[1]
    tile = _tile(n, 1024)
    return pl.pallas_call(
        _linear_kernel,
        out_shape=jax.ShapeDtypeStruct((n, d_out), jnp.bfloat16),
        grid_spec=pltpu.PrefetchScalarGridSpec(
            num_scalar_prefetch=0, grid=(n // tile,),
            in_specs=[pl.BlockSpec((tile, d_in), lambda i: (i, 0)),
                      _const_spec((d_in, d_out), lambda i: (0, 0)),
                      _const_spec((1, d_out), lambda i: (0, 0))],
            out_specs=pl.BlockSpec((tile, d_out), lambda i: (i, 0))),
        compiler_params=_cparams(("parallel",)),
    )(x, w_bf, b)


# ----------------------------------------------------------------------------
# Kernel 2: fused attention block (Q/KV proj + flash attention + out proj + add+LN)
# grid = (batch 'parallel', q-tile 'parallel', kv-tile 'arbitrary')
# ----------------------------------------------------------------------------
def _attn_kernel(xq_ref, xkv_ref, bias_ref, wq_ref, bq_ref, wkv_ref, bkv_ref,
                 wo_ref, bo_ref, g_ref, be_ref, y_ref,
                 q_sc, m_sc, l_sc, acc_sc, *, nhead, scale):
    kv = pl.program_id(2)
    d = xq_ref.shape[2]
    dh = d // nhead

    @pl.when(kv == 0)
    def _init():
        # Q projection once per (batch, q-tile); 1/sqrt(dh) folded into q.
        q = (jnp.dot(xq_ref[0], wq_ref[...], preferred_element_type=jnp.float32)
             + bq_ref[...]) * scale                               # [tq, d] f32
        for h in range(nhead):                                    # split heads without transpose
            q_sc[h] = q[:, h * dh:(h + 1) * dh].astype(jnp.bfloat16)
        m_sc[...] = jnp.full_like(m_sc, -1e30)
        l_sc[...] = jnp.zeros_like(l_sc)
        acc_sc[...] = jnp.zeros_like(acc_sc)

    # fused K/V projection for this KV tile
    kvp = jnp.dot(xkv_ref[0], wkv_ref[...],
                  preferred_element_type=jnp.float32) + bkv_ref[...]   # [tkv, 2d]
    k_all = kvp[:, :d].astype(jnp.bfloat16)
    v_all = kvp[:, d:].astype(jnp.bfloat16)
    bias = bias_ref[0]                                                 # [1, tkv] key-pad bias

    # per-head online-softmax update: static python loop keeps every matmul 2-D and
    # avoids jnp.transpose relayouts of q / the f32 accumulator.
    for h in range(nhead):
        lo, hi = h * dh, (h + 1) * dh
        q_h = q_sc[h]                                                  # [tq, dh] bf16
        k_h = k_all[:, lo:hi]
        v_h = v_all[:, lo:hi]
        s_h = lax.dot_general(q_h, k_h, (((1,), (1,)), ((), ())),
                              preferred_element_type=jnp.float32) + bias   # [tq, tkv]
        m_prev = m_sc[h]
        m_new = jnp.maximum(m_prev, jnp.max(s_h, axis=-1, keepdims=True))
        alpha = jnp.exp(m_prev - m_new)
        p = jnp.exp(s_h - m_new)
        l_sc[h] = alpha * l_sc[h] + jnp.sum(p, axis=-1, keepdims=True)
        acc_sc[h] = alpha * acc_sc[h] + jnp.dot(p.astype(jnp.bfloat16), v_h,
                                                preferred_element_type=jnp.float32)
        m_sc[h] = m_new

    @pl.when(kv == pl.num_programs(2) - 1)
    def _finalize():
        # merged-head output projection as per-head dots (no transpose of the accumulator)
        out = bo_ref[...]                                              # [1, d] -> broadcast
        for h in range(nhead):
            o_h = acc_sc[h] * pl.reciprocal(l_sc[h], approx=True)      # [tq, dh]
            out = out + jnp.dot(o_h.astype(jnp.bfloat16),
                                wo_ref[h * dh:(h + 1) * dh, :],
                                preferred_element_type=jnp.float32)
        z = xq_ref[0].astype(jnp.float32) + out                        # post-norm residual
        mean = jnp.mean(z, axis=-1, keepdims=True)
        var = jnp.mean((z - mean) ** 2, axis=-1, keepdims=True)
        y_ref[0] = (g_ref[...] * (z - mean) * lax.rsqrt(var + 1e-5)
                    + be_ref[...]).astype(y_ref.dtype)


def attention_block(x, bias, layer, *, nhead):
    b, s, d = x.shape
    dh = d // nhead
    tq = _tile(s, 256)
    tkv = _lane_tile(s, 512)   # multiple of 128 or full S (bias block has tkv on the lane dim)
    scale = 1.0 / math.sqrt(dh)
    kernel = functools.partial(_attn_kernel, nhead=nhead, scale=scale)
    return pl.pallas_call(
        kernel,
        out_shape=jax.ShapeDtypeStruct((b, s, d), jnp.bfloat16),
        grid_spec=pltpu.PrefetchScalarGridSpec(
            num_scalar_prefetch=0, grid=(b, s // tq, s // tkv),
            in_specs=[
                # x is passed twice because the query view and KV view are tiled differently
                # (query tiling keeps per-step VMEM bounded at large S).
                pl.BlockSpec((1, tq, d), lambda ib, qi, kv: (ib, qi, 0)),   # queries / residual
                pl.BlockSpec((1, tkv, d), lambda ib, qi, kv: (ib, kv, 0)),  # KV tile
                pl.BlockSpec((1, 1, tkv), lambda ib, qi, kv: (ib, 0, kv)),  # key-padding bias
                _const_spec((d, d), lambda ib, qi, kv: (0, 0)),             # wq (bf16)
                _const_spec((1, d), lambda ib, qi, kv: (0, 0)),             # bq
                _const_spec((d, 2 * d), lambda ib, qi, kv: (0, 0)),         # wkv (bf16, K|V)
                _const_spec((1, 2 * d), lambda ib, qi, kv: (0, 0)),         # bkv
                _const_spec((d, d), lambda ib, qi, kv: (0, 0)),             # wo (bf16)
                _const_spec((1, d), lambda ib, qi, kv: (0, 0)),             # bo
                _const_spec((1, d), lambda ib, qi, kv: (0, 0)),             # ln1 gamma
                _const_spec((1, d), lambda ib, qi, kv: (0, 0)),             # ln1 beta
            ],
            out_specs=pl.BlockSpec((1, tq, d), lambda ib, qi, kv: (ib, qi, 0)),
            scratch_shapes=[
                pltpu.VMEM((nhead, tq, dh), jnp.bfloat16),   # q (scaled, per head)
                pltpu.VMEM((nhead, tq, 1), jnp.float32),     # running max
                pltpu.VMEM((nhead, tq, 1), jnp.float32),     # running denom
                pltpu.VMEM((nhead, tq, dh), jnp.float32),    # accumulator
            ]),
        compiler_params=_cparams(("parallel", "parallel", "arbitrary")),
    )(x, x, bias, layer['wq'], layer['bq'], layer['wkv'], layer['bkv'],
      layer['wo'], layer['bo'], layer['ln1_g'], layer['ln1_b'])


# ----------------------------------------------------------------------------
# Kernel 3: fused MoE block (router + softmax + top-k gating + expert FFN + add+LN)
# grid = (row-tile 'parallel', expert 'arbitrary', ff-chunk 'arbitrary'):
# only ONE expert-weight slice is resident / double-buffered at a time.
# ----------------------------------------------------------------------------
def _moe_kernel(x_ref, rw_ref, rb_ref, w1_ref, b1_ref, w2_ref, b2_ref,
                g_ref, be_ref, y_ref, rl_ref, gates_sc, acc_sc, *, top_k):
    e = pl.program_id(1)
    f = pl.program_id(2)
    e_pad = rw_ref.shape[-1]          # padded router width (multiple of 128)

    @pl.when(jnp.logical_and(e == 0, f == 0))
    def _route():
        rl = jnp.dot(x_ref[...], rw_ref[...],
                     preferred_element_type=jnp.float32) + rb_ref[...]   # [tile, e_pad]
        rl_ref[...] = rl                                                 # lane-dense store
        # softmax over experts (padded columns carry -1e30 bias -> prob 0); exact division
        m = jnp.max(rl, axis=-1, keepdims=True)
        p = jnp.exp(rl - m)
        probs = p / jnp.sum(p, axis=-1, keepdims=True)
        # top-k gating, first-occurrence tie-break, renormalized over selected experts
        iota = lax.broadcasted_iota(jnp.int32, probs.shape, 1)
        gates = jnp.zeros_like(probs)
        work = probs
        for _ in range(top_k):
            mx = jnp.max(work, axis=-1, keepdims=True)
            is_max = work >= mx
            first_idx = jnp.min(jnp.where(is_max, iota, e_pad), axis=-1, keepdims=True)
            sel = iota == first_idx
            gates = jnp.where(sel, probs, gates)
            work = jnp.where(sel, -1.0, work)
        gates_sc[...] = gates / jnp.sum(gates, axis=-1, keepdims=True)
        acc_sc[...] = jnp.zeros_like(acc_sc)

    # contribution of expert `e`, ff-chunk `f` (x already bf16: no per-step casts)
    iota = lax.broadcasted_iota(jnp.int32, gates_sc.shape, 1)
    g_e = jnp.sum(jnp.where(iota == e, gates_sc[...], 0.0), axis=-1, keepdims=True)  # [tile,1]
    h = jnp.maximum(jnp.dot(x_ref[...], w1_ref[0],
                            preferred_element_type=jnp.float32) + b1_ref[0], 0.0)    # [tile,ffc]
    ye = jnp.dot(h.astype(jnp.bfloat16), w2_ref[0],
                 preferred_element_type=jnp.float32)                                 # [tile, d]
    ye = ye + (f == 0).astype(jnp.float32) * b2_ref[0]     # expert bias once per expert
    acc_sc[...] += g_e * ye

    @pl.when(jnp.logical_and(e == pl.num_programs(1) - 1, f == pl.num_programs(2) - 1))
    def _finalize():
        z = x_ref[...].astype(jnp.float32) + acc_sc[...]
        mean = jnp.mean(z, axis=-1, keepdims=True)
        var = jnp.mean((z - mean) ** 2, axis=-1, keepdims=True)
        y_ref[...] = (g_ref[...] * (z - mean) * lax.rsqrt(var + 1e-5)
                      + be_ref[...]).astype(y_ref.dtype)


def moe_block(x, layer, *, top_k):
    n, d = x.shape
    num_experts, _, ff = layer['moe_w1'].shape
    e_pad = layer['router_w'].shape[1]
    tile = _tile(n, 512)
    ffc = _lane_tile(ff, 2048)            # ff-chunking keeps one expert-weight *slice* resident
    kernel = functools.partial(_moe_kernel, top_k=top_k)
    y, rl = pl.pallas_call(
        kernel,
        out_shape=(jax.ShapeDtypeStruct((n, d), jnp.bfloat16),
                   jax.ShapeDtypeStruct((n, e_pad), jnp.float32)),
        grid_spec=pltpu.PrefetchScalarGridSpec(
            num_scalar_prefetch=0, grid=(n // tile, num_experts, ff // ffc),
            in_specs=[
                pl.BlockSpec((tile, d), lambda i, e, f: (i, 0)),        # x (bf16)
                _const_spec((d, e_pad), lambda i, e, f: (0, 0)),        # router_w (bf16, padded)
                _const_spec((1, e_pad), lambda i, e, f: (0, 0)),        # router_b (padded -1e30)
                pl.BlockSpec((1, d, ffc), lambda i, e, f: (e, 0, f)),   # expert w1 chunk (bf16)
                pl.BlockSpec((1, 1, ffc), lambda i, e, f: (e, 0, f)),   # expert b1 chunk
                pl.BlockSpec((1, ffc, d), lambda i, e, f: (e, f, 0)),   # expert w2 chunk (bf16)
                pl.BlockSpec((1, 1, d), lambda i, e, f: (e, 0, 0)),     # expert b2
                _const_spec((1, d), lambda i, e, f: (0, 0)),            # ln2 gamma
                _const_spec((1, d), lambda i, e, f: (0, 0)),            # ln2 beta
            ],
            out_specs=(pl.BlockSpec((tile, d), lambda i, e, f: (i, 0)),
                       pl.BlockSpec((tile, e_pad), lambda i, e, f: (i, 0))),
            scratch_shapes=[pltpu.VMEM((tile, e_pad), jnp.float32),   # gates
                            pltpu.VMEM((tile, d), jnp.float32)]),      # accumulator
        compiler_params=_cparams(("parallel", "arbitrary", "arbitrary")),
    )(x, layer['router_w'], layer['router_b'],
      layer['moe_w1'], layer['moe_b1'], layer['moe_w2'], layer['moe_b2'],
      layer['ln2_g'], layer['ln2_b'])
    return y, rl[:, :num_experts]


# ----------------------------------------------------------------------------
# Kernel 4: fused mRNA output head (Linear -> LayerNorm -> ReLU -> Linear -> mask fill)
# ----------------------------------------------------------------------------
def _head_kernel(x_ref, w1_ref, b1_ref, g_ref, be_ref, w2_ref, b2_ref, mask_ref, o_ref):
    h = jnp.dot(x_ref[...], w1_ref[...],
                preferred_element_type=jnp.float32) + b1_ref[...]
    mean = jnp.mean(h, axis=-1, keepdims=True)
    var = jnp.mean((h - mean) ** 2, axis=-1, keepdims=True)
    h = g_ref[...] * (h - mean) * lax.rsqrt(var + 1e-5) + be_ref[...]
    h = jnp.maximum(h, 0.0)                       # ReLU; dropout identity in eval mode
    logits = jnp.dot(h.astype(jnp.bfloat16), w2_ref[...],
                     preferred_element_type=jnp.float32) + b2_ref[...]
    o_ref[...] = jnp.where(mask_ref[...] > 0.5, logits, jnp.float32(-60000.0))


def mrna_head(x, w1_bf, b1, gamma, beta, w2p_bf, b2p, maskp):
    n, d = x.shape
    dh = w1_bf.shape[1]
    vpad = w2p_bf.shape[1]
    tile = _tile(n, 1024)
    return pl.pallas_call(
        _head_kernel,
        out_shape=jax.ShapeDtypeStruct((n, vpad), jnp.float32),
        grid_spec=pltpu.PrefetchScalarGridSpec(
            num_scalar_prefetch=0, grid=(n // tile,),
            in_specs=[
                pl.BlockSpec((tile, d), lambda i: (i, 0)),          # x (bf16)
                _const_spec((d, dh), lambda i: (0, 0)),
                _const_spec((1, dh), lambda i: (0, 0)),
                _const_spec((1, dh), lambda i: (0, 0)),
                _const_spec((1, dh), lambda i: (0, 0)),
                _const_spec((dh, vpad), lambda i: (0, 0)),
                _const_spec((1, vpad), lambda i: (0, 0)),
                pl.BlockSpec((tile, vpad), lambda i: (i, 0)),       # codon mask (bf16)
            ],
            out_specs=pl.BlockSpec((tile, vpad), lambda i: (i, 0))),
        compiler_params=_cparams(("parallel",)),
    )(x, w1_bf, b1, gamma, beta, w2p_bf, b2p, maskp)


# ----------------------------------------------------------------------------
# Parameter init (module-equivalent f32) + kernel-ready preparation
# ----------------------------------------------------------------------------
def init_params(key, *, esm2_dim, d_model, nhead, num_layers, dim_ff,
                num_experts, vocab_size):
    def nrm(k, shape, scale=0.02):
        return scale * jax.random.normal(k, shape, dtype=jnp.float32)

    keys = iter(jax.random.split(key, 8 + num_layers * 16))
    p = {
        'dim_trans_w': nrm(next(keys), (esm2_dim, d_model)),
        'dim_trans_b': jnp.zeros((d_model,), jnp.float32),
        'layers': [],
        'head_w1': nrm(next(keys), (d_model, d_model // 2)),
        'head_b1': jnp.zeros((d_model // 2,), jnp.float32),
        'head_ln_g': jnp.ones((d_model // 2,), jnp.float32),
        'head_ln_b': jnp.zeros((d_model // 2,), jnp.float32),
        'head_w2': nrm(next(keys), (d_model // 2, vocab_size)),
        'head_b2': jnp.zeros((vocab_size,), jnp.float32),
    }
    for _ in range(num_layers):
        layer = {
            'wq': nrm(next(keys), (d_model, d_model)), 'bq': jnp.zeros((d_model,), jnp.float32),
            'wk': nrm(next(keys), (d_model, d_model)), 'bk': jnp.zeros((d_model,), jnp.float32),
            'wv': nrm(next(keys), (d_model, d_model)), 'bv': jnp.zeros((d_model,), jnp.float32),
            'wo': nrm(next(keys), (d_model, d_model)), 'bo': jnp.zeros((d_model,), jnp.float32),
            'ln1_g': jnp.ones((d_model,), jnp.float32), 'ln1_b': jnp.zeros((d_model,), jnp.float32),
            'ln2_g': jnp.ones((d_model,), jnp.float32), 'ln2_b': jnp.zeros((d_model,), jnp.float32),
            'router_w': nrm(next(keys), (d_model, num_experts)),
            'router_b': jnp.zeros((num_experts,), jnp.float32),
            'moe_w1': nrm(next(keys), (num_experts, d_model, dim_ff)),
            'moe_b1': jnp.zeros((num_experts, dim_ff), jnp.float32),
            'moe_w2': nrm(next(keys), (num_experts, dim_ff, d_model)),
            'moe_b2': jnp.zeros((num_experts, d_model), jnp.float32),
        }
        p['layers'].append(layer)
    return p


def prepare_params(p):
    """One-time prep: fuse K|V weights, cast matmul weights to bf16, pad router/vocab dims."""
    bf = lambda a: a.astype(jnp.bfloat16)
    vpad = V_PAD - p['head_w2'].shape[1]
    out = {
        'dim_trans_w': bf(p['dim_trans_w']),
        'dim_trans_b': p['dim_trans_b'].reshape(1, -1),
        'layers': [],
        'head_w1': bf(p['head_w1']),
        'head_b1': p['head_b1'].reshape(1, -1),
        'head_ln_g': p['head_ln_g'].reshape(1, -1),
        'head_ln_b': p['head_ln_b'].reshape(1, -1),
        'head_w2': bf(jnp.pad(p['head_w2'], ((0, 0), (0, vpad)))),
        'head_b2': jnp.pad(p['head_b2'], (0, vpad)).reshape(1, -1),
    }
    for L in p['layers']:
        num_experts = L['router_w'].shape[1]
        e_pad = ((num_experts + LANE - 1) // LANE) * LANE
        rw = jnp.pad(L['router_w'], ((0, 0), (0, e_pad - num_experts)))
        rb = jnp.pad(L['router_b'], (0, e_pad - num_experts), constant_values=-1e30)
        out['layers'].append({
            'wq': bf(L['wq']), 'bq': L['bq'].reshape(1, -1),
            'wkv': bf(jnp.concatenate([L['wk'], L['wv']], axis=1)),
            'bkv': jnp.concatenate([L['bk'], L['bv']], axis=0).reshape(1, -1),
            'wo': bf(L['wo']), 'bo': L['bo'].reshape(1, -1),
            'ln1_g': L['ln1_g'].reshape(1, -1), 'ln1_b': L['ln1_b'].reshape(1, -1),
            'ln2_g': L['ln2_g'].reshape(1, -1), 'ln2_b': L['ln2_b'].reshape(1, -1),
            'router_w': bf(rw), 'router_b': rb.reshape(1, -1),
            'moe_w1': bf(L['moe_w1']), 'moe_b1': L['moe_b1'][:, None, :],
            'moe_w2': bf(L['moe_w2']), 'moe_b2': L['moe_b2'][:, None, :],
        })
    return out


# ----------------------------------------------------------------------------
# Full forward
# ----------------------------------------------------------------------------
def forward(prep, tok_ids, esm2_feats, mask_table_p, *, nhead, top_k):
    """Returns (mrna_logits [B,S,V], router_logits_list, entropy_loss)."""
    b, s = tok_ids.shape
    d_model = prep['dim_trans_w'].shape[1]
    n = b * s

    attn_bias = jnp.where(tok_ids == PAD_IDX, -1e9, 0.0).astype(jnp.float32)[:, None, :]  # [B,1,S]

    x = dim_trans(esm2_feats.reshape(n, -1), prep['dim_trans_w'], prep['dim_trans_b'])

    router_logits_list = []
    entropies = []
    for layer in prep['layers']:
        x = attention_block(x.reshape(b, s, d_model), attn_bias, layer,
                            nhead=nhead).reshape(n, d_model)
        x, rl = moe_block(x, layer, top_k=top_k)
        router_logits_list.append(rl.reshape(b, s, -1))
        probs = jax.nn.softmax(rl, axis=-1)
        entropies.append(jnp.mean(-jnp.sum(probs * jnp.log(probs + 1e-9), axis=-1)))

    entropy_loss = jnp.mean(jnp.stack(entropies))

    # TODO(synk): the codon-mask gather could move in-kernel via scalar-prefetched tok_ids.
    aa_mask = mask_table_p[tok_ids.reshape(-1)]                      # [B*S, V_PAD] bf16
    logits_p = mrna_head(x, prep['head_w1'], prep['head_b1'], prep['head_ln_g'],
                         prep['head_ln_b'], prep['head_w2'], prep['head_b2'], aa_mask)
    logits = logits_p[:, :VOCAB_SIZE].reshape(b, s, VOCAB_SIZE)
    return logits, router_logits_list, entropy_loss


# ----------------------------------------------------------------------------
if __name__ == "__main__":
    # small config consistent with the module's constructor
    batch, seq = 2, 8
    d_model, nhead, num_layers = 32, 4, 2
    dim_ff, esm2_dim = 64, 48
    num_experts, top_k = 4, 2

    # probe (eagerly, before jit) whether single-buffering constant weights is supported
    _probe_single_buffering()

    key = jax.random.PRNGKey(0)
    k_param, k_tok, k_esm = jax.random.split(key, 3)

    raw_params = init_params(k_param, esm2_dim=esm2_dim, d_model=d_model, nhead=nhead,
                             num_layers=num_layers, dim_ff=dim_ff,
                             num_experts=num_experts, vocab_size=VOCAB_SIZE)
    prep = prepare_params(raw_params)

    # tokenized protein ids: amino-acid tokens (ids 5..25), with trailing padding
    tok_ids = jax.random.randint(k_tok, (batch, seq), 5, 5 + len(AMINO_ACIDS),
                                 dtype=jnp.int32)
    tok_ids = tok_ids.at[:, -2:].set(PAD_IDX)

    esm2_feats = jax.random.normal(k_esm, (batch, seq, esm2_dim), dtype=jnp.float32)
    mask_table_p = jnp.asarray(build_aa_to_codon_mask_table()).astype(jnp.bfloat16)

    fwd = jax.jit(functools.partial(forward, nhead=nhead, top_k=top_k))
    logits, router_logits_list, entropy_loss = fwd(prep, tok_ids, esm2_feats, mask_table_p)

    jax.block_until_ready(logits)
    jax.block_until_ready(entropy_loss)
    for rl in router_logits_list:
        jax.block_until_ready(rl)

    assert logits.shape == (batch, seq, VOCAB_SIZE)
    assert logits.dtype == jnp.float32
    assert len(router_logits_list) == num_layers
    assert all(rl.shape == (batch, seq, num_experts) for rl in router_logits_list)
    assert np.isfinite(float(entropy_loss))
    print("KERNEL_OK")
</pallas_src>

<mosaic_0001>
module attributes {stable_mosaic.version = 11 : i64} {
  func.func @_k(%arg0: i32, %arg1: memref<8x128xf32, #tpu.memory_space<vmem>>, %arg2: memref<8x128xf32, #tpu.memory_space<vmem>>, %arg3: memref<8x128xf32, #tpu.memory_space<vmem>>) attributes {dimension_semantics = [#tpu.dimension_semantics<arbitrary>], iteration_bounds = array<i64: 2>, scalar_prefetch = 0 : i64, scratch_operands = 0 : i64, tpu.core_type = #tpu.core_type<tc>, window_params = [{transform_indices = @transform_0, window_bounds = array<i64: 8, 128>}, {pipeline_mode = #tpu.pipeline_mode<synchronous>, transform_indices = @transform_1, window_bounds = array<i64: 8, 128>}, {transform_indices = @transform_2, window_bounds = array<i64: 8, 128>}]} {
    %c0 = arith.constant 0 : index
    %c0_0 = arith.constant 0 : index
    %0 = vector.load %arg1[%c0, %c0_0] : memref<8x128xf32, #tpu.memory_space<vmem>>, vector<8x128xf32>
    %c0_1 = arith.constant 0 : index
    %c0_2 = arith.constant 0 : index
    %1 = vector.load %arg2[%c0_1, %c0_2] : memref<8x128xf32, #tpu.memory_space<vmem>>, vector<8x128xf32>
    %2 = arith.addf %0, %1 : vector<8x128xf32>
    %c0_3 = arith.constant 0 : index
    %c0_4 = arith.constant 0 : index
    %3 = vector.load %arg3[%c0_3, %c0_4] : memref<8x128xf32, #tpu.memory_space<vmem>>, vector<8x128xf32>
    tpu.vector_store %arg3[%c0_3, %c0_4], %2 {strides = array<i32>} : memref<8x128xf32, #tpu.memory_space<vmem>>, vector<8x128xf32>,
    return
  }
  func.func @transform_0(%arg0: i32) -> (i32, i32) {
    %c0_i32 = arith.constant 0 : i32
    %c0_i32_0 = arith.constant 0 : i32
    return %arg0, %c0_i32 : i32, i32
  }
  func.func @transform_1(%arg0: i32) -> (i32, i32) {
    %c0_i32 = arith.constant 0 : i32
    %c0_i32_0 = arith.constant 0 : i32
    %c0_i32_1 = arith.constant 0 : i32
    return %c0_i32, %c0_i32_0 : i32, i32
  }
  func.func @transform_2(%arg0: i32) -> (i32, i32) {
    %c0_i32 = arith.constant 0 : i32
    %c0_i32_0 = arith.constant 0 : i32
    return %arg0, %c0_i32 : i32, i32
  }
}

module attributes {stable_mosaic.version = 11 : i64} {
  func.func @_attn_kernel(%arg0: i32, %arg1: i32, %arg2: i32, %arg3: memref<1x8x32xbf16, #tpu.memory_space<vmem>>, %arg4: memref<1x8x32xbf16, #tpu.memory_space<vmem>>, %arg5: memref<1x1x8xf32, #tpu.memory_space<vmem>>, %arg6: memref<32x32xbf16, #tpu.memory_space<vmem>>, %arg7: memref<1x32xf32, #tpu.memory_space<vmem>>, %arg8: memref<32x64xbf16, #tpu.memory_space<vmem>>, %arg9: memref<1x64xf32, #tpu.memory_space<vmem>>, %arg10: memref<32x32xbf16, #tpu.memory_space<vmem>>, %arg11: memref<1x32xf32, #tpu.memory_space<vmem>>, %arg12: memref<1x32xf32, #tpu.memory_space<vmem>>, %arg13: memref<1x32xf32, #tpu.memory_space<vmem>>, %arg14: memref<1x8x32xbf16, #tpu.memory_space<vmem>>, %arg15: memref<4x8x8xbf16, #tpu.memory_space<vmem>>, %arg16: memref<4x8x1xf32, #tpu.memory_space<vmem>>, %arg17: memref<4x8x1xf32, #tpu.memory_space<vmem>>, %arg18: memref<4x8x8xf32, #tpu.memory_space<vmem>>) attributes {dimension_semantics = [#tpu.dimension_semantics<parallel>, #tpu.dimension_semantics<parallel>, #tpu.dimension_semantics<arbitrary>], iteration_bounds = array<i64: 2, 1, 1>, scalar_prefetch = 0 : i64, scratch_operands = 4 : i64, tpu.core_type = #tpu.core_type<tc>, window_params = [{transform_indices = @transform_0, window_bounds = array<i64: 1, 8, 32>}, {transform_indices = @transform_1, window_bounds = array<i64: 1, 8, 32>}, {transform_indices = @transform_2, window_bounds = array<i64: 1, 1, 8>}, {pipeline_mode = #tpu.pipeline_mode<synchronous>, transform_indices = @transform_3, window_bounds = array<i64: 32, 32>}, {pipeline_mode = #tpu.pipeline_mode<synchronous>, transform_indices = @transform_4, window_bounds = array<i64: 1, 32>}, {pipeline_mode = #tpu.pipeline_mode<synchronous>, transform_indices = @transform_5, window_bounds = array<i64: 32, 64>}, {pipeline_mode = #tpu.pipeline_mode<synchronous>, transform_indices = @transform_6, window_bounds = array<i64: 1, 64>}, {pipeline_mode = #tpu.pipeline_mode<synchronous>, transform_indices = @transform_7, window_bounds = array<i64: 32, 32>}, {pipeline_mode = #tpu.pipeline_mode<synchronous>, transform_indices = @transform_8, window_bounds = array<i64: 1, 32>}, {pipeline_mode = #tpu.pipeline_mode<synchronous>, transform_indices = @transform_9, window_bounds = array<i64: 1, 32>}, {pipeline_mode = #tpu.pipeline_mode<synchronous>, transform_indices = @transform_10, window_bounds = array<i64: 1, 32>}, {transform_indices = @transform_11, window_bounds = array<i64: 1, 8, 32>}]} {
    %c0_i32 = arith.constant 0 : i32
    %0 = arith.cmpi eq, %arg2, %c0_i32 : i32
    %1 = arith.extui %0 : i1 to i32
    %c0_i32_0 = arith.constant 0 : i32
    %2 = arith.cmpi ne, %1, %c0_i32_0 : i32
    scf.if %2 {
      %c0_109 = arith.constant 0 : index
      %c0_110 = arith.constant 0 : index
      %c0_111 = arith.constant 0 : index
      %175 = vector.load %arg3[%c0_109, %c0_110, %c0_111] : memref<1x8x32xbf16, #tpu.memory_space<vmem>>, vector<1x8x32xbf16>
      %176 = vector.shape_cast %175 : vector<1x8x32xbf16> to vector<8x32xbf16>
      %c0_112 = arith.constant 0 : index
      %c0_113 = arith.constant 0 : index
      %177 = vector.load %arg6[%c0_112, %c0_113] : memref<32x32xbf16, #tpu.memory_space<vmem>>, vector<32x32xbf16>
      %cst_114 = arith.constant dense<0.000000e+00> : vector<8x32xf32>
      %178 = tpu.matmul %176, %177, %cst_114 {dimension_numbers = #tpu.dot_dimension_numbers<[1], [0], [0], [1], [0, 0, 1, 1], [], []>} : vector<8x32xbf16>, vector<32x32xbf16>, vector<8x32xf32> -> vector<8x32xf32>
      %c0_115 = arith.constant 0 : index
      %c0_116 = arith.constant 0 : index
      %179 = vector.load %arg7[%c0_115, %c0_116] : memref<1x32xf32, #tpu.memory_space<vmem>>, vector<1x32xf32>
      %180 = vector.broadcast %179 : vector<1x32xf32> to vector<8x32xf32>
      %181 = arith.addf %178, %180 : vector<8x32xf32>
      %cst_117 = arith.constant 0.353553385 : f32
      %182 = vector.broadcast %cst_117 : f32 to vector<8x32xf32>
      %183 = arith.mulf %181, %182 : vector<8x32xf32>
      %184 = vector.extract_strided_slice %183 {offsets = [0, 0], sizes = [8, 8], strides = [1, 1]} : vector<8x32xf32> to vector<8x8xf32>
      %185 = arith.truncf %184 : vector<8x8xf32> to vector<8x8xbf16>
      %c0_118 = arith.constant 0 : index
      %c0_119 = arith.constant 0 : index
      %c0_120 = arith.constant 0 : index
      %186 = vector.load %arg15[%c0_118, %c0_119, %c0_120] : memref<4x8x8xbf16, #tpu.memory_space<vmem>>, vector<1x8x8xbf16>
      %187 = vector.shape_cast %186 : vector<1x8x8xbf16> to vector<8x8xbf16>
      %188 = vector.shape_cast %185 : vector<8x8xbf16> to vector<1x8x8xbf16>
      tpu.vector_store %arg15[%c0_118, %c0_119, %c0_120], %188 {strides = array<i32>} : memref<4x8x8xbf16, #tpu.memory_space<vmem>>, vector<1x8x8xbf16>,
      %189 = vector.extract_strided_slice %183 {offsets = [0, 8], sizes = [8, 8], strides = [1, 1]} : vector<8x32xf32> to vector<8x8xf32>
      %190 = arith.truncf %189 : vector<8x8xf32> to vector<8x8xbf16>
      %c1_121 = arith.constant 1 : index
      %c0_122 = arith.constant 0 : index
      %c0_123 = arith.constant 0 : index
      %191 = vector.load %arg15[%c1_121, %c0_122, %c0_123] : memref<4x8x8xbf16, #tpu.memory_space<vmem>>, vector<1x8x8xbf16>
      %192 = vector.shape_cast %191 : vector<1x8x8xbf16> to vector<8x8xbf16>
      %193 = vector.shape_cast %190 : vector<8x8xbf16> to vector<1x8x8xbf16>
      tpu.vector_store %arg15[%c1_121, %c0_122, %c0_123], %193 {strides = array<i32>} : memref<4x8x8xbf16, #tpu.memory_space<vmem>>, vector<1x8x8xbf16>,
      %194 = vector.extract_strided_slice %183 {offsets = [0, 16], sizes = [8, 8], strides = [1, 1]} : vector<8x32xf32> to vector<8x8xf32>
      %195 = arith.truncf %194 : vector<8x8xf32> to vector<8x8xbf16>
      %c2_124 = arith.constant 2 : index
      %c0_125 = arith.constant 0 : index
      %c0_126 = arith.constant 0 : index
      %196 = vector.load %arg15[%c2_124, %c0_125, %c0_126] : memref<4x8x8xbf16, #tpu.memory_space<vmem>>, vector<1x8x8xbf16>
      %197 = vector.shape_cast %196 : vector<1x8x8xbf16> to vector<8x8xbf16>
      %198 = vector.shape_cast %195 : vector<8x8xbf16> to vector<1x8x8xbf16>
      tpu.vector_store %arg15[%c2_124, %c0_125, %c0_126], %198 {strides = array<i32>} : memref<4x8x8xbf16, #tpu.memory_space<vmem>>, vector<1x8x8xbf16>,
      %199 = vector.extract_strided_slice %183 {offsets = [0, 24], sizes = [8, 8], strides = [1, 1]} : vector<8x32xf32> to vector<8x8xf32>
      %200 = arith.truncf %199 : vector<8x8xf32> to vector<8x8xbf16>
      %c3_127 = arith.constant 3 : index
      %c0_128 = arith.constant 0 : index
      %c0_129 = arith.constant 0 : index
      %201 = vector.load %arg15[%c3_127, %c0_128, %c0_129] : memref<4x8x8xbf16, #tpu.memory_space<vmem>>, vector<1x8x8xbf16>
      %202 = vector.shape_cast %201 : vector<1x8x8xbf16> to vector<8x8xbf16>
      %203 = vector.shape_cast %200 : vector<8x8xbf16> to vector<1x8x8xbf16>
      tpu.vector_store %arg15[%c3_127, %c0_128, %c0_129], %203 {strides = array<i32>} : memref<4x8x8xbf16, #tpu.memory_space<vmem>>, vector<1x8x8xbf16>,
      %cst_130 = arith.constant -1.000000e+30 : f32
      %204 = vector.broadcast %cst_130 : f32 to vector<4x8x1xf32>
      %c0_131 = arith.constant 0 : index
      %c0_132 = arith.constant 0 : index
      %c0_133 = arith.constant 0 : index
      %205 = vector.load %arg16[%c0_131, %c0_132, %c0_133] : memref<4x8x1xf32, #tpu.memory_space<vmem>>, vector<4x8x1xf32>
      tpu.vector_store %arg16[%c0_131, %c0_132, %c0_133], %204 {strides = array<i32>} : memref<4x8x1xf32, #tpu.memory_space<vmem>>, vector<4x8x1xf32>,
      %cst_134 = arith.constant 0.000000e+00 : f32
      %206 = vector.broadcast %cst_134 : f32 to vector<4x8x1xf32>
      %c0_135 = arith.constant 0 : index
      %c0_136 = arith.constant 0 : index
      %c0_137 = arith.constant 0 : index
      %207 = vector.load %arg17[%c0_135, %c0_136, %c0_137] : memref<4x8x1xf32, #tpu.memory_space<vmem>>, vector<4x8x1xf32>
      tpu.vector_store %arg17[%c0_135, %c0_136, %c0_137], %206 {strides = array<i32>} : memref<4x8x1xf32, #tpu.memory_space<vmem>>, vector<4x8x1xf32>,
      %cst_138 = arith.constant 0.000000e+00 : f32
      %208 = vector.broadcast %cst_138 : f32 to vector<4x8x8xf32>
      %c0_139 = arith.constant 0 : index
      %c0_140 = arith.constant 0 : index
      %c0_141 = arith.constant 0 : index
      %209 = vector.load %arg18[%c0_139, %c0_140, %c0_141] : memref<4x8x8xf32, #tpu.memory_space<vmem>>, vector<4x8x8xf32>
      tpu.vector_store %arg18[%c0_139, %c0_140, %c0_141], %208 {strides = array<i32>} : memref<4x8x8xf32, #tpu.memory_space<vmem>>, vector<4x8x8xf32>,
    } else {
    }
    %c0 = arith.constant 0 : index
    %c0_1 = arith.constant 0 : index
    %c0_2 = arith.constant 0 : index
    %3 = vector.load %arg4[%c0, %c0_1, %c0_2] : memref<1x8x32xbf16, #tpu.memory_space<vmem>>, vector<1x8x32xbf16>
    %4 = vector.shape_cast %3 : vector<1x8x32xbf16> to vector<8x32xbf16>
    %c0_3 = arith.constant 0 : index
    %c0_4 = arith.constant 0 : index
    %5 = vector.load %arg8[%c0_3, %c0_4] : memref<32x64xbf16, #tpu.memory_space<vmem>>, vector<32x64xbf16>
    %cst = arith.constant dense<0.000000e+00> : vector<8x64xf32>
    %6 = tpu.matmul %4, %5, %cst {dimension_numbers = #tpu.dot_dimension_numbers<[1], [0], [0], [1], [0, 0, 1, 1], [], []>} : vector<8x32xbf16>, vector<32x64xbf16>, vector<8x64xf32> -> vector<8x64xf32>
    %c0_5 = arith.constant 0 : index
    %c0_6 = arith.constant 0 : index
    %7 = vector.load %arg9[%c0_5, %c0_6] : memref<1x64xf32, #tpu.memory_space<vmem>>, vector<1x64xf32>
    %8 = vector.broadcast %7 : vector<1x64xf32> to vector<8x64xf32>
    %9 = arith.addf %6, %8 : vector<8x64xf32>
    %10 = vector.extract_strided_slice %9 {offsets = [0, 0], sizes = [8, 32], strides = [1, 1]} : vector<8x64xf32> to vector<8x32xf32>
    %11 = arith.truncf %10 : vector<8x32xf32> to vector<8x32xbf16>
    %12 = vector.extract_strided_slice %9 {offsets = [0, 32], sizes = [8, 32], strides = [1, 1]} : vector<8x64xf32> to vector<8x32xf32>
    %13 = arith.truncf %12 : vector<8x32xf32> to vector<8x32xbf16>
    %c0_7 = arith.constant 0 : index
    %c0_8 = arith.constant 0 : index
    %c0_9 = arith.constant 0 : index
    %14 = vector.load %arg5[%c0_7, %c0_8, %c0_9] : memref<1x1x8xf32, #tpu.memory_space<vmem>>, vector<1x1x8xf32>
    %15 = vector.shape_cast %14 : vector<1x1x8xf32> to vector<1x8xf32>
    %c0_10 = arith.constant 0 : index
    %c0_11 = arith.constant 0 : index
    %c0_12 = arith.constant 0 : index
    %16 = vector.load %arg15[%c0_10, %c0_11, %c0_12] : memref<4x8x8xbf16, #tpu.memory_space<vmem>>, vector<1x8x8xbf16>
    %17 = vector.shape_cast %16 : vector<1x8x8xbf16> to vector<8x8xbf16>
    %18 = vector.extract_strided_slice %11 {offsets = [0, 0], sizes = [8, 8], strides = [1, 1]} : vector<8x32xbf16> to vector<8x8xbf16>
    %19 = vector.extract_strided_slice %13 {offsets = [0, 0], sizes = [8, 8], strides = [1, 1]} : vector<8x32xbf16> to vector<8x8xbf16>
    %cst_13 = arith.constant dense<0.000000e+00> : vector<8x8xf32>
    %20 = tpu.matmul %17, %18, %cst_13 {dimension_numbers = #tpu.dot_dimension_numbers<[1], [1], [0], [0], [0, 0, 1, 0], [], []>} : vector<8x8xbf16>, vector<8x8xbf16>, vector<8x8xf32> -> vector<8x8xf32>
    %21 = vector.broadcast %15 : vector<1x8xf32> to vector<8x8xf32>
    %22 = arith.addf %20, %21 : vector<8x8xf32>
    %c0_14 = arith.constant 0 : index
    %c0_15 = arith.constant 0 : index
    %c0_16 = arith.constant 0 : index
    %23 = vector.load %arg16[%c0_14, %c0_15, %c0_16] : memref<4x8x1xf32, #tpu.memory_space<vmem>>, vector<1x8x1xf32>
    %24 = vector.shape_cast %23 : vector<1x8x1xf32> to vector<8x1xf32>
    %cst_17 = arith.constant dense<0xFF800000> : vector<8xf32>
    %25 = vector.multi_reduction <maximumf>, %22, %cst_17 [1] : vector<8x8xf32> to vector<8xf32>
    %26 = vector.shape_cast %25 : vector<8xf32> to vector<8x1xf32>
    %27 = arith.maximumf %24, %26 : vector<8x1xf32>
    %28 = arith.subf %24, %27 : vector<8x1xf32>
    %29 = math.exp %28 : vector<8x1xf32>
    %30 = vector.broadcast %27 : vector<8x1xf32> to vector<8x8xf32>
    %31 = arith.subf %22, %30 : vector<8x8xf32>
    %32 = math.exp %31 : vector<8x8xf32>
    %c0_18 = arith.constant 0 : index
    %c0_19 = arith.constant 0 : index
    %c0_20 = arith.constant 0 : index
    %33 = vector.load %arg17[%c0_18, %c0_19, %c0_20] : memref<4x8x1xf32, #tpu.memory_space<vmem>>, vector<1x8x1xf32>
    %34 = vector.shape_cast %33 : vector<1x8x1xf32> to vector<8x1xf32>
    %35 = arith.mulf %29, %34 : vector<8x1xf32>
    %cst_21 = arith.constant dense<0.000000e+00> : vector<8xf32>
    %36 = vector.multi_reduction <add>, %32, %cst_21 [1] : vector<8x8xf32> to vector<8xf32>
    %37 = vector.shape_cast %36 : vector<8xf32> to vector<8x1xf32>
    %38 = arith.addf %35, %37 : vector<8x1xf32>
    %c0_22 = arith.constant 0 : index
    %c0_23 = arith.constant 0 : index
    %c0_24 = arith.constant 0 : index
    %39 = vector.load %arg17[%c0_22, %c0_23, %c0_24] : memref<4x8x1xf32, #tpu.memory_space<vmem>>, vector<1x8x1xf32>
    %40 = vector.shape_cast %39 : vector<1x8x1xf32> to vector<8x1xf32>
    %41 = vector.shape_cast %38 : vector<8x1xf32> to vector<1x8x1xf32>
    tpu.vector_store %arg17[%c0_22, %c0_23, %c0_24], %41 {strides = array<i32>} : memref<4x8x1xf32, #tpu.memory_space<vmem>>, vector<1x8x1xf32>,
    %c0_25 = arith.constant 0 : index
    %c0_26 = arith.constant 0 : index
    %c0_27 = arith.constant 0 : index
    %42 = vector.load %arg18[%c0_25, %c0_26, %c0_27] : memref<4x8x8xf32, #tpu.memory_space<vmem>>, vector<1x8x8xf32>
    %43 = vector.shape_cast %42 : vector<1x8x8xf32> to vector<8x8xf32>
    %44 = vector.broadcast %29 : vector<8x1xf32> to vector<8x8xf32>
    %45 = arith.mulf %44, %43 : vector<8x8xf32>
    %46 = arith.truncf %32 : vector<8x8xf32> to vector<8x8xbf16>
    %cst_28 = arith.constant dense<0.000000e+00> : vector<8x8xf32>
    %47 = tpu.matmul %46, %19, %cst_28 {dimension_numbers = #tpu.dot_dimension_numbers<[1], [0], [0], [1], [0, 0, 1, 1], [], []>} : vector<8x8xbf16>, vector<8x8xbf16>, vector<8x8xf32> -> vector<8x8xf32>
    %48 = arith.addf %45, %47 : vector<8x8xf32>
    %c0_29 = arith.constant 0 : index
    %c0_30 = arith.constant 0 : index
    %c0_31 = arith.constant 0 : index
    %49 = vector.load %arg18[%c0_29, %c0_30, %c0_31] : memref<4x8x8xf32, #tpu.memory_space<vmem>>, vector<1x8x8xf32>
    %50 = vector.shape_cast %49 : vector<1x8x8xf32> to vector<8x8xf32>
    %51 = vector.shape_cast %48 : vector<8x8xf32> to vector<1x8x8xf32>
    tpu.vector_store %arg18[%c0_29, %c0_30, %c0_31], %51 {strides = array<i32>} : memref<4x8x8xf32, #tpu.memory_space<vmem>>, vector<1x8x8xf32>,
    %c0_32 = arith.constant 0 : index
    %c0_33 = arith.constant 0 : index
    %c0_34 = arith.constant 0 : index
    %52 = vector.load %arg16[%c0_32, %c0_33, %c0_34] : memref<4x8x1xf32, #tpu.memory_space<vmem>>, vector<1x8x1xf32>
    %53 = vector.shape_cast %52 : vector<1x8x1xf32> to vector<8x1xf32>
    %54 = vector.shape_cast %27 : vector<8x1xf32> to vector<1x8x1xf32>
    tpu.vector_store %arg16[%c0_32, %c0_33, %c0_34], %54 {strides = array<i32>} : memref<4x8x1xf32, #tpu.memory_space<vmem>>, vector<1x8x1xf32>,
    %c1 = arith.constant 1 : index
    %c0_35 = arith.constant 0 : index
    %c0_36 = arith.constant 0 : index
    %55 = vector.load %arg15[%c1, %c0_35, %c0_36] : memref<4x8x8xbf16, #tpu.memory_space<vmem>>, vector<1x8x8xbf16>
    %56 = vector.shape_cast %55 : vector<1x8x8xbf16> to vector<8x8xbf16>
    %57 = vector.extract_strided_slice %11 {offsets = [0, 8], sizes = [8, 8], strides = [1, 1]} : vector<8x32xbf16> to vector<8x8xbf16>
    %58 = vector.extract_strided_slice %13 {offsets = [0, 8], sizes = [8, 8], strides = [1, 1]} : vector<8x32xbf16> to vector<8x8xbf16>
    %cst_37 = arith.constant dense<0.000000e+00> : vector<8x8xf32>
    %59 = tpu.matmul %56, %57, %cst_37 {dimension_numbers = #tpu.dot_dimension_numbers<[1], [1], [0], [0], [0, 0, 1, 0], [], []>} : vector<8x8xbf16>, vector<8x8xbf16>, vector<8x8xf32> -> vector<8x8xf32>
    %60 = vector.broadcast %15 : vector<1x8xf32> to vector<8x8xf32>
    %61 = arith.addf %59, %60 : vector<8x8xf32>
    %c1_38 = arith.constant 1 : index
    %c0_39 = arith.constant 0 : index
    %c0_40 = arith.constant 0 : index
    %62 = vector.load %arg16[%c1_38, %c0_39, %c0_40] : memref<4x8x1xf32, #tpu.memory_space<vmem>>, vector<1x8x1xf32>
    %63 = vector.shape_cast %62 : vector<1x8x1xf32> to vector<8x1xf32>
    %cst_41 = arith.constant dense<0xFF800000> : vector<8xf32>
    %64 = vector.multi_reduction <maximumf>, %61, %cst_41 [1] : vector<8x8xf32> to vector<8xf32>
    %65 = vector.shape_cast %64 : vector<8xf32> to vector<8x1xf32>
    %66 = arith.maximumf %63, %65 : vector<8x1xf32>
    %67 = arith.subf %63, %66 : vector<8x1xf32>
    %68 = math.exp %67 : vector<8x1xf32>
    %69 = vector.broadcast %66 : vector<8x1xf32> to vector<8x8xf32>
    %70 = arith.subf %61, %69 : vector<8x8xf32>
    %71 = math.exp %70 : vector<8x8xf32>
    %c1_42 = arith.constant 1 : index
    %c0_43 = arith.constant 0 : index
    %c0_44 = arith.constant 0 : index
    %72 = vector.load %arg17[%c1_42, %c0_43, %c0_44] : memref<4x8x1xf32, #tpu.memory_space<vmem>>, vector<1x8x1xf32>
    %73 = vector.shape_cast %72 : vector<1x8x1xf32> to vector<8x1xf32>
    %74 = arith.mulf %68, %73 : vector<8x1xf32>
    %cst_45 = arith.constant dense<0.000000e+00> : vector<8xf32>
    %75 = vector.multi_reduction <add>, %71, %cst_45 [1] : vector<8x8xf32> to vector<8xf32>
    %76 = vector.shape_cast %75 : vector<8xf32> to vector<8x1xf32>
    %77 = arith.addf %74, %76 : vector<8x1xf32>
    %c1_46 = arith.constant 1 : index
    %c0_47 = arith.constant 0 : index
    %c0_48 = arith.constant 0 : index
    %78 = vector.load %arg17[%c1_46, %c0_47, %c0_48] : memref<4x8x1xf32, #tpu.memory_space<vmem>>, vector<1x8x1xf32>
    %79 = vector.shape_cast %78 : vector<1x8x1xf32> to vector<8x1xf32>
    %80 = vector.shape_cast %77 : vector<8x1xf32> to vector<1x8x1xf32>
    tpu.vector_store %arg17[%c1_46, %c0_47, %c0_48], %80 {strides = array<i32>} : memref<4x8x1xf32, #tpu.memory_space<vmem>>, vector<1x8x1xf32>,
    %c1_49 = arith.constant 1 : index
    %c0_50 = arith.constant 0 : index
    %c0_51 = arith.constant 0 : index
    %81 = vector.load %arg18[%c1_49, %c0_50, %c0_51] : memref<4x8x8xf32, #tpu.memory_space<vmem>>, vector<1x8x8xf32>
    %82 = vector.shape_cast %81 : vector<1x8x8xf32> to vector<8x8xf32>
    %83 = vector.broadcast %68 : vector<8x1xf32> to vector<8x8xf32>
    %84 = arith.mulf %83, %82 : vector<8x8xf32>
    %85 = arith.truncf %71 : vector<8x8xf32> to vector<8x8xbf16>
    %cst_52 = arith.constant dense<0.000000e+00> : vector<8x8xf32>
    %86 = tpu.matmul %85, %58, %cst_52 {dimension_numbers = #tpu.dot_dimension_numbers<[1], [0], [0], [1], [0, 0, 1, 1], [], []>} : vector<8x8xbf16>, vector<8x8xbf16>, vector<8x8xf32> -> vector<8x8xf32>
    %87 = arith.addf %84, %86 : vector<8x8xf32>
    %c1_53 = arith.constant 1 : index
    %c0_54 = arith.constant 0 : index
    %c0_55 = arith.constant 0 : index
    %88 = vector.load %arg18[%c1_53, %c0_54, %c0_55] : memref<4x8x8xf32, #tpu.memory_space<vmem>>, vector<1x8x8xf32>
    %89 = vector.shape_cast %88 : vector<1x8x8xf32> to vector<8x8xf32>
    %90 = vector.shape_cast %87 : vector<8x8xf32> to vector<1x8x8xf32>
    tpu.vector_store %arg18[%c1_53, %c0_54, %c0_55], %90 {strides = array<i32>} : memref<4x8x8xf32, #tpu.memory_space<vmem>>, vector<1x8x8xf32>,
    %c1_56 = arith.constant 1 : index
    %c0_57 = arith.constant 0 : index
    %c0_58 = arith.constant 0 : index
    %91 = vector.load %arg16[%c1_56, %c0_57, %c0_58] : memref<4x8x1xf32, #tpu.memory_space<vmem>>, vector<1x8x1xf32>
    %92 = vector.shape_cast %91 : vector<1x8x1xf32> to vector<8x1xf32>
    %93 = vector.shape_cast %66 : vector<8x1xf32> to vector<1x8x1xf32>
    tpu.vector_store %arg16[%c1_56, %c0_57, %c0_58], %93 {strides = array<i32>} : memref<4x8x1xf32, #tpu.memory_space<vmem>>, vector<1x8x1xf32>,
    %c2 = arith.constant 2 : index
    %c0_59 = arith.constant 0 : index
    %c0_60 = arith.constant 0 : index
    %94 = vector.load %arg15[%c2, %c0_59, %c0_60] : memref<4x8x8xbf16, #tpu.memory_space<vmem>>, vector<1x8x8xbf16>
    %95 = vector.shape_cast %94 : vector<1x8x8xbf16> to vector<8x8xbf16>
    %96 = vector.extract_strided_slice %11 {offsets = [0, 16], sizes = [8, 8], strides = [1, 1]} : vector<8x32xbf16> to vector<8x8xbf16>
    %97 = vector.extract_strided_slice %13 {offsets = [0, 16], sizes = [8, 8], strides = [1, 1]} : vector<8x32xbf16> to vector<8x8xbf16>
    %cst_61 = arith.constant dense<0.000000e+00> : vector<8x8xf32>
    %98 = tpu.matmul %95, %96, %cst_61 {dimension_numbers = #tpu.dot_dimension_numbers<[1], [1], [0], [0], [0, 0, 1, 0], [], []>} : vector<8x8xbf16>, vector<8x8xbf16>, vector<8x8xf32> -> vector<8x8xf32>
    %99 = vector.broadcast %15 : vector<1x8xf32> to vector<8x8xf32>
    %100 = arith.addf %98, %99 : vector<8x8xf32>
    %c2_62 = arith.constant 2 : index
    %c0_63 = arith.constant 0 : index
    %c0_64 = arith.constant 0 : index
    %101 = vector.load %arg16[%c2_62, %c0_63, %c0_64] : memref<4x8x1xf32, #tpu.memory_space<vmem>>, vector<1x8x1xf32>
    %102 = vector.shape_cast %101 : vector<1x8x1xf32> to vector<8x1xf32>
    %cst_65 = arith.constant dense<0xFF800000> : vector<8xf32>
    %103 = vector.multi_reduction <maximumf>, %100, %cst_65 [1] : vector<8x8xf32> to vector<8xf32>
    %104 = vector.shape_cast %103 : vector<8xf32> to vector<8x1xf32>
    %105 = arith.maximumf %102, %104 : vector<8x1xf32>
    %106 = arith.subf %102, %105 : vector<8x1xf32>
    %107 = math.exp %106 : vector<8x1xf32>
    %108 = vector.broadcast %105 : vector<8x1xf32> to vector<8x8xf32>
    %109 = arith.subf %100, %108 : vector<8x8xf32>
    %110 = math.exp %109 : vector<8x8xf32>
    %c2_66 = arith.constant 2 : index
    %c0_67 = arith.constant 0 : index
    %c0_68 = arith.constant 0 : index
    %111 = vector.load %arg17[%c2_66, %c0_67, %c0_68] : memref<4x8x1xf32, #tpu.memory_space<vmem>>, vector<1x8x1xf32>
    %112 = vector.shape_cast %111 : vector<1x8x1xf32> to vector<8x1xf32>
    %113 = arith.mulf %107, %112 : vector<8x1xf32>
    %cst_69 = arith.constant dense<0.000000e+00> : vector<8xf32>
    %114 = vector.multi_reduction <add>, %110, %cst_69 [1] : vector<8x8xf32> to vector<8xf32>
    %115 = vector.shape_cast %114 : vector<8xf32> to vector<8x1xf32>
    %116 = arith.addf %113, %115 : vector<8x1xf32>
    %c2_70 = arith.constant 2 : index
    %c0_71 = arith.constant 0 : index
    %c0_72 = arith.constant 0 : index
    %117 = vector.load %arg17[%c2_70, %c0_71, %c0_72] : memref<4x8x1xf32, #tpu.memory_space<vmem>>, vector<1x8x1xf32>
    %118 = vector.shape_cast %117 : vector<1x8x1xf32> to vector<8x1xf32>
    %119 = vector.shape_cast %116 : vector<8x1xf32> to vector<1x8x1xf32>
    tpu.vector_store %arg17[%c2_70, %c0_71, %c0_72], %119 {strides = array<i32>} : memref<4x8x1xf32, #tpu.memory_space<vmem>>, vector<1x8x1xf32>,
    %c2_73 = arith.constant 2 : index
    %c0_74 = arith.constant 0 : index
    %c0_75 = arith.constant 0 : index
    %120 = vector.load %arg18[%c2_73, %c0_74, %c0_75] : memref<4x8x8xf32, #tpu.memory_space<vmem>>, vector<1x8x8xf32>
    %121 = vector.shape_cast %120 : vector<1x8x8xf32> to vector<8x8xf32>
    %122 = vector.broadcast %107 : vector<8x1xf32> to vector<8x8xf32>
    %123 = arith.mulf %122, %121 : vector<8x8xf32>
    %124 = arith.truncf %110 : vector<8x8xf32> to vector<8x8xbf16>
    %cst_76 = arith.constant dense<0.000000e+00> : vector<8x8xf32>
    %125 = tpu.matmul %124, %97, %cst_76 {dimension_numbers = #tpu.dot_dimension_numbers<[1], [0], [0], [1], [0, 0, 1, 1], [], []>} : vector<8x8xbf16>, vector<8x8xbf16>, vector<8x8xf32> -> vector<8x8xf32>
    %126 = arith.addf %123, %125 : vector<8x8xf32>
    %c2_77 = arith.constant 2 : index
    %c0_78 = arith.constant 0 : index
    %c0_79 = arith.constant 0 : index
    %127 = vector.load %arg18[%c2_77, %c0_78, %c0_79] : memref<4x8x8xf32, #tpu.memory_space<vmem>>, vector<1x8x8xf32>
    %128 = vector.shape_cast %127 : vector<1x8x8xf32> to vector<8x8xf32>
    %129 = vector.shape_cast %126 : vector<8x8xf32> to vector<1x8x8xf32>
    tpu.vector_store %arg18[%c2_77, %c0_78, %c0_79], %129 {strides = array<i32>} : memref<4x8x8xf32, #tpu.memory_space<vmem>>, vector<1x8x8xf32>,
    %c2_80 = arith.constant 2 : index
    %c0_81 = arith.constant 0 : index
    %c0_82 = arith.constant 0 : index
    %130 = vector.load %arg16[%c2_80, %c0_81, %c0_82] : memref<4x8x1xf32, #tpu.memory_space<vmem>>, vector<1x8x1xf32>
    %131 = vector.shape_cast %130 : vector<1x8x1xf32> to vector<8x1xf32>
    %132 = vector.shape_cast %105 : vector<8x1xf32> to vector<1x8x1xf32>
    tpu.vector_store %arg16[%c2_80, %c0_81, %c0_82], %132 {strides = array<i32>} : memref<4x8x1xf32, #tpu.memory_space<vmem>>, vector<1x8x1xf32>,
    %c3 = arith.constant 3 : index
    %c0_83 = arith.constant 0 : index
    %c0_84 = arith.constant 0 : index
    %133 = vector.load %arg15[%c3, %c0_83, %c0_84] : memref<4x8x8xbf16, #tpu.memory_space<vmem>>, vector<1x8x8xbf16>
    %134 = vector.shape_cast %133 : vector<1x8x8xbf16> to vector<8x8xbf16>
    %135 = vector.extract_strided_slice %11 {offsets = [0, 24], sizes = [8, 8], strides = [1, 1]} : vector<8x32xbf16> to vector<8x8xbf16>
    %136 = vector.extract_strided_slice %13 {offsets = [0, 24], sizes = [8, 8], strides = [1, 1]} : vector<8x32xbf16> to vector<8x8xbf16>
    %cst_85 = arith.constant dense<0.000000e+00> : vector<8x8xf32>
    %137 = tpu.matmul %134, %135, %cst_85 {dimension_numbers = #tpu.dot_dimension_numbers<[1], [1], [0], [0], [0, 0, 1, 0], [], []>} : vector<8x8xbf16>, vector<8x8xbf16>, vector<8x8xf32> -> vector<8x8xf32>
    %138 = vector.broadcast %15 : vector<1x8xf32> to vector<8x8xf32>
    %139 = arith.addf %137, %138 : vector<8x8xf32>
    %c3_86 = arith.constant 3 : index
    %c0_87 = arith.constant 0 : index
    %c0_88 = arith.constant 0 : index
    %140 = vector.load %arg16[%c3_86, %c0_87, %c0_88] : memref<4x8x1xf32, #tpu.memory_space<vmem>>, vector<1x8x1xf32>
    %141 = vector.shape_cast %140 : vector<1x8x1xf32> to vector<8x1xf32>
    %cst_89 = arith.constant dense<0xFF800000> : vector<8xf32>
    %142 = vector.multi_reduction <maximumf>, %139, %cst_89 [1] : vector<8x8xf32> to vector<8xf32>
    %143 = vector.shape_cast %142 : vector<8xf32> to vector<8x1xf32>
    %144 = arith.maximumf %141, %143 : vector<8x1xf32>
    %145 = arith.subf %141, %144 : vector<8x1xf32>
    %146 = math.exp %145 : vector<8x1xf32>
    %147 = vector.broadcast %144 : vector<8x1xf32> to vector<8x8xf32>
    %148 = arith.subf %139, %147 : vector<8x8xf32>
    %149 = math.exp %148 : vector<8x8xf32>
    %c3_90 = arith.constant 3 : index
    %c0_91 = arith.constant 0 : index
    %c0_92 = arith.constant 0 : index
    %150 = vector.load %arg17[%c3_90, %c0_91, %c0_92] : memref<4x8x1xf32, #tpu.memory_space<vmem>>, vector<1x8x1xf32>
    %151 = vector.shape_cast %150 : vector<1x8x1xf32> to vector<8x1xf32>
    %152 = arith.mulf %146, %151 : vector<8x1xf32>
    %cst_93 = arith.constant dense<0.000000e+00> : vector<8xf32>
    %153 = vector.multi_reduction <add>, %149, %cst_93 [1] : vector<8x8xf32> to vector<8xf32>
    %154 = vector.shape_cast %153 : vector<8xf32> to vector<8x1xf32>
    %155 = arith.addf %152, %154 : vector<8x1xf32>
    %c3_94 = arith.constant 3 : index
    %c0_95 = arith.constant 0 : index
    %c0_96 = arith.constant 0 : index
    %156 = vector.load %arg17[%c3_94, %c0_95, %c0_96] : memref<4x8x1xf32, #tpu.memory_space<vmem>>, vector<1x8x1xf32>
    %157 = vector.shape_cast %156 : vector<1x8x1xf32> to vector<8x1xf32>
    %158 = vector.shape_cast %155 : vector<8x1xf32> to vector<1x8x1xf32>
    tpu.vector_store %arg17[%c3_94, %c0_95, %c0_96], %158 {strides = array<i32>} : memref<4x8x1xf32, #tpu.memory_space<vmem>>, vector<1x8x1xf32>,
    %c3_97 = arith.constant 3 : index
    %c0_98 = arith.constant 0 : index
    %c0_99 = arith.constant 0 : index
    %159 = vector.load %arg18[%c3_97, %c0_98, %c0_99] : memref<4x8x8xf32, #tpu.memory_space<vmem>>, vector<1x8x8xf32>
    %160 = vector.shape_cast %159 : vector<1x8x8xf32> to vector<8x8xf32>
    %161 = vector.broadcast %146 : vector<8x1xf32> to vector<8x8xf32>
    %162 = arith.mulf %161, %160 : vector<8x8xf32>
    %163 = arith.truncf %149 : vector<8x8xf32> to vector<8x8xbf16>
    %cst_100 = arith.constant dense<0.000000e+00> : vector<8x8xf32>
    %164 = tpu.matmul %163, %136, %cst_100 {dimension_numbers = #tpu.dot_dimension_numbers<[1], [0], [0], [1], [0, 0, 1, 1], [], []>} : vector<8x8xbf16>, vector<8x8xbf16>, vector<8x8xf32> -> vector<8x8xf32>
    %165 = arith.addf %162, %164 : vector<8x8xf32>
    %c3_101 = arith.constant 3 : index
    %c0_102 = arith.constant 0 : index
    %c0_103 = arith.constant 0 : index
    %166 = vector.load %arg18[%c3_101, %c0_102, %c0_103] : memref<4x8x8xf32, #tpu.memory_space<vmem>>, vector<1x8x8xf32>
    %167 = vector.shape_cast %166 : vector<1x8x8xf32> to vector<8x8xf32>
    %168 = vector.shape_cast %165 : vector<8x8xf32> to vector<1x8x8xf32>
    tpu.vector_store %arg18[%c3_101, %c0_102, %c0_103], %168 {strides = array<i32>} : memref<4x8x8xf32, #tpu.memory_space<vmem>>, vector<1x8x8xf32>,
    %c3_104 = arith.constant 3 : index
    %c0_105 = arith.constant 0 : index
    %c0_106 = arith.constant 0 : index
    %169 = vector.load %arg16[%c3_104, %c0_105, %c0_106] : memref<4x8x1xf32, #tpu.memory_space<vmem>>, vector<1x8x1xf32>
    %170 = vector.shape_cast %169 : vector<1x8x1xf32> to vector<8x1xf32>
    %171 = vector.shape_cast %144 : vector<8x1xf32> to vector<1x8x1xf32>
    tpu.vector_store %arg16[%c3_104, %c0_105, %c0_106], %171 {strides = array<i32>} : memref<4x8x1xf32, #tpu.memory_space<vmem>>, vector<1x8x1xf32>,
    %c0_i32_107 = arith.constant 0 : i32
    %172 = arith.cmpi eq, %arg2, %c0_i32_107 : i32
    %173 = arith.extui %172 : i1 to i32
    %c0_i32_108 = arith.constant 0 : i32
    %174 = arith.cmpi ne, %173, %c0_i32_108 : i32
    scf.if %174 {
      %c0_109 = arith.constant 0 : index
      %c0_110 = arith.constant 0 : index
      %175 = vector.load %arg11[%c0_109, %c0_110] : memref<1x32xf32, #tpu.memory_space<vmem>>, vector<1x32xf32>
      %c0_111 = arith.constant 0 : index
      %c0_112 = arith.constant 0 : index
      %c0_113 = arith.constant 0 : index
      %176 = vector.load %arg18[%c0_111, %c0_112, %c0_113] : memref<4x8x8xf32, #tpu.memory_space<vmem>>, vector<1x8x8xf32>
      %177 = vector.shape_cast %176 : vector<1x8x8xf32> to vector<8x8xf32>
      %c0_114 = arith.constant 0 : index
      %c0_115 = arith.constant 0 : index
      %c0_116 = arith.constant 0 : index
      %178 = vector.load %arg17[%c0_114, %c0_115, %c0_116] : memref<4x8x1xf32, #tpu.memory_space<vmem>>, vector<1x8x1xf32>
      %179 = vector.shape_cast %178 : vector<1x8x1xf32> to vector<8x1xf32>
      %180 = tpu.reciprocal %179 {approx = true} : vector<8x1xf32> -> vector<8x1xf32>
      %181 = vector.broadcast %180 : vector<8x1xf32> to vector<8x8xf32>
      %182 = arith.mulf %177, %181 : vector<8x8xf32>
      %183 = arith.truncf %182 : vector<8x8xf32> to vector<8x8xbf16>
      %c0_117 = arith.constant 0 : index
      %c0_118 = arith.constant 0 : index
      %184 = vector.load %arg10[%c0_117, %c0_118] : memref<32x32xbf16, #tpu.memory_space<vmem>>, vector<8x32xbf16>
      %cst_119 = arith.constant dense<0.000000e+00> : vector<8x32xf32>
      %185 = tpu.matmul %183, %184, %cst_119 {dimension_numbers = #tpu.dot_dimension_numbers<[1], [0], [0], [1], [0, 0, 1, 1], [], []>} : vector<8x8xbf16>, vector<8x32xbf16>, vector<8x32xf32> -> vector<8x32xf32>
      %186 = vector.broadcast %175 : vector<1x32xf32> to vector<8x32xf32>
      %187 = arith.addf %186, %185 : vector<8x32xf32>
      %c1_120 = arith.constant 1 : index
      %c0_121 = arith.constant 0 : index
      %c0_122 = arith.constant 0 : index
      %188 = vector.load %arg18[%c1_120, %c0_121, %c0_122] : memref<4x8x8xf32, #tpu.memory_space<vmem>>, vector<1x8x8xf32>
      %189 = vector.shape_cast %188 : vector<1x8x8xf32> to vector<8x8xf32>
      %c1_123 = arith.constant 1 : index
      %c0_124 = arith.constant 0 : index
      %c0_125 = arith.constant 0 : index
      %190 = vector.load %arg17[%c1_123, %c0_124, %c0_125] : memref<4x8x1xf32, #tpu.memory_space<vmem>>, vector<1x8x1xf32>
      %191 = vector.shape_cast %190 : vector<1x8x1xf32> to vector<8x1xf32>
      %192 = tpu.reciprocal %191 {approx = true} : vector<8x1xf32> -> vector<8x1xf32>
      %193 = vector.broadcast %192 : vector<8x1xf32> to vector<8x8xf32>
      %194 = arith.mulf %189, %193 : vector<8x8xf32>
      %195 = arith.truncf %194 : vector<8x8xf32> to vector<8x8xbf16>
      %c8 = arith.constant 8 : index
      %c0_126 = arith.constant 0 : index
      %196 = vector.load %arg10[%c8, %c0_126] : memref<32x32xbf16, #tpu.memory_space<vmem>>, vector<8x32xbf16>
      %cst_127 = arith.constant dense<0.000000e+00> : vector<8x32xf32>
      %197 = tpu.matmul %195, %196, %cst_127 {dimension_numbers = #tpu.dot_dimension_numbers<[1], [0], [0], [1], [0, 0, 1, 1], [], []>} : vector<8x8xbf16>, vector<8x32xbf16>, vector<8x32xf32> -> vector<8x32xf32>
      %198 = arith.addf %187, %197 : vector<8x32xf32>
      %c2_128 = arith.constant 2 : index
      %c0_129 = arith.constant 0 : index
      %c0_130 = arith.constant 0 : index
      %199 = vector.load %arg18[%c2_128, %c0_129, %c0_130] : memref<4x8x8xf32, #tpu.memory_space<vmem>>, vector<1x8x8xf32>
      %200 = vector.shape_cast %199 : vector<1x8x8xf32> to vector<8x8xf32>
      %c2_131 = arith.constant 2 : index
      %c0_132 = arith.constant 0 : index
      %c0_133 = arith.constant 0 : index
      %201 = vector.load %arg17[%c2_131, %c0_132, %c0_133] : memref<4x8x1xf32, #tpu.memory_space<vmem>>, vector<1x8x1xf32>
      %202 = vector.shape_cast %201 : vector<1x8x1xf32> to vector<8x1xf32>
      %203 = tpu.reciprocal %202 {approx = true} : vector<8x1xf32> -> vector<8x1xf32>
      %204 = vector.broadcast %203 : vector<8x1xf32> to vector<8x8xf32>
      %205 = arith.mulf %200, %204 : vector<8x8xf32>
      %206 = arith.truncf %205 : vector<8x8xf32> to vector<8x8xbf16>
      %c16 = arith.constant 16 : index
      %c0_134 = arith.constant 0 : index
      %207 = vector.load %arg10[%c16, %c0_134] : memref<32x32xbf16, #tpu.memory_space<vmem>>, vector<8x32xbf16>
      %cst_135 = arith.constant dense<0.000000e+00> : vector<8x32xf32>
      %208 = tpu.matmul %206, %207, %cst_135 {dimension_numbers = #tpu.dot_dimension_numbers<[1], [0], [0], [1], [0, 0, 1, 1], [], []>} : vector<8x8xbf16>, vector<8x32xbf16>, vector<8x32xf32> -> vector<8x32xf32>
      %209 = arith.addf %198, %208 : vector<8x32xf32>
      %c3_136 = arith.constant 3 : index
      %c0_137 = arith.constant 0 : index
      %c0_138 = arith.constant 0 : index
      %210 = vector.load %arg18[%c3_136, %c0_137, %c0_138] : memref<4x8x8xf32, #tpu.memory_space<vmem>>, vector<1x8x8xf32>
      %211 = vector.shape_cast %210 : vector<1x8x8xf32> to vector<8x8xf32>
      %c3_139 = arith.constant 3 : index
      %c0_140 = arith.constant 0 : index
      %c0_141 = arith.constant 0 : index
      %212 = vector.load %arg17[%c3_139, %c0_140, %c0_141] : memref<4x8x1xf32, #tpu.memory_space<vmem>>, vector<1x8x1xf32>
      %213 = vector.shape_cast %212 : vector<1x8x1xf32> to vector<8x1xf32>
      %214 = tpu.reciprocal %213 {approx = true} : vector<8x1xf32> -> vector<8x1xf32>
      %215 = vector.broadcast %214 : vector<8x1xf32> to vector<8x8xf32>
      %216 = arith.mulf %211, %215 : vector<8x8xf32>
      %217 = arith.truncf %216 : vector<8x8xf32> to vector<8x8xbf16>
      %c24 = arith.constant 24 : index
      %c0_142 = arith.constant 0 : index
      %218 = vector.load %arg10[%c24, %c0_142] : memref<32x32xbf16, #tpu.memory_space<vmem>>, vector<8x32xbf16>
      %cst_143 = arith.constant dense<0.000000e+00> : vector<8x32xf32>
      %219 = tpu.matmul %217, %218, %cst_143 {dimension_numbers = #tpu.dot_dimension_numbers<[1], [0], [0], [1], [0, 0, 1, 1], [], []>} : vector<8x8xbf16>, vector<8x32xbf16>, vector<8x32xf32> -> vector<8x32xf32>
      %220 = arith.addf %209, %219 : vector<8x32xf32>
      %c0_144 = arith.constant 0 : index
      %c0_145 = arith.constant 0 : index
      %c0_146 = arith.constant 0 : index
      %221 = vector.load %arg3[%c0_144, %c0_145, %c0_146] : memref<1x8x32xbf16, #tpu.memory_space<vmem>>, vector<1x8x32xbf16>
      %222 = vector.shape_cast %221 : vector<1x8x32xbf16> to vector<8x32xbf16>
      %223 = arith.extf %222 : vector<8x32xbf16> to vector<8x32xf32>
      %224 = arith.addf %223, %220 : vector<8x32xf32>
      %cst_147 = arith.constant dense<0.000000e+00> : vector<8xf32>
      %225 = vector.multi_reduction <add>, %224, %cst_147 [1] : vector<8x32xf32> to vector<8xf32>
      %226 = vector.shape_cast %225 : vector<8xf32> to vector<8x1xf32>
      %cst_148 = arith.constant 3.200000e+01 : f32
      %227 = vector.broadcast %cst_148 : f32 to vector<8x1xf32>
      %228 = arith.divf %226, %227 : vector<8x1xf32>
      %229 = vector.broadcast %228 : vector<8x1xf32> to vector<8x32xf32>
      %230 = arith.subf %224, %229 : vector<8x32xf32>
      %231 = arith.mulf %230, %230 : vector<8x32xf32>
      %cst_149 = arith.constant dense<0.000000e+00> : vector<8xf32>
      %232 = vector.multi_reduction <add>, %231, %cst_149 [1] : vector<8x32xf32> to vector<8xf32>
      %233 = vector.shape_cast %232 : vector<8xf32> to vector<8x1xf32>
      %cst_150 = arith.constant 3.200000e+01 : f32
      %234 = vector.broadcast %cst_150 : f32 to vector<8x1xf32>
      %235 = arith.divf %233, %234 : vector<8x1xf32>
      %c0_151 = arith.constant 0 : index
      %c0_152 = arith.constant 0 : index
      %236 = vector.load %arg12[%c0_151, %c0_152] : memref<1x32xf32, #tpu.memory_space<vmem>>, vector<1x32xf32>
      %237 = vector.broadcast %228 : vector<8x1xf32> to vector<8x32xf32>
      %238 = arith.subf %224, %237 : vector<8x32xf32>
      %239 = vector.broadcast %236 : vector<1x32xf32> to vector<8x32xf32>
      %240 = arith.mulf %239, %238 : vector<8x32xf32>
      %cst_153 = arith.constant 9.99999974E-6 : f32
      %241 = vector.broadcast %cst_153 : f32 to vector<8x1xf32>
      %242 = arith.addf %235, %241 : vector<8x1xf32>
      %243 = math.rsqrt %242 : vector<8x1xf32>
      %244 = vector.broadcast %243 : vector<8x1xf32> to vector<8x32xf32>
      %245 = arith.mulf %240, %244 : vector<8x32xf32>
      %c0_154 = arith.constant 0 : index
      %c0_155 = arith.constant 0 : index
      %246 = vector.load %arg13[%c0_154, %c0_155] : memref<1x32xf32, #tpu.memory_space<vmem>>, vector<1x32xf32>
      %247 = vector.broadcast %246 : vector<1x32xf32> to vector<8x32xf32>
      %248 = arith.addf %245, %247 : vector<8x32xf32>
      %249 = arith.truncf %248 : vector<8x32xf32> to vector<8x32xbf16>
      %c0_156 = arith.constant 0 : index
      %c0_157 = arith.constant 0 : index
      %c0_158 = arith.constant 0 : index
      %250 = vector.load %arg14[%c0_156, %c0_157, %c0_158] : memref<1x8x32xbf16, #tpu.memory_space<vmem>>, vector<1x8x32xbf16>
      %251 = vector.shape_cast %250 : vector<1x8x32xbf16> to vector<8x32xbf16>
      %252 = vector.shape_cast %249 : vector<8x32xbf16> to vector<1x8x32xbf16>
      tpu.vector_store %arg14[%c0_156, %c0_157, %c0_158], %252 {strides = array<i32>} : memref<1x8x32xbf16, #tpu.memory_space<vmem>>, vector<1x8x32xbf16>,
    } else {
    }
    return
  }
  func.func @transform_0(%arg0: i32, %arg1: i32, %arg2: i32) -> (i32, i32, i32) {
    %c0_i32 = arith.constant 0 : i32
    %c0_i32_0 = arith.constant 0 : i32
    return %arg0, %arg1, %c0_i32 : i32, i32, i32
  }
  func.func @transform_1(%arg0: i32, %arg1: i32, %arg2: i32) -> (i32, i32, i32) {
    %c0_i32 = arith.constant 0 : i32
    %c0_i32_0 = arith.constant 0 : i32
    return %arg0, %arg2, %c0_i32 : i32, i32, i32
  }
  func.func @transform_2(%arg0: i32, %arg1: i32, %arg2: i32) -> (i32, i32, i32) {
    %c0_i32 = arith.constant 0 : i32
    %c0_i32_0 = arith.constant 0 : i32
    return %arg0, %c0_i32, %arg2 : i32, i32, i32
  }
  func.func @transform_3(%arg0: i32, %arg1: i32, %arg2: i32) -> (i32, i32) {
    %c0_i32 = arith.constant 0 : i32
    %c0_i32_0 = arith.constant 0 : i32
    %c0_i32_1 = arith.constant 0 : i32
    return %c0_i32, %c0_i32_0 : i32, i32
  }
  func.func @transform_4(%arg0: i32, %arg1: i32, %arg2: i32) -> (i32, i32) {
    %c0_i32 = arith.constant 0 : i32
    %c0_i32_0 = arith.constant 0 : i32
    %c0_i32_1 = arith.constant 0 : i32
    return %c0_i32, %c0_i32_0 : i32, i32
  }
  func.func @transform_5(%arg0: i32, %arg1: i32, %arg2: i32) -> (i32, i32) {
    %c0_i32 = arith.constant 0 : i32
    %c0_i32_0 = arith.constant 0 : i32
    %c0_i32_1 = arith.constant 0 : i32
    return %c0_i32, %c0_i32_0 : i32, i32
  }
  func.func @transform_6(%arg0: i32, %arg1: i32, %arg2: i32) -> (i32, i32) {
    %c0_i32 = arith.constant 0 : i32
    %c0_i32_0 = arith.constant 0 : i32
    %c0_i32_1 = arith.constant 0 : i32
    return %c0_i32, %c0_i32_0 : i32, i32
  }
  func.func @transform_7(%arg0: i32, %arg1: i32, %arg2: i32) -> (i32, i32) {
    %c0_i32 = arith.constant 0 : i32
    %c0_i32_0 = arith.constant 0 : i32
    %c0_i32_1 = arith.constant 0 : i32
    return %c0_i32, %c0_i32_0 : i32, i32
  }
  func.func @transform_8(%arg0: i32, %arg1: i32, %arg2: i32) -> (i32, i32) {
    %c0_i32 = arith.constant 0 : i32
    %c0_i32_0 = arith.constant 0 : i32
    %c0_i32_1 = arith.constant 0 : i32
    return %c0_i32, %c0_i32_0 : i32, i32
  }
  func.func @transform_9(%arg0: i32, %arg1: i32, %arg2: i32) -> (i32, i32) {
    %c0_i32 = arith.constant 0 : i32
    %c0_i32_0 = arith.constant 0 : i32
    %c0_i32_1 = arith.constant 0 : i32
    return %c0_i32, %c0_i32_0 : i32, i32
  }
  func.func @transform_10(%arg0: i32, %arg1: i32, %arg2: i32) -> (i32, i32) {
    %c0_i32 = arith.constant 0 : i32
    %c0_i32_0 = arith.constant 0 : i32
    %c0_i32_1 = arith.constant 0 : i32
    return %c0_i32, %c0_i32_0 : i32, i32
  }
  func.func @transform_11(%arg0: i32, %arg1: i32, %arg2: i32) -> (i32, i32, i32) {
    %c0_i32 = arith.constant 0 : i32
    %c0_i32_0 = arith.constant 0 : i32
    return %arg0, %arg1, %c0_i32 : i32, i32, i32
  }
}

module attributes {stable_mosaic.version = 11 : i64} {
  func.func @_linear_kernel(%arg0: i32, %arg1: memref<16x48xf32, #tpu.memory_space<vmem>>, %arg2: memref<48x32xbf16, #tpu.memory_space<vmem>>, %arg3: memref<1x32xf32, #tpu.memory_space<vmem>>, %arg4: memref<16x32xbf16, #tpu.memory_space<vmem>>) attributes {dimension_semantics = [#tpu.dimension_semantics<parallel>], iteration_bounds = array<i64: 1>, scalar_prefetch = 0 : i64, scratch_operands = 0 : i64, tpu.core_type = #tpu.core_type<tc>, window_params = [{transform_indices = @transform_0, window_bounds = array<i64: 16, 48>}, {pipeline_mode = #tpu.pipeline_mode<synchronous>, transform_indices = @transform_1, window_bounds = array<i64: 48, 32>}, {pipeline_mode = #tpu.pipeline_mode<synchronous>, transform_indices = @transform_2, window_bounds = array<i64: 1, 32>}, {transform_indices = @transform_3, window_bounds = array<i64: 16, 32>}]} {
    %c0 = arith.constant 0 : index
    %c0_0 = arith.constant 0 : index
    %0 = vector.load %arg1[%c0, %c0_0] : memref<16x48xf32, #tpu.memory_space<vmem>>, vector<16x48xf32>
    %1 = arith.truncf %0 : vector<16x48xf32> to vector<16x48xbf16>
    %c0_1 = arith.constant 0 : index
    %c0_2 = arith.constant 0 : index
    %2 = vector.load %arg2[%c0_1, %c0_2] : memref<48x32xbf16, #tpu.memory_space<vmem>>, vector<48x32xbf16>
    %cst = arith.constant dense<0.000000e+00> : vector<16x32xf32>
    %3 = tpu.matmul %1, %2, %cst {dimension_numbers = #tpu.dot_dimension_numbers<[1], [0], [0], [1], [0, 0, 1, 1], [], []>} : vector<16x48xbf16>, vector<48x32xbf16>, vector<16x32xf32> -> vector<16x32xf32>
    %c0_3 = arith.constant 0 : index
    %c0_4 = arith.constant 0 : index
    %4 = vector.load %arg3[%c0_3, %c0_4] : memref<1x32xf32, #tpu.memory_space<vmem>>, vector<1x32xf32>
    %5 = vector.broadcast %4 : vector<1x32xf32> to vector<16x32xf32>
    %6 = arith.addf %3, %5 : vector<16x32xf32>
    %7 = arith.truncf %6 : vector<16x32xf32> to vector<16x32xbf16>
    %c0_5 = arith.constant 0 : index
    %c0_6 = arith.constant 0 : index
    %8 = vector.load %arg4[%c0_5, %c0_6] : memref<16x32xbf16, #tpu.memory_space<vmem>>, vector<16x32xbf16>
    tpu.vector_store %arg4[%c0_5, %c0_6], %7 {strides = array<i32>} : memref<16x32xbf16, #tpu.memory_space<vmem>>, vector<16x32xbf16>,
    return
  }
  func.func @transform_0(%arg0: i32) -> (i32, i32) {
    %c0_i32 = arith.constant 0 : i32
    %c0_i32_0 = arith.constant 0 : i32
    return %arg0, %c0_i32 : i32, i32
  }
  func.func @transform_1(%arg0: i32) -> (i32, i32) {
    %c0_i32 = arith.constant 0 : i32
    %c0_i32_0 = arith.constant 0 : i32
    %c0_i32_1 = arith.constant 0 : i32
    return %c0_i32, %c0_i32_0 : i32, i32
  }
  func.func @transform_2(%arg0: i32) -> (i32, i32) {
    %c0_i32 = arith.constant 0 : i32
    %c0_i32_0 = arith.constant 0 : i32
    %c0_i32_1 = arith.constant 0 : i32
    return %c0_i32, %c0_i32_0 : i32, i32
  }
  func.func @transform_3(%arg0: i32) -> (i32, i32) {
    %c0_i32 = arith.constant 0 : i32
    %c0_i32_0 = arith.constant 0 : i32
    return %arg0, %c0_i32 : i32, i32
  }
}

module attributes {stable_mosaic.version = 11 : i64} {
  func.func @_moe_kernel(%arg0: i32, %arg1: i32, %arg2: i32, %arg3: memref<16x32xbf16, #tpu.memory_space<vmem>>, %arg4: memref<32x128xbf16, #tpu.memory_space<vmem>>, %arg5: memref<1x128xf32, #tpu.memory_space<vmem>>, %arg6: memref<1x32x64xbf16, #tpu.memory_space<vmem>>, %arg7: memref<1x1x64xf32, #tpu.memory_space<vmem>>, %arg8: memref<1x64x32xbf16, #tpu.memory_space<vmem>>, %arg9: memref<1x1x32xf32, #tpu.memory_space<vmem>>, %arg10: memref<1x32xf32, #tpu.memory_space<vmem>>, %arg11: memref<1x32xf32, #tpu.memory_space<vmem>>, %arg12: memref<16x32xbf16, #tpu.memory_space<vmem>>, %arg13: memref<16x128xf32, #tpu.memory_space<vmem>>, %arg14: memref<16x128xf32, #tpu.memory_space<vmem>>, %arg15: memref<16x32xf32, #tpu.memory_space<vmem>>) attributes {dimension_semantics = [#tpu.dimension_semantics<parallel>, #tpu.dimension_semantics<arbitrary>, #tpu.dimension_semantics<arbitrary>], iteration_bounds = array<i64: 1, 4, 1>, scalar_prefetch = 0 : i64, scratch_operands = 2 : i64, tpu.core_type = #tpu.core_type<tc>, window_params = [{transform_indices = @transform_0, window_bounds = array<i64: 16, 32>}, {pipeline_mode = #tpu.pipeline_mode<synchronous>, transform_indices = @transform_1, window_bounds = array<i64: 32, 128>}, {pipeline_mode = #tpu.pipeline_mode<synchronous>, transform_indices = @transform_2, window_bounds = array<i64: 1, 128>}, {transform_indices = @transform_3, window_bounds = array<i64: 1, 32, 64>}, {transform_indices = @transform_4, window_bounds = array<i64: 1, 1, 64>}, {transform_indices = @transform_5, window_bounds = array<i64: 1, 64, 32>}, {transform_indices = @transform_6, window_bounds = array<i64: 1, 1, 32>}, {pipeline_mode = #tpu.pipeline_mode<synchronous>, transform_indices = @transform_7, window_bounds = array<i64: 1, 32>}, {pipeline_mode = #tpu.pipeline_mode<synchronous>, transform_indices = @transform_8, window_bounds = array<i64: 1, 32>}, {transform_indices = @transform_9, window_bounds = array<i64: 16, 32>}, {transform_indices = @transform_10, window_bounds = array<i64: 16, 128>}]} {
    %c0_i32 = arith.constant 0 : i32
    %0 = arith.cmpi eq, %arg1, %c0_i32 : i32
    %c0_i32_0 = arith.constant 0 : i32
    %1 = arith.cmpi eq, %arg2, %c0_i32_0 : i32
    %2 = arith.andi %0, %1 : i1
    %3 = arith.extui %2 : i1 to i32
    %c0_i32_1 = arith.constant 0 : i32
    %4 = arith.cmpi ne, %3, %c0_i32_1 : i32
    scf.if %4 {
      %c0_28 = arith.constant 0 : index
      %c0_29 = arith.constant 0 : index
      %46 = vector.load %arg3[%c0_28, %c0_29] : memref<16x32xbf16, #tpu.memory_space<vmem>>, vector<16x32xbf16>
      %c0_30 = arith.constant 0 : index
      %c0_31 = arith.constant 0 : index
      %47 = vector.load %arg4[%c0_30, %c0_31] : memref<32x128xbf16, #tpu.memory_space<vmem>>, vector<32x128xbf16>
      %cst_32 = arith.constant dense<0.000000e+00> : vector<16x128xf32>
      %48 = tpu.matmul %46, %47, %cst_32 {dimension_numbers = #tpu.dot_dimension_numbers<[1], [0], [0], [1], [0, 0, 1, 1], [], []>} : vector<16x32xbf16>, vector<32x128xbf16>, vector<16x128xf32> -> vector<16x128xf32>
      %c0_33 = arith.constant 0 : index
      %c0_34 = arith.constant 0 : index
      %49 = vector.load %arg5[%c0_33, %c0_34] : memref<1x128xf32, #tpu.memory_space<vmem>>, vector<1x128xf32>
      %50 = vector.broadcast %49 : vector<1x128xf32> to vector<16x128xf32>
      %51 = arith.addf %48, %50 : vector<16x128xf32>
      %c0_35 = arith.constant 0 : index
      %c0_36 = arith.constant 0 : index
      %52 = vector.load %arg13[%c0_35, %c0_36] : memref<16x128xf32, #tpu.memory_space<vmem>>, vector<16x128xf32>
      tpu.vector_store %arg13[%c0_35, %c0_36], %51 {strides = array<i32>} : memref<16x128xf32, #tpu.memory_space<vmem>>, vector<16x128xf32>,
      %cst_37 = arith.constant dense<0xFF800000> : vector<16xf32>
      %53 = vector.multi_reduction <maximumf>, %51, %cst_37 [1] : vector<16x128xf32> to vector<16xf32>
      %54 = vector.shape_cast %53 : vector<16xf32> to vector<16x1xf32>
      %55 = vector.broadcast %54 : vector<16x1xf32> to vector<16x128xf32>
      %56 = arith.subf %51, %55 : vector<16x128xf32>
      %57 = math.exp %56 : vector<16x128xf32>
      %cst_38 = arith.constant dense<0.000000e+00> : vector<16xf32>
      %58 = vector.multi_reduction <add>, %57, %cst_38 [1] : vector<16x128xf32> to vector<16xf32>
      %59 = vector.shape_cast %58 : vector<16xf32> to vector<16x1xf32>
      %60 = vector.broadcast %59 : vector<16x1xf32> to vector<16x128xf32>
      %61 = arith.divf %57, %60 : vector<16x128xf32>
      %62 = tpu.iota {dimensions = array<i32: 1>} : vector<16x128xi32>
      %cst_39 = arith.constant 0.000000e+00 : f32
      %63 = vector.broadcast %cst_39 : f32 to vector<16x128xf32>
      %cst_40 = arith.constant dense<0xFF800000> : vector<16xf32>
      %64 = vector.multi_reduction <maximumf>, %61, %cst_40 [1] : vector<16x128xf32> to vector<16xf32>
      %65 = vector.shape_cast %64 : vector<16xf32> to vector<16x1xf32>
      %66 = vector.broadcast %65 : vector<16x1xf32> to vector<16x128xf32>
      %67 = arith.cmpf oge, %61, %66 : vector<16x128xf32>
      %c128_i32 = arith.constant 128 : i32
      %68 = vector.broadcast %c128_i32 : i32 to vector<16x128xi32>
      %69 = arith.select %67, %62, %68 : vector<16x128xi1>, vector<16x128xi32>
      %cst_41 = arith.constant dense<2147483647> : vector<16xi32>
      %70 = vector.multi_reduction <minsi>, %69, %cst_41 [1] : vector<16x128xi32> to vector<16xi32>
      %71 = vector.shape_cast %70 : vector<16xi32> to vector<16x1xi32>
      %72 = vector.broadcast %71 : vector<16x1xi32> to vector<16x128xi32>
      %73 = arith.cmpi eq, %62, %72 : vector<16x128xi32>
      %74 = arith.select %73, %61, %63 : vector<16x128xi1>, vector<16x128xf32>
      %cst_42 = arith.constant -1.000000e+00 : f32
      %75 = vector.broadcast %cst_42 : f32 to vector<16x128xf32>
      %76 = arith.select %73, %75, %61 : vector<16x128xi1>, vector<16x128xf32>
      %cst_43 = arith.constant dense<0xFF800000> : vector<16xf32>
      %77 = vector.multi_reduction <maximumf>, %76, %cst_43 [1] : vector<16x128xf32> to vector<16xf32>
      %78 = vector.shape_cast %77 : vector<16xf32> to vector<16x1xf32>
      %79 = vector.broadcast %78 : vector<16x1xf32> to vector<16x128xf32>
      %80 = arith.cmpf oge, %76, %79 : vector<16x128xf32>
      %c128_i32_44 = arith.constant 128 : i32
      %81 = vector.broadcast %c128_i32_44 : i32 to vector<16x128xi32>
      %82 = arith.select %80, %62, %81 : vector<16x128xi1>, vector<16x128xi32>
      %cst_45 = arith.constant dense<2147483647> : vector<16xi32>
      %83 = vector.multi_reduction <minsi>, %82, %cst_45 [1] : vector<16x128xi32> to vector<16xi32>
      %84 = vector.shape_cast %83 : vector<16xi32> to vector<16x1xi32>
      %85 = vector.broadcast %84 : vector<16x1xi32> to vector<16x128xi32>
      %86 = arith.cmpi eq, %62, %85 : vector<16x128xi32>
      %87 = arith.select %86, %61, %74 : vector<16x128xi1>, vector<16x128xf32>
      %cst_46 = arith.constant dense<0.000000e+00> : vector<16xf32>
      %88 = vector.multi_reduction <add>, %87, %cst_46 [1] : vector<16x128xf32> to vector<16xf32>
      %89 = vector.shape_cast %88 : vector<16xf32> to vector<16x1xf32>
      %90 = vector.broadcast %89 : vector<16x1xf32> to vector<16x128xf32>
      %91 = arith.divf %87, %90 : vector<16x128xf32>
      %c0_47 = arith.constant 0 : index
      %c0_48 = arith.constant 0 : index
      %92 = vector.load %arg14[%c0_47, %c0_48] : memref<16x128xf32, #tpu.memory_space<vmem>>, vector<16x128xf32>
      tpu.vector_store %arg14[%c0_47, %c0_48], %91 {strides = array<i32>} : memref<16x128xf32, #tpu.memory_space<vmem>>, vector<16x128xf32>,
      %cst_49 = arith.constant 0.000000e+00 : f32
      %93 = vector.broadcast %cst_49 : f32 to vector<16x32xf32>
      %c0_50 = arith.constant 0 : index
      %c0_51 = arith.constant 0 : index
      %94 = vector.load %arg15[%c0_50, %c0_51] : memref<16x32xf32, #tpu.memory_space<vmem>>, vector<16x32xf32>
      tpu.vector_store %arg15[%c0_50, %c0_51], %93 {strides = array<i32>} : memref<16x32xf32, #tpu.memory_space<vmem>>, vector<16x32xf32>,
    } else {
    }
    %5 = tpu.iota {dimensions = array<i32: 1>} : vector<16x128xi32>
    %6 = vector.broadcast %arg1 : i32 to vector<16x128xi32>
    %7 = arith.cmpi eq, %5, %6 : vector<16x128xi32>
    %c0 = arith.constant 0 : index
    %c0_2 = arith.constant 0 : index
    %8 = vector.load %arg14[%c0, %c0_2] : memref<16x128xf32, #tpu.memory_space<vmem>>, vector<16x128xf32>
    %cst = arith.constant 0.000000e+00 : f32
    %9 = vector.broadcast %cst : f32 to vector<16x128xf32>
    %10 = arith.select %7, %8, %9 : vector<16x128xi1>, vector<16x128xf32>
    %cst_3 = arith.constant dense<0.000000e+00> : vector<16xf32>
    %11 = vector.multi_reduction <add>, %10, %cst_3 [1] : vector<16x128xf32> to vector<16xf32>
    %12 = vector.shape_cast %11 : vector<16xf32> to vector<16x1xf32>
    %c0_4 = arith.constant 0 : index
    %c0_5 = arith.constant 0 : index
    %13 = vector.load %arg3[%c0_4, %c0_5] : memref<16x32xbf16, #tpu.memory_space<vmem>>, vector<16x32xbf16>
    %c0_6 = arith.constant 0 : index
    %c0_7 = arith.constant 0 : index
    %c0_8 = arith.constant 0 : index
    %14 = vector.load %arg6[%c0_6, %c0_7, %c0_8] : memref<1x32x64xbf16, #tpu.memory_space<vmem>>, vector<1x32x64xbf16>
    %15 = vector.shape_cast %14 : vector<1x32x64xbf16> to vector<32x64xbf16>
    %cst_9 = arith.constant dense<0.000000e+00> : vector<16x64xf32>
    %16 = tpu.matmul %13, %15, %cst_9 {dimension_numbers = #tpu.dot_dimension_numbers<[1], [0], [0], [1], [0, 0, 1, 1], [], []>} : vector<16x32xbf16>, vector<32x64xbf16>, vector<16x64xf32> -> vector<16x64xf32>
    %c0_10 = arith.constant 0 : index
    %c0_11 = arith.constant 0 : index
    %c0_12 = arith.constant 0 : index
    %17 = vector.load %arg7[%c0_10, %c0_11, %c0_12] : memref<1x1x64xf32, #tpu.memory_space<vmem>>, vector<1x1x64xf32>
    %18 = vector.shape_cast %17 : vector<1x1x64xf32> to vector<1x64xf32>
    %19 = vector.broadcast %18 : vector<1x64xf32> to vector<16x64xf32>
    %20 = arith.addf %16, %19 : vector<16x64xf32>
    %cst_13 = arith.constant 0.000000e+00 : f32
    %21 = vector.broadcast %cst_13 : f32 to vector<16x64xf32>
    %22 = arith.maximumf %20, %21 : vector<16x64xf32>
    %23 = arith.truncf %22 : vector<16x64xf32> to vector<16x64xbf16>
    %c0_14 = arith.constant 0 : index
    %c0_15 = arith.constant 0 : index
    %c0_16 = arith.constant 0 : index
    %24 = vector.load %arg8[%c0_14, %c0_15, %c0_16] : memref<1x64x32xbf16, #tpu.memory_space<vmem>>, vector<1x64x32xbf16>
    %25 = vector.shape_cast %24 : vector<1x64x32xbf16> to vector<64x32xbf16>
    %cst_17 = arith.constant dense<0.000000e+00> : vector<16x32xf32>
    %26 = tpu.matmul %23, %25, %cst_17 {dimension_numbers = #tpu.dot_dimension_numbers<[1], [0], [0], [1], [0, 0, 1, 1], [], []>} : vector<16x64xbf16>, vector<64x32xbf16>, vector<16x32xf32> -> vector<16x32xf32>
    %c0_i32_18 = arith.constant 0 : i32
    %27 = arith.cmpi eq, %arg2, %c0_i32_18 : i32
    %28 = arith.extui %27 : i1 to i32
    %29 = arith.sitofp %28 : i32 to f32
    %c0_19 = arith.constant 0 : index
    %c0_20 = arith.constant 0 : index
    %c0_21 = arith.constant 0 : index
    %30 = vector.load %arg9[%c0_19, %c0_20, %c0_21] : memref<1x1x32xf32, #tpu.memory_space<vmem>>, vector<1x1x32xf32>
    %31 = vector.shape_cast %30 : vector<1x1x32xf32> to vector<1x32xf32>
    %32 = vector.broadcast %29 : f32 to vector<1x32xf32>
    %33 = arith.mulf %32, %31 : vector<1x32xf32>
    %34 = vector.broadcast %33 : vector<1x32xf32> to vector<16x32xf32>
    %35 = arith.addf %26, %34 : vector<16x32xf32>
    %c0_22 = arith.constant 0 : index
    %c0_23 = arith.constant 0 : index
    %36 = vector.load %arg15[%c0_22, %c0_23] : memref<16x32xf32, #tpu.memory_space<vmem>>, vector<16x32xf32>
    %37 = vector.broadcast %12 : vector<16x1xf32> to vector<16x32xf32>
    %38 = arith.mulf %37, %35 : vector<16x32xf32>
    %39 = arith.addf %36, %38 : vector<16x32xf32>
    %c0_24 = arith.constant 0 : index
    %c0_25 = arith.constant 0 : index
    %40 = vector.load %arg15[%c0_24, %c0_25] : memref<16x32xf32, #tpu.memory_space<vmem>>, vector<16x32xf32>
    tpu.vector_store %arg15[%c0_24, %c0_25], %39 {strides = array<i32>} : memref<16x32xf32, #tpu.memory_space<vmem>>, vector<16x32xf32>,
    %c3_i32 = arith.constant 3 : i32
    %41 = arith.cmpi eq, %arg1, %c3_i32 : i32
    %c0_i32_26 = arith.constant 0 : i32
    %42 = arith.cmpi eq, %arg2, %c0_i32_26 : i32
    %43 = arith.andi %41, %42 : i1
    %44 = arith.extui %43 : i1 to i32
    %c0_i32_27 = arith.constant 0 : i32
    %45 = arith.cmpi ne, %44, %c0_i32_27 : i32
    scf.if %45 {
      %c0_28 = arith.constant 0 : index
      %c0_29 = arith.constant 0 : index
      %46 = vector.load %arg3[%c0_28, %c0_29] : memref<16x32xbf16, #tpu.memory_space<vmem>>, vector<16x32xbf16>
      %47 = arith.extf %46 : vector<16x32xbf16> to vector<16x32xf32>
      %c0_30 = arith.constant 0 : index
      %c0_31 = arith.constant 0 : index
      %48 = vector.load %arg15[%c0_30, %c0_31] : memref<16x32xf32, #tpu.memory_space<vmem>>, vector<16x32xf32>
      %49 = arith.addf %47, %48 : vector<16x32xf32>
      %cst_32 = arith.constant dense<0.000000e+00> : vector<16xf32>
      %50 = vector.multi_reduction <add>, %49, %cst_32 [1] : vector<16x32xf32> to vector<16xf32>
      %51 = vector.shape_cast %50 : vector<16xf32> to vector<16x1xf32>
      %cst_33 = arith.constant 3.200000e+01 : f32
      %52 = vector.broadcast %cst_33 : f32 to vector<16x1xf32>
      %53 = arith.divf %51, %52 : vector<16x1xf32>
      %54 = vector.broadcast %53 : vector<16x1xf32> to vector<16x32xf32>
      %55 = arith.subf %49, %54 : vector<16x32xf32>
      %56 = arith.mulf %55, %55 : vector<16x32xf32>
      %cst_34 = arith.constant dense<0.000000e+00> : vector<16xf32>
      %57 = vector.multi_reduction <add>, %56, %cst_34 [1] : vector<16x32xf32> to vector<16xf32>
      %58 = vector.shape_cast %57 : vector<16xf32> to vector<16x1xf32>
      %cst_35 = arith.constant 3.200000e+01 : f32
      %59 = vector.broadcast %cst_35 : f32 to vector<16x1xf32>
      %60 = arith.divf %58, %59 : vector<16x1xf32>
      %c0_36 = arith.constant 0 : index
      %c0_37 = arith.constant 0 : index
      %61 = vector.load %arg10[%c0_36, %c0_37] : memref<1x32xf32, #tpu.memory_space<vmem>>, vector<1x32xf32>
      %62 = vector.broadcast %53 : vector<16x1xf32> to vector<16x32xf32>
      %63 = arith.subf %49, %62 : vector<16x32xf32>
      %64 = vector.broadcast %61 : vector<1x32xf32> to vector<16x32xf32>
      %65 = arith.mulf %64, %63 : vector<16x32xf32>
      %cst_38 = arith.constant 9.99999974E-6 : f32
      %66 = vector.broadcast %cst_38 : f32 to vector<16x1xf32>
      %67 = arith.addf %60, %66 : vector<16x1xf32>
      %68 = math.rsqrt %67 : vector<16x1xf32>
      %69 = vector.broadcast %68 : vector<16x1xf32> to vector<16x32xf32>
      %70 = arith.mulf %65, %69 : vector<16x32xf32>
      %c0_39 = arith.constant 0 : index
      %c0_40 = arith.constant 0 : index
      %71 = vector.load %arg11[%c0_39, %c0_40] : memref<1x32xf32, #tpu.memory_space<vmem>>, vector<1x32xf32>
      %72 = vector.broadcast %71 : vector<1x32xf32> to vector<16x32xf32>
      %73 = arith.addf %70, %72 : vector<16x32xf32>
      %74 = arith.truncf %73 : vector<16x32xf32> to vector<16x32xbf16>
      %c0_41 = arith.constant 0 : index
      %c0_42 = arith.constant 0 : index
      %75 = vector.load %arg12[%c0_41, %c0_42] : memref<16x32xbf16, #tpu.memory_space<vmem>>, vector<16x32xbf16>
      tpu.vector_store %arg12[%c0_41, %c0_42], %74 {strides = array<i32>} : memref<16x32xbf16, #tpu.memory_space<vmem>>, vector<16x32xbf16>,
    } else {
    }
    return
  }
  func.func @transform_0(%arg0: i32, %arg1: i32, %arg2: i32) -> (i32, i32) {
    %c0_i32 = arith.constant 0 : i32
    %c0_i32_0 = arith.constant 0 : i32
    return %arg0, %c0_i32 : i32, i32
  }
  func.func @transform_1(%arg0: i32, %arg1: i32, %arg2: i32) -> (i32, i32) {
    %c0_i32 = arith.constant 0 : i32
    %c0_i32_0 = arith.constant 0 : i32
    %c0_i32_1 = arith.constant 0 : i32
    return %c0_i32, %c0_i32_0 : i32, i32
  }
  func.func @transform_2(%arg0: i32, %arg1: i32, %arg2: i32) -> (i32, i32) {
    %c0_i32 = arith.constant 0 : i32
    %c0_i32_0 = arith.constant 0 : i32
    %c0_i32_1 = arith.constant 0 : i32
    return %c0_i32, %c0_i32_0 : i32, i32
  }
  func.func @transform_3(%arg0: i32, %arg1: i32, %arg2: i32) -> (i32, i32, i32) {
    %c0_i32 = arith.constant 0 : i32
    %c0_i32_0 = arith.constant 0 : i32
    return %arg1, %c0_i32, %arg2 : i32, i32, i32
  }
  func.func @transform_4(%arg0: i32, %arg1: i32, %arg2: i32) -> (i32, i32, i32) {
    %c0_i32 = arith.constant 0 : i32
    %c0_i32_0 = arith.constant 0 : i32
    return %arg1, %c0_i32, %arg2 : i32, i32, i32
  }
  func.func @transform_5(%arg0: i32, %arg1: i32, %arg2: i32) -> (i32, i32, i32) {
    %c0_i32 = arith.constant 0 : i32
    %c0_i32_0 = arith.constant 0 : i32
    return %arg1, %arg2, %c0_i32 : i32, i32, i32
  }
  func.func @transform_6(%arg0: i32, %arg1: i32, %arg2: i32) -> (i32, i32, i32) {
    %c0_i32 = arith.constant 0 : i32
    %c0_i32_0 = arith.constant 0 : i32
    %c0_i32_1 = arith.constant 0 : i32
    return %arg1, %c0_i32, %c0_i32_0 : i32, i32, i32
  }
  func.func @transform_7(%arg0: i32, %arg1: i32, %arg2: i32) -> (i32, i32) {
    %c0_i32 = arith.constant 0 : i32
    %c0_i32_0 = arith.constant 0 : i32
    %c0_i32_1 = arith.constant 0 : i32
    return %c0_i32, %c0_i32_0 : i32, i32
  }
  func.func @transform_8(%arg0: i32, %arg1: i32, %arg2: i32) -> (i32, i32) {
    %c0_i32 = arith.constant 0 : i32
    %c0_i32_0 = arith.constant 0 : i32
    %c0_i32_1 = arith.constant 0 : i32
    return %c0_i32, %c0_i32_0 : i32, i32
  }
  func.func @transform_9(%arg0: i32, %arg1: i32, %arg2: i32) -> (i32, i32) {
    %c0_i32 = arith.constant 0 : i32
    %c0_i32_0 = arith.constant 0 : i32
    return %arg0, %c0_i32 : i32, i32
  }
  func.func @transform_10(%arg0: i32, %arg1: i32, %arg2: i32) -> (i32, i32) {
    %c0_i32 = arith.constant 0 : i32
    %c0_i32_0 = arith.constant 0 : i32
    return %arg0, %c0_i32 : i32, i32
  }
}

module attributes {stable_mosaic.version = 11 : i64} {
  func.func @_head_kernel(%arg0: i32, %arg1: memref<16x32xbf16, #tpu.memory_space<vmem>>, %arg2: memref<32x16xbf16, #tpu.memory_space<vmem>>, %arg3: memref<1x16xf32, #tpu.memory_space<vmem>>, %arg4: memref<1x16xf32, #tpu.memory_space<vmem>>, %arg5: memref<1x16xf32, #tpu.memory_space<vmem>>, %arg6: memref<16x128xbf16, #tpu.memory_space<vmem>>, %arg7: memref<1x128xf32, #tpu.memory_space<vmem>>, %arg8: memref<16x128xbf16, #tpu.memory_space<vmem>>, %arg9: memref<16x128xf32, #tpu.memory_space<vmem>>) attributes {dimension_semantics = [#tpu.dimension_semantics<parallel>], iteration_bounds = array<i64: 1>, scalar_prefetch = 0 : i64, scratch_operands = 0 : i64, tpu.core_type = #tpu.core_type<tc>, window_params = [{transform_indices = @transform_0, window_bounds = array<i64: 16, 32>}, {pipeline_mode = #tpu.pipeline_mode<synchronous>, transform_indices = @transform_1, window_bounds = array<i64: 32, 16>}, {pipeline_mode = #tpu.pipeline_mode<synchronous>, transform_indices = @transform_2, window_bounds = array<i64: 1, 16>}, {pipeline_mode = #tpu.pipeline_mode<synchronous>, transform_indices = @transform_3, window_bounds = array<i64: 1, 16>}, {pipeline_mode = #tpu.pipeline_mode<synchronous>, transform_indices = @transform_4, window_bounds = array<i64: 1, 16>}, {pipeline_mode = #tpu.pipeline_mode<synchronous>, transform_indices = @transform_5, window_bounds = array<i64: 16, 128>}, {pipeline_mode = #tpu.pipeline_mode<synchronous>, transform_indices = @transform_6, window_bounds = array<i64: 1, 128>}, {transform_indices = @transform_7, window_bounds = array<i64: 16, 128>}, {transform_indices = @transform_8, window_bounds = array<i64: 16, 128>}]} {
    %c0 = arith.constant 0 : index
    %c0_0 = arith.constant 0 : index
    %0 = vector.load %arg1[%c0, %c0_0] : memref<16x32xbf16, #tpu.memory_space<vmem>>, vector<16x32xbf16>
    %c0_1 = arith.constant 0 : index
    %c0_2 = arith.constant 0 : index
    %1 = vector.load %arg2[%c0_1, %c0_2] : memref<32x16xbf16, #tpu.memory_space<vmem>>, vector<32x16xbf16>
    %cst = arith.constant dense<0.000000e+00> : vector<16x16xf32>
    %2 = tpu.matmul %0, %1, %cst {dimension_numbers = #tpu.dot_dimension_numbers<[1], [0], [0], [1], [0, 0, 1, 1], [], []>} : vector<16x32xbf16>, vector<32x16xbf16>, vector<16x16xf32> -> vector<16x16xf32>
    %c0_3 = arith.constant 0 : index
    %c0_4 = arith.constant 0 : index
    %3 = vector.load %arg3[%c0_3, %c0_4] : memref<1x16xf32, #tpu.memory_space<vmem>>, vector<1x16xf32>
    %4 = vector.broadcast %3 : vector<1x16xf32> to vector<16x16xf32>
    %5 = arith.addf %2, %4 : vector<16x16xf32>
    %cst_5 = arith.constant dense<0.000000e+00> : vector<16xf32>
    %6 = vector.multi_reduction <add>, %5, %cst_5 [1] : vector<16x16xf32> to vector<16xf32>
    %7 = vector.shape_cast %6 : vector<16xf32> to vector<16x1xf32>
    %cst_6 = arith.constant 1.600000e+01 : f32
    %8 = vector.broadcast %cst_6 : f32 to vector<16x1xf32>
    %9 = arith.divf %7, %8 : vector<16x1xf32>
    %10 = vector.broadcast %9 : vector<16x1xf32> to vector<16x16xf32>
    %11 = arith.subf %5, %10 : vector<16x16xf32>
    %12 = arith.mulf %11, %11 : vector<16x16xf32>
    %cst_7 = arith.constant dense<0.000000e+00> : vector<16xf32>
    %13 = vector.multi_reduction <add>, %12, %cst_7 [1] : vector<16x16xf32> to vector<16xf32>
    %14 = vector.shape_cast %13 : vector<16xf32> to vector<16x1xf32>
    %cst_8 = arith.constant 1.600000e+01 : f32
    %15 = vector.broadcast %cst_8 : f32 to vector<16x1xf32>
    %16 = arith.divf %14, %15 : vector<16x1xf32>
    %c0_9 = arith.constant 0 : index
    %c0_10 = arith.constant 0 : index
    %17 = vector.load %arg4[%c0_9, %c0_10] : memref<1x16xf32, #tpu.memory_space<vmem>>, vector<1x16xf32>
    %18 = vector.broadcast %9 : vector<16x1xf32> to vector<16x16xf32>
    %19 = arith.subf %5, %18 : vector<16x16xf32>
    %20 = vector.broadcast %17 : vector<1x16xf32> to vector<16x16xf32>
    %21 = arith.mulf %20, %19 : vector<16x16xf32>
    %cst_11 = arith.constant 9.99999974E-6 : f32
    %22 = vector.broadcast %cst_11 : f32 to vector<16x1xf32>
    %23 = arith.addf %16, %22 : vector<16x1xf32>
    %24 = math.rsqrt %23 : vector<16x1xf32>
    %25 = vector.broadcast %24 : vector<16x1xf32> to vector<16x16xf32>
    %26 = arith.mulf %21, %25 : vector<16x16xf32>
    %c0_12 = arith.constant 0 : index
    %c0_13 = arith.constant 0 : index
    %27 = vector.load %arg5[%c0_12, %c0_13] : memref<1x16xf32, #tpu.memory_space<vmem>>, vector<1x16xf32>
    %28 = vector.broadcast %27 : vector<1x16xf32> to vector<16x16xf32>
    %29 = arith.addf %26, %28 : vector<16x16xf32>
    %cst_14 = arith.constant 0.000000e+00 : f32
    %30 = vector.broadcast %cst_14 : f32 to vector<16x16xf32>
    %31 = arith.maximumf %29, %30 : vector<16x16xf32>
    %32 = arith.truncf %31 : vector<16x16xf32> to vector<16x16xbf16>
    %c0_15 = arith.constant 0 : index
    %c0_16 = arith.constant 0 : index
    %33 = vector.load %arg6[%c0_15, %c0_16] : memref<16x128xbf16, #tpu.memory_space<vmem>>, vector<16x128xbf16>
    %cst_17 = arith.constant dense<0.000000e+00> : vector<16x128xf32>
    %34 = tpu.matmul %32, %33, %cst_17 {dimension_numbers = #tpu.dot_dimension_numbers<[1], [0], [0], [1], [0, 0, 1, 1], [], []>} : vector<16x16xbf16>, vector<16x128xbf16>, vector<16x128xf32> -> vector<16x128xf32>
    %c0_18 = arith.constant 0 : index
    %c0_19 = arith.constant 0 : index
    %35 = vector.load %arg7[%c0_18, %c0_19] : memref<1x128xf32, #tpu.memory_space<vmem>>, vector<1x128xf32>
    %36 = vector.broadcast %35 : vector<1x128xf32> to vector<16x128xf32>
    %37 = arith.addf %34, %36 : vector<16x128xf32>
    %c0_20 = arith.constant 0 : index
    %c0_21 = arith.constant 0 : index
    %38 = vector.load %arg8[%c0_20, %c0_21] : memref<16x128xbf16, #tpu.memory_space<vmem>>, vector<16x128xbf16>
    %cst_22 = arith.constant 5.000000e-01 : bf16
    %39 = vector.broadcast %cst_22 : bf16 to vector<16x128xbf16>
    %40 = arith.cmpf ogt, %38, %39 : vector<16x128xbf16>
    %cst_23 = arith.constant -6.000000e+04 : f32
    %41 = vector.broadcast %cst_23 : f32 to vector<16x128xf32>
    %42 = arith.select %40, %37, %41 : vector<16x128xi1>, vector<16x128xf32>
    %c0_24 = arith.constant 0 : index
    %c0_25 = arith.constant 0 : index
    %43 = vector.load %arg9[%c0_24, %c0_25] : memref<16x128xf32, #tpu.memory_space<vmem>>, vector<16x128xf32>
    tpu.vector_store %arg9[%c0_24, %c0_25], %42 {strides = array<i32>} : memref<16x128xf32, #tpu.memory_space<vmem>>, vector<16x128xf32>,
    return
  }
  func.func @transform_0(%arg0: i32) -> (i32, i32) {
    %c0_i32 = arith.constant 0 : i32
    %c0_i32_0 = arith.constant 0 : i32
    return %arg0, %c0_i32 : i32, i32
  }
  func.func @transform_1(%arg0: i32) -> (i32, i32) {
    %c0_i32 = arith.constant 0 : i32
    %c0_i32_0 = arith.constant 0 : i32
    %c0_i32_1 = arith.constant 0 : i32
    return %c0_i32, %c0_i32_0 : i32, i32
  }
  func.func @transform_2(%arg0: i32) -> (i32, i32) {
    %c0_i32 = arith.constant 0 : i32
    %c0_i32_0 = arith.constant 0 : i32
    %c0_i32_1 = arith.constant 0 : i32
    return %c0_i32, %c0_i32_0 : i32, i32
  }
  func.func @transform_3(%arg0: i32) -> (i32, i32) {
    %c0_i32 = arith.constant 0 : i32
    %c0_i32_0 = arith.constant 0 : i32
    %c0_i32_1 = arith.constant 0 : i32
    return %c0_i32, %c0_i32_0 : i32, i32
  }
  func.func @transform_4(%arg0: i32) -> (i32, i32) {
    %c0_i32 = arith.constant 0 : i32
    %c0_i32_0 = arith.constant 0 : i32
    %c0_i32_1 = arith.constant 0 : i32
    return %c0_i32, %c0_i32_0 : i32, i32
  }
  func.func @transform_5(%arg0: i32) -> (i32, i32) {
    %c0_i32 = arith.constant 0 : i32
    %c0_i32_0 = arith.constant 0 : i32
    %c0_i32_1 = arith.constant 0 : i32
    return %c0_i32, %c0_i32_0 : i32, i32
  }
  func.func @transform_6(%arg0: i32) -> (i32, i32) {
    %c0_i32 = arith.constant 0 : i32
    %c0_i32_0 = arith.constant 0 : i32
    %c0_i32_1 = arith.constant 0 : i32
    return %c0_i32, %c0_i32_0 : i32, i32
  }
  func.func @transform_7(%arg0: i32) -> (i32, i32) {
    %c0_i32 = arith.constant 0 : i32
    %c0_i32_0 = arith.constant 0 : i32
    return %arg0, %c0_i32 : i32, i32
  }
  func.func @transform_8(%arg0: i32) -> (i32, i32) {
    %c0_i32 = arith.constant 0 : i32
    %c0_i32_0 = arith.constant 0 : i32
    return %arg0, %c0_i32 : i32, i32
  }
}

</mosaic_0001>

<bundles_post_ra>
// kernel: tpu_custom_call.1
= control target key start
LH: loop header
LB: loop body
LE: loop exit
PB: predicated region body
PF: predicated region fallthrough
CT: control target
= control target key end

     0   :  { %7 = vsyncpa [#allocation3], 0  ;;  %s649_s0 = inlined_call_operand.hbm [shape: f32[16,128], index: 0, kind: input, shape index: {}]   ;;  %s650_s1 = inlined_call_operand.hbm [shape: f32[8,128], index: 1, kind: input, shape index: {}]   ;;  %s651_s2 = inlined_call_operand.hbm [shape: f32[16,128], index: 2, kind: output, shape index: {}]  }
   0x1   :  { %9 = vsyncpa [#allocation3 + $0x1], 0 }
   0x2   :  { %10 = vsyncpa [#allocation6], 0 }
   0x3   :  { %11 = vsyncpa [#allocation4], 0 }
   0x4   :  { %13 = vsyncpa [#allocation4 + $0x1], 0  ;;  %s483_s9 = smov 0   ;;  %s485_s10 = smov 0  }
   0x5   :  { %s487_s11 = smov 0   ;;  %s489_s12 = smov 0  }
   0x6 LB: > { %s504_s13 = sadd.s32 4294967295, %s463_s12   ;;  %s270_s14 = sadd.s32 4294967294, %s463_s12   ;;  %s463_s12 = sphi %s489_s12, %s674_s12   ;;  %s459_s11 = sphi %s487_s11, %s673_s11   ;;  %s455_s10 = sphi %s485_s10, %s672_s10   ;;  %s451_s9 = sphi %s483_s9, %s671_s9  }
   0x7   : > { %p39_p0 = scmp.ne.s32.totalorder %s455_s10, %s451_s9  ;;  %p652_p1 = scmp.eq.s32.totalorder %s504_s13, 0 }
   0x8   : > { %p90_p3 = scmp.eq.s32.totalorder %s270_s14, 1  ;;  %p271_p5 = scmp.ge.s32.totalorder %s463_s12, 1 }
   0x9   : > { %p513_p4 = por %p652_p1, %p39_p0  ;;  %p97_p7 = scmp.lt.s32.totalorder %s463_s12, 3 }
   0xa   : > { %p518_p6 = por %p90_p3, %p39_p0  ;;  %s465_s18 = smov [#allocation5]  }
   0xb   : > { %s656_s15 = scalar_select %p513_p4, 1, 0 }
   0xc   : > { %s657_s16 = scalar_select %p518_p6, 1, 0 }
   0xd   : > { %p523_p8 = pnand %p271_p5, %p97_p7  ;;  %s110_s19 = sshll.u32 %s465_s18, 4  ;;  %s111_s19 = int_to_ptr.vmem [resolvable:$true] %s110_s19 }
   0xe   : > { %s531_s20 = sadd.s32 1, %s463_s12   ;;  %s26_s24 = sadd.s32 1, %s459_s11 }
   0xf   : > { %s658_s17 = scalar_select %p523_p8, 1, 0 }
  0x10   : > { %p292_p10 = pneg %p523_p8  ;;  %s23_s22 = ssub.s32 %s463_s12, %s531_s20 }
  0x11   : > { %p541_p12 = scmp.eq.s32.totalorder %s23_s22, 0  ;;  %p33_p13 = scmp.ne.s32.totalorder %s459_s11, %s455_s10 }
  0x12   : > { %p535_p11 = pnand %p292_p10, %p652_p1  ;;  %s352_s25 = scalar_lea.vmem %s111_s19, 128 }
  0x13   : > { %p353_p3 = scmp.ne.s32.totalorder %s111_s19, %s352_s25  ;;  %p360_p9 = scmp.lt.s32.totalorder %s111_s19, %s111_s19 }
  0x14   : > { %p343_p0 = pneg %p535_p11  ;;  %p361_p2 = scmp.lt.s32.totalorder %s352_s25, %s352_s25 }
  0x16   : > { %p355_p5 = pnand %p353_p3, %p343_p0  ;;  %p362_p10 = por %p361_p2, %p360_p9 }
  0x18   : > { %p356_p7 = pneg %p355_p5 }
  0x1a   : > { %p363_p1 = pnand %p362_p10, %p356_p7 }
  0x1c   : > { %366 = shalt.err (!%p363_p1)
}
  0x1d   : > { %295 = dma.hbm_to_vmem [thread:$0]  (!%p535_p11), %s650_s1, 128, %s111_s19, [#allocation6]  }
  0x1e   : > { %s558_s28 = scalar_select %p541_p12, %s459_s11, %s26_s24  }
  0x1f   : > { %p34_p1 = scmp.eq.s32.totalorder %s463_s12, 0  ;;  %p661_p2 = scmp.eq.s32.totalorder %s504_s13, 1 }
  0x20   : > { %p305_p0 = scmp.lt.s32.totalorder %s463_s12, 2  ;;  %s121_s30 = sand.u32 1, %s459_s11  }
  0x21   : > { %p566_p9 = por %p661_p2, %p33_p13  ;;  %p35_p3 = por %p34_p1, %p33_p13 }
  0x22   : > { %s274_s3 = sshll.u32 %s121_s30, 3  ;;  %s275_s4 = sshll.u32 %s463_s12, 7 }
  0x23   : > { %s662_s29 = scalar_select %p566_p9, 1, 0 }
  0x24   : > { %s579_s7 = scalar_lea.hbm %s649_s0, %s275_s4  ;;  %s125_s8 = scalar_lea.vmem [#allocation2], %s274_s3 }
  0x25   : > { %s132_s14 = sshll.u32 %s125_s8, 4  ;;  %p581_p11 = pnand %p305_p0, %p35_p3  ;;  %s133_s14 = int_to_ptr.vmem [resolvable:$true] %s132_s14 }
  0x26   : > { %s122_s19 = scalar_lea.sflag [#allocation3], %s121_s30  ;;  %s367_s21 = scalar_lea.hbm %s579_s7, 128 }
  0x27   : > { %p368_p12 = scmp.ne.s32.totalorder %s579_s7, %s367_s21  ;;  %p369_p13 = pneg %p581_p11 }
  0x28   : > { %s372_s24 = scalar_lea.hbm %s649_s0, 256  ;;  %p373_p10 = scmp.lt.s32.totalorder %s579_s7, %s649_s0 }
  0x29   : > { %p370_p5 = pnand %p369_p13, %p368_p12  ;;  %p374_p1 = scmp.lt.s32.totalorder %s372_s24, %s367_s21 }
  0x2b   : > { %p371_p7 = pneg %p370_p5  ;;  %p375_p2 = por %p374_p1, %p373_p10 }
  0x2d   : > { %p376_p0 = pnand %p375_p2, %p371_p7 }
  0x2f   : > { %379 = shalt.err (!%p376_p0)
}
  0x30   : > { %s380_s27 = scalar_lea.vmem %s133_s14, 128  ;;  %s466_s30 = smov [#allocation2]  }
  0x31   : > { %p381_p3 = scmp.ne.s32.totalorder %s133_s14, %s380_s27  ;;  %s385_s3 = sshll.u32 %s466_s30, 4  ;;  %s386_s3 = int_to_ptr.vmem [resolvable:$false] %s385_s3 }
  0x32   : > { %s387_s4 = scalar_lea.vmem %s386_s3, 256  ;;  %p388_p12 = scmp.lt.s32.totalorder %s133_s14, %s386_s3 }
  0x33   : > { %p383_p6 = pnand %p381_p3, %p369_p13  ;;  %p389_p5 = scmp.lt.s32.totalorder %s387_s4, %s380_s27 }
  0x35   : > { %p384_p9 = pneg %p383_p6  ;;  %p390_p4 = por %p389_p5, %p388_p12 }
  0x37   : > { %p391_p8 = pnand %p390_p4, %p384_p9 }
  0x39   : > { %394 = shalt.err (!%p391_p8)
}
  0x3a   : > { %299 = dma.hbm_to_vmem [thread:$0]  (!%p581_p11), %s579_s7, 128, %s133_s14, %s122_s19  }
  0x3b   : > { %p664_p7 = scmp.ne.s32.totalorder %s658_s17, 0 }
  0x3c   : > { %s602_s5 = sand.u32 (!%p664_p7), 1, %s455_s10   ;;  %p665_p6 = scmp.ne.s32.totalorder (!%p664_p7), %s656_s15, 0 }
  0x3d   : > { %141 = sbr.rel (%p664_p7) target bundleno = 95 (0x5f), region = 28  ;;  %s277_s6 = sshll.u32 (!%p664_p7), %s602_s5, 3 }
  0x3e   : > { %s144_s8 = scalar_lea.sflag (!%p664_p7), [#allocation3], %s602_s5  ;;  %s147_s21 = scalar_lea.vmem (!%p664_p7), [#allocation2], %s277_s6 }
  0x42   : > { %438 = dma.done.wait (%p665_p6), %s144_s8, 128  }
  0x43   : > { %440 = vsyncadd (%p665_p6), %s144_s8, 4294967168  ;;  %p666_p4 = scmp.eq.s32.totalorder %s504_s13, 0 }
  0x45   : > { %442 = dma.done.wait (%p666_p4), [#allocation6], 128   ;;  %p667_p8 = pmov %p666_p4 }
  0x46   : > { %s171_s17 = scalar_lea.vmem [#allocation7], %s277_s6  ;;  %s281_s14 = sshll.u32 %s504_s13, 7  ;;  %v172_v0 = vld [vmem:[%s147_s21] sm:$0xff]  ;;  %v173_v1 = vld [vmem:[#allocation5] sm:$0xff] }
  0x47   : > { %444 = vsyncadd (%p667_p8), [#allocation6], 4294967168  ;;  %s190_s7 = sshll.u32 %s171_s17, 4  ;;  %v174_v2 = vadd.f32 %v173_v1, %v172_v0  ;;  %s188_s15 = scalar_lea.hbm %s651_s2, %s281_s14  ;;  %s191_s7 = int_to_ptr.vmem [resolvable:$true] %s190_s7 }
  0x48   : > { %s177_s22 = scalar_lea.sflag [#allocation4], %s602_s5  ;;  %s395_s23 = scalar_lea.vmem %s191_s7, 128 }
  0x49   : > { %175 = vst [vmem:[%s171_s17] sm:$0xff] %v174_v2  ;;  %p396_p9 = scmp.ne.s32.totalorder %s191_s7, %s395_s23  ;;  %p668_p11 = scmp.ne.s32.totalorder %s662_s29, 0 }
  0x4a   : > { %s467_s24 = smov [#allocation7]  }
  0x4b   : > { %p397_p13 = pnand %p396_p9, %p668_p11  ;;  %s399_s25 = sshll.u32 %s467_s24, 4  ;;  %s400_s25 = int_to_ptr.vmem [resolvable:$false] %s399_s25 }
  0x4c   : > { %s401_s26 = scalar_lea.vmem %s400_s25, 256  ;;  %p402_p1 = scmp.lt.s32.totalorder %s191_s7, %s400_s25 }
  0x4d   : > { %p398_p10 = pneg %p397_p13  ;;  %p403_p2 = scmp.lt.s32.totalorder %s401_s26, %s395_s23 }
  0x4f   : > { %p404_p0 = por %p403_p2, %p402_p1 }
  0x51   : > { %p405_p3 = pnand %p404_p0, %p398_p10 }
  0x53   : > { %408 = shalt.err (!%p405_p3)
}
  0x54   : > { %s409_s13 = scalar_lea.hbm %s188_s15, 128  ;;  %s413_s3 = scalar_lea.hbm %s651_s2, 256 }
  0x55   : > { %p410_p12 = scmp.ne.s32.totalorder %s188_s15, %s409_s13  ;;  %p414_p6 = scmp.lt.s32.totalorder %s188_s15, %s651_s2 }
  0x56   : > { %p415_p4 = scmp.lt.s32.totalorder %s413_s3, %s409_s13 }
  0x57   : > { %p411_p5 = pnand %p410_p12, %p668_p11 }
  0x58   : > { %p416_p8 = por %p415_p4, %p414_p6 }
  0x59   : > { %p412_p7 = pneg %p411_p5 }
  0x5b   : > { %p417_p9 = pnand %p416_p8, %p412_p7 }
  0x5d   : > { %420 = shalt.err (!%p417_p9)
}
  0x5e   : > { %290 = dma.vmem_to_hbm [thread:$0]  (%p668_p11), %s191_s7, 128, %s188_s15, %s177_s22  }
  0x5f PF: > { %s202_s6 = sand.u32 1, %s451_s9   ;;  %p669_p13 = scmp.ne.s32.totalorder %s657_s16, 0 }
  0x60   : > { %p670_p10 = scmp.ge.s32.totalorder %s463_s12, 2  ;;  %s203_s8 = scalar_lea.sflag [#allocation4], %s202_s6 }
  0x62   : > { %p301_p1 = pnand %p670_p10, %p669_p13 }
  0x64   : > { %p302_p2 = pneg %p301_p1 }
  0x66   : > { %446 = dma.done.wait (%p302_p2), %s203_s8, 128  }
  0x67   : > { %448 = vsyncadd (%p302_p2), %s203_s8, 4294967168  ;;  %p16_p0 = scmp.ge.s32.totalorder %s531_s20, 4   ;;  %s671_s9 = smov %s455_s10 }
  0x68   : > { %s672_s10 = smov %s459_s11  ;;  %s673_s11 = smov %s558_s28 }
  0x69   : > { %s674_s12 = smov %s531_s20  ;;  %18 = sbr.rel (!%p16_p0) target bundleno = 6 (0x6), region = 77 }
  0x6e   :  { %208 = vsyncpa [#allocation3], 1 }
  0x6f   :  { %210 = vsyncpa [#allocation3 + $0x1], 1 }
  0x70   :  { %211 = vsyncpa [#allocation6], 1 }
  0x71   :  { %212 = vsyncpa [#allocation4], 1 }
  0x72   :  { %214 = vsyncpa [#allocation4 + $0x1], 1 }

// kernel: forward.6
= control target key start
LH: loop header
LB: loop body
LE: loop exit
PB: predicated region body
PF: predicated region fallthrough
CT: control target
= control target key end

     0   :  { %v137_v0 = vmov 0.0   ;;  %vm138_vm0 = vmmov 0   ;;  %vm49_vm1 = vcmask 392192   ;;  %vm102_vm2 = vcmask 257024   ;;  %s183_s1 = inlined_call_operand.vmem [shape: bf16[48,32], index: 1, kind: input, shape index: {}]   ;;  %s184_s0 = inlined_call_operand.vmem [shape: f32[16,48], index: 0, kind: input, shape index: {}]   ;;  %s185_s2 = inlined_call_operand.vmem [shape: f32[1,32], index: 2, kind: input, shape index: {}]   ;;  %s186_s3 = inlined_call_operand.vmem [shape: bf16[16,32], index: 3, kind: output, shape index: {}]  }
   0x1   :  { %122 = vmatprep.subr.bf16.mxu0 %v137_v0  ;;  %v134_v1 = vld [vmem:[%s183_s1 + $0x10] sm:$0xff]   ;;  %128 = vmatprep.mubr.msk.bf16.mxu0 %vm138_vm0, %v137_v0  ;;  %v135_v2 = vld [vmem:[%s183_s1 + $0x8] sm:$0xff]   ;;  %v136_v3 = vld [vmem:[%s183_s1] sm:$0xff]  }
   0x2   :  { %123 = vmatpush3.bf16.msra.mxu0 %v134_v1  ;;  %v15_v4 = vld [vmem:[%s184_s0] sm:$0xff]  ;;  %v16_v5 = vld [vmem:[%s184_s0 + $0x8] sm:$0xff] }
   0x3   :  { %124 = vmatprep.subr.bf16.mxu0 %v137_v0  ;;  %v17_v6 = vpack.c.bf16 %v16_v5, %v15_v4  ;;  %v109_v7 = vld [vmem:[%s185_s2] ss:$0 sm:$0xff] }
   0x6   :  { %125 = vmatpush3.bf16.msra.mxu0 %v135_v2 }
   0x7   :  { %126 = vmatprep.subr.bf16.mxu0 %v137_v0 }
   0xa   :  { %127 = vmatpush3.bf16.msra.mxu0 %v136_v3 }
   0xd   :  { %129 = vmatmul.mubr.msk.bf16.vlgmr.msra.gmra.mxu0 %vm49_vm1, %v17_v6 }
  0xcd   :  { %v87_v8 = vpop.f32.mrf.mxu0 }
  0xce   :  { %v88_v9 = vadd.f32 %v109_v7, %v87_v8 }
  0xcf   :  { %v130_v10 = vpop.f32.mrf.mxu0 }
  0xd0   :  { %v116_v11 = vpack.c.bf16 %v88_v9, %v88_v9 }
  0xd1   :  { %v90_v12 = vpop.f32.mrf.mxu0 }
  0xd2   :  { %103 = vst.msk [vmem:[%s186_s3] sm:$0xf] %vm102_vm2, %v116_v11  ;;  %v91_v13 = vadd.f32 %v109_v7, %v90_v12 }
  0xd3   :  { %v131_v14 = vpop.f32.mrf.mxu0 }
  0xd4   :  { %v117_v15 = vpack.c.bf16 %v91_v13, %v91_v13 }
  0xd6   :  { %104 = vst.msk [vmem:[%s186_s3 + $0x4] sm:$0xf] %vm102_vm2, %v117_v15 }

// kernel: forward.8
= control target key start
LH: loop header
LB: loop body
LE: loop exit
PB: predicated region body
PF: predicated region fallthrough
CT: control target
= control target key end

     0   :  { %s1334_s13 = smov 0   ;;  %s1336_s14 = smov 0   ;;  %s1483_s0 = inlined_call_operand.vmem [shape: bf16[16,32], index: 0, kind: input, shape index: {}]   ;;  %s1484_s1 = inlined_call_operand.vmem [shape: bf16[32,128], index: 1, kind: input, shape index: {}]   ;;  %s1485_s2 = inlined_call_operand.vmem [shape: f32[1,128], index: 2, kind: input, shape index: {}]   ;;  %s1486_s3 = inlined_call_operand.vmem [shape: bf16[4,32,64], index: 3, kind: input, shape index: {}]   ;;  %s1487_s4 = inlined_call_operand.vmem [shape: f32[4,1,64], index: 4, kind: input, shape index: {}]   ;;  %s1488_s5 = inlined_call_operand.vmem [shape: bf16[4,64,32], index: 5, kind: input, shape index: {}]   ;;  %s1489_s6 = inlined_call_operand.vmem [shape: f32[4,1,32], index: 6, kind: input, shape index: {}]   ;;  %s1490_s7 = inlined_call_operand.vmem [shape: f32[1,32], index: 7, kind: input, shape index: {}]   ;;  %s1491_s8 = inlined_call_operand.vmem [shape: f32[1,32], index: 8, kind: input, shape index: {}]   ;;  %s1492_s9 = inlined_call_operand.vmem [shape: bf16[16,32], index: 9, kind: output, shape index: {0}]   ;;  %s1493_s10 = inlined_call_operand.vmem [shape: f32[16,128], index: 10, kind: output, shape index: {1}]  }
   0x1   :  { %s1338_s15 = smov 0  }
   0x2 LB: > { %s36_s16 = sadd.s32 1, %s1269_s14  ;;  %p1115_p0 = scmp.ge.s32.totalorder %s1273_s15, 1  ;;  %s1273_s15 = sphi %s1338_s15, %s21_s15   ;;  %s1269_s14 = sphi %s1336_s14, %s1497_s14   ;;  %s1265_s13 = sphi %s1334_s13, %s1496_s13  }
   0x3   : > { %p38_p1 = scmp.ge.s32.totalorder %s36_s16, 4  ;;  %p388_p2 = scmp.lt.s32.totalorder %s1273_s15, 5 }
   0x5   : > { %s1499_s16 = smov (%p38_p1, %s36_s16), 0  ;;  %p389_p3 = pnand %p1115_p0, %p388_p2 }
   0x6   : > { %1494 = sst [smem:[#allocation4_spill]] %s1499_s16  ;;  %p463_p4 = scmp.lt.s32.totalorder (!%p389_p3), %s1265_s13, 3 }
   0x7   : > { %392 = sbr.rel (%p389_p3) target bundleno = 2275 (0x8e3), region = 56  ;;  %p503_p5 = scmp.eq.s32.totalorder (!%p389_p3), %s1265_s13, 0 }
   0xc   : > { %s1357_s17 = scalar_select %p463_p4, %s1265_s13, 3  ;;  %v1225_v0 = vld [vmem:[%s1484_s1 + $0x8] sm:$0xff] (%p503_p5)   ;;  %v1275_v1 = vmov (%p503_p5), 0.0   ;;  %v1226_v2 = vld [vmem:[%s1484_s1] sm:$0xff] (%p503_p5)   ;;  %vm1276_vm0 = vmmov (%p503_p5), 0   ;;  %vm539_vm1 = vcmask (%p503_p5), 261120   ;;  %v604_v25 = vlaneseq (%p503_p5) }
   0xd   : > { %508 = sbr.rel (!%p503_p5) target bundleno = 1541 (0x605), region = 60  ;;  %1169 = vmatprep.subr.bf16.mxu0 (%p503_p5), %v1275_v1  ;;  %1173 = vmatprep.mubr.msk.bf16.mxu0 (%p503_p5), %vm1276_vm0, %v1275_v1  ;;  %698 = vst.msk [vmem:[#allocation3] sm:$0xff] (%p503_p5), %vm539_vm1, %v1275_v1  ;;  %699 = vst.msk [vmem:[#allocation3 + $0x8] sm:$0xff] (%p503_p5), %vm539_vm1, %v1275_v1  ;;  %v1227_v3 = vld [vmem:[%s1483_s0] sm:$0xff] (%p503_p5)  }
   0xe   : > { %s1148_s18 = sshll.u32 %s1357_s17, 4  ;;  %s476_s21 = scalar_lea.vmem %s1487_s4, %s1357_s17  ;;  %1170 = vmatpush3.bf16.msra.mxu0 (%p503_p5), %v1225_v0  ;;  %v1121_v4 = vld [vmem:[%s1485_s2] ss:$0 sm:$0xff] (%p503_p5)  ;;  %v1403_v26 = vand.u32 (%p503_p5), 127, %v604_v25 }
   0xf   : > { %s1367_s24 = scalar_lea.vmem %s1486_s3, %s1148_s18  ;;  %s1149_s25 = sshll.u32 %s1357_s17, 5  ;;  %1171 = vmatprep.subr.bf16.mxu0 (%p503_p5), %v1275_v1 }
  0x10   : > { %s1373_s28 = scalar_lea.vmem %s1488_s5, %s1149_s25  ;;  %s489_s11 = scalar_lea.vmem %s1489_s6, %s1357_s17 }
  0x12   : > { %1172 = vmatpush3.bf16.msra.mxu0 %v1226_v2 }
  0x15   : > { %1174 = vmatmul.mubr.msk.bf16.vlgmr.msra.gmra.mxu0 %vm539_vm1, %v1227_v3 }
  0xd5   : > { %v577_v5 = vpop.f32.mrf.mxu0 }
  0xd6   : > { %v578_v6 = vadd.f32 %v1121_v4, %v577_v5 }
  0xd7   : > { %v1175_v7 = vpop.f32.mrf.mxu0 }
  0xd8   : > { %584 = vst [vmem:[%s1493_s10] sm:$0xff] %v578_v6  ;;  %586 = vmax.xlane.f32.xlu0 %v578_v6 }
  0xd9   : > { %v580_v8 = vpop.f32.mrf.mxu0 }
  0xda   : > { %v581_v9 = vadd.f32 %v1121_v4, %v580_v8 }
  0xdb   : > { %v1176_v10 = vpop.f32.mrf.mxu0 }
  0xdc   : > { %585 = vst [vmem:[%s1493_s10 + $0x8] sm:$0xff] %v581_v9  ;;  %588 = vmax.xlane.f32.xlu0 %v581_v9 }
 0x161   : > { %v587_v11 = vpop.xlane.xlu0 %586 }
 0x162   : > { %v590_v12 = vsub.f32 %v578_v6, %v587_v11 }
 0x164   : > { %v592_v13 = vmul.f32 1.442695, %v590_v12 }
 0x165   : > { %v589_v14 = vpop.xlane.xlu0 %588 }
 0x166   : > { %1228 = vpow2.f32 %v592_v13  ;;  %v591_v15 = vsub.f32 %v581_v9, %v589_v14 }
 0x168   : > { %v594_v16 = vmul.f32 1.442695, %v591_v15 }
 0x16a   : > { %1230 = vpow2.f32 %v594_v16 }
 0x173   : > { %v1229_v17 = vpop.eup %1228 }
 0x174   : > { %596 = vadd.xlane.f32.xlu1 %v1229_v17 }
 0x177   : > { %v1231_v18 = vpop.eup %1230 }
 0x178   : > { %598 = vadd.xlane.f32.xlu1 %v1231_v18 }
 0x1fd   : > { %v597_v19 = vpop.xlane.xlu1 %596 }
 0x1fe   : > { %1232 = vrcp.f32 %v597_v19 }
 0x201   : > { %v599_v20 = vpop.xlane.xlu1 %598 }
 0x202   : > { %1234 = vrcp.f32 %v599_v20 }
 0x20b   : > { %v1233_v21 = vpop.eup %1232 }
 0x20c   : > { %v1397_v22 = vmul.f32 %v1233_v21, %v1229_v17 }
 0x20e   : > { %606 = vmax.xlane.f32.xlu0 %v1397_v22 }
 0x20f   : > { %v1235_v23 = vpop.eup %1234 }
 0x210   : > { %v1400_v24 = vmul.f32 %v1235_v23, %v1231_v18 }
 0x212   : > { %608 = vmax.xlane.f32.xlu1 %v1400_v24 }
 0x297   : > { %v607_v27 = vpop.xlane.xlu0 %606 }
 0x298   : > { %vm610_vm2 = vcmp.ge.f32.partialorder %v1397_v22, %v607_v27 }
 0x299   : > { %v612_v28 = vsel %vm610_vm2, %v1403_v26, 128 }
 0x29a   : > { %v615_v29 = vshra.s32 %v612_v28, 16  ;;  %v614_v35 = vand.u32 65535, %v612_v28 }
 0x29b   : > { %v609_v30 = vpop.xlane.xlu1 %608 }
 0x29c   : > { %vm611_vm3 = vcmp.ge.f32.partialorder %v1400_v24, %v609_v30  ;;  %v617_v31 = vcvt.s32.f32 %v615_v29  ;;  %v616_v38 = vcvt.s32.f32 %v614_v35 }
 0x29d   : > { %v613_v32 = vsel %vm611_vm3, %v1403_v26, 128 }
 0x29e   : > { %618 = vmin.xlane.f32.xlu0 %v617_v31  ;;  %v629_v33 = vshra.s32 %v613_v32, 16  ;;  %v628_v36 = vand.u32 65535, %v613_v32 }
 0x2a0   : > { %v631_v34 = vcvt.s32.f32 %v629_v33  ;;  %v630_v41 = vcvt.s32.f32 %v628_v36 }
 0x2a2   : > { %632 = vmin.xlane.f32.xlu1 %v631_v34 }
 0x327   : > { %v619_v37 = vpop.xlane.xlu0 %618 }
 0x328   : > { %vm620_vm4 = vcmp.eq.f32.partialorder %v617_v31, %v619_v37  ;;  %v625_v43 = vcvt.f32.s32 %v619_v37 }
 0x329   : > { %v621_v39 = vsel %vm620_vm4, %v616_v38, inf }
 0x32a   : > { %622 = vmin.xlane.f32.xlu0 %v621_v39  ;;  %v626_v45 = vshll.u32 %v625_v43, 16 }
 0x32b   : > { %v633_v40 = vpop.xlane.xlu1 %632 }
 0x32c   : > { %vm634_vm5 = vcmp.eq.f32.partialorder %v631_v34, %v633_v40  ;;  %v639_v46 = vcvt.f32.s32 %v633_v40 }
 0x32d   : > { %v635_v42 = vsel %vm634_vm5, %v630_v41, inf }
 0x32e   : > { %636 = vmin.xlane.f32.xlu1 %v635_v42  ;;  %v640_v50 = vshll.u32 %v639_v46, 16 }
 0x3b3   : > { %v623_v44 = vpop.xlane.xlu0 %622 }
 0x3b4   : > { %v624_v47 = vcvt.f32.s32 %v623_v44 }
 0x3b6   : > { %v627_v48 = vadd.s32 %v626_v45, %v624_v47 }
 0x3b7   : > { %v637_v49 = vpop.xlane.xlu1 %636 }
 0x3b8   : > { %v638_v51 = vcvt.f32.s32 %v637_v49  ;;  %vm642_vm6 = vcmp.eq.s32.totalorder %v1403_v26, %v627_v48 }
 0x3b9   : > { %v646_v52 = vsel %vm642_vm6, -1.0, %v1397_v22  ;;  %v644_v14 = vsel %vm642_vm6, %v1397_v22, 0.0 }
 0x3ba   : > { %v641_v53 = vadd.s32 %v640_v50, %v638_v51  ;;  %648 = vmax.xlane.f32.xlu0 %v646_v52 }
 0x3bc   : > { %vm643_vm7 = vcmp.eq.s32.totalorder %v1403_v26, %v641_v53 }
 0x3bd   : > { %v647_v54 = vsel %vm643_vm7, -1.0, %v1400_v24  ;;  %v645_v19 = vsel %vm643_vm7, %v1400_v24, 0.0 }
 0x3be   : > { %650 = vmax.xlane.f32.xlu1 %v647_v54 }
 0x443   : > { %v649_v55 = vpop.xlane.xlu0 %648 }
 0x444   : > { %vm652_vm8 = vcmp.ge.f32.partialorder %v646_v52, %v649_v55 }
 0x445   : > { %v654_v56 = vsel %vm652_vm8, %v1403_v26, 128 }
 0x446   : > { %v657_v57 = vshra.s32 %v654_v56, 16  ;;  %v656_v63 = vand.u32 65535, %v654_v56 }
 0x447   : > { %v651_v58 = vpop.xlane.xlu1 %650 }
 0x448   : > { %vm653_vm9 = vcmp.ge.f32.partialorder %v647_v54, %v651_v58  ;;  %v659_v59 = vcvt.s32.f32 %v657_v57  ;;  %v658_v2 = vcvt.s32.f32 %v656_v63 }
 0x449   : > { %v655_v60 = vsel %vm653_vm9, %v1403_v26, 128 }
 0x44a   : > { %660 = vmin.xlane.f32.xlu0 %v659_v59  ;;  %v671_v61 = vshra.s32 %v655_v60, 16  ;;  %v670_v0 = vand.u32 65535, %v655_v60 }
 0x44c   : > { %v673_v62 = vcvt.s32.f32 %v671_v61  ;;  %v672_v5 = vcvt.s32.f32 %v670_v0 }
 0x44e   : > { %674 = vmin.xlane.f32.xlu1 %v673_v62 }
 0x4d3   : > { %v661_v1 = vpop.xlane.xlu0 %660 }
 0x4d4   : > { %vm662_vm10 = vcmp.eq.f32.partialorder %v659_v59, %v661_v1  ;;  %v667_v7 = vcvt.f32.s32 %v661_v1 }
 0x4d5   : > { %v663_v3 = vsel %vm662_vm10, %v658_v2, inf }
 0x4d6   : > { %664 = vmin.xlane.f32.xlu0 %v663_v3  ;;  %v668_v9 = vshll.u32 %v667_v7, 16 }
 0x4d7   : > { %v675_v4 = vpop.xlane.xlu1 %674 }
 0x4d8   : > { %vm676_vm11 = vcmp.eq.f32.partialorder %v673_v62, %v675_v4  ;;  %v681_v10 = vcvt.f32.s32 %v675_v4 }
 0x4d9   : > { %v677_v6 = vsel %vm676_vm11, %v672_v5, inf }
 0x4da   : > { %678 = vmin.xlane.f32.xlu1 %v677_v6  ;;  %v682_v15 = vshll.u32 %v681_v10, 16 }
 0x55f   : > { %v665_v8 = vpop.xlane.xlu0 %664 }
 0x560   : > { %v666_v11 = vcvt.f32.s32 %v665_v8 }
 0x562   : > { %v669_v12 = vadd.s32 %v668_v9, %v666_v11 }
 0x563   : > { %v679_v13 = vpop.xlane.xlu1 %678 }
 0x564   : > { %v680_v16 = vcvt.f32.s32 %v679_v13  ;;  %vm684_vm12 = vcmp.eq.s32.totalorder %v1403_v26, %v669_v12 }
 0x565   : > { %v686_v17 = vsel %vm684_vm12, %v1397_v22, %v644_v14 }
 0x566   : > { %v683_v18 = vadd.s32 %v682_v15, %v680_v16  ;;  %688 = vadd.xlane.f32.xlu0 %v686_v17 }
 0x568   : > { %vm685_vm13 = vcmp.eq.s32.totalorder %v1403_v26, %v683_v18 }
 0x569   : > { %v687_v20 = vsel %vm685_vm13, %v1400_v24, %v645_v19 }
 0x56a   : > { %690 = vadd.xlane.f32.xlu1 %v687_v20 }
 0x5ef   : > { %v689_v21 = vpop.xlane.xlu0 %688 }
 0x5f0   : > { %1236 = vrcp.f32 %v689_v21 }
 0x5f3   : > { %v691_v23 = vpop.xlane.xlu1 %690 }
 0x5f4   : > { %1238 = vrcp.f32 %v691_v23 }
 0x5fd   : > { %v1237_v25 = vpop.eup %1236 }
 0x5fe   : > { %v693_v27 = vmul.f32 %v1237_v25, %v686_v17 }
 0x600   : > { %696 = vst [vmem:[#allocation2] sm:$0xff] %v693_v27 }
 0x601   : > { %v1239_v28 = vpop.eup %1238 }
 0x602   : > { %v695_v22 = vmul.f32 %v1239_v28, %v687_v20 }
 0x604   : > { %697 = vst [vmem:[#allocation2 + $0x8] sm:$0xff] %v695_v22 }
 0x605 PF: > { %v1240_v29 = vld [vmem:[%s1367_s24 + $0x8] sm:$0xff]   ;;  %v1277_v30 = vmov 0.0   ;;  %v1241_v24 = vld [vmem:[%s1367_s24] sm:$0xff]   ;;  %vm1278_vm14 = vmmov 0   ;;  %v1243_v26 = vld [vmem:[%s1373_s28 + $0x18] sm:$0xff]   ;;  %vm742_vm15 = vcmask 261120   ;;  %v700_v35 = vlaneseq }
 0x606   : > { %1177 = vmatprep.subr.bf16.mxu0 %v1277_v30  ;;  %1185 = vmatprep.subr.bf16.mxu1 %v1277_v30  ;;  %v1242_v31 = vld [vmem:[%s1483_s0] sm:$0xff]   ;;  %v1244_v32 = vld [vmem:[%s1373_s28 + $0x10] sm:$0xff]   ;;  %v1245_v33 = vld [vmem:[%s1373_s28 + $0x8] sm:$0xff]   ;;  %v702_v36 = vstv %s1265_s13  ;;  %vm833_vm1 = vcmask 523264   ;;  %p886_p6 = scmp.eq.s32.totalorder %s1265_s13, 3 }
 0x607   : > { %1178 = vmatpush3.bf16.msra.mxu0 %v1240_v29  ;;  %1181 = vmatprep.mubr.msk.bf16.mxu0 %vm1278_vm14, %v1277_v30  ;;  %v1246_v34 = vld [vmem:[%s1373_s28] sm:$0xff]   ;;  %v701_v37 = vand.u32 127, %v700_v35  ;;  %v878_v57 = vld [vmem:[#allocation3] sm:$0xff]  ;;  %v879_v0 = vld [vmem:[#allocation3 + $0x8] sm:$0xff]  ;;  %vm952_vm2 = vcmask (%p886_p6), 257024  }
 0x608   : > { %1179 = vmatprep.subr.bf16.mxu0 %v1277_v30  ;;  %1193 = vmatprep.mubr.msk.bf16.mxu1 %vm1278_vm14, %v1277_v30  ;;  %v704_v38 = vld [vmem:[#allocation2] sm:$0xff] }
 0x609   : > { %1186 = vmatpush3.bf16.msra.mxu1 %v1243_v26  ;;  %vm703_vm0 = vcmp.eq.s32.totalorder %v701_v37, %v702_v36  ;;  %v1126_v42 = vld [vmem:[%s476_s21] ss:$0 sm:$0xff] }
 0x60a   : > { %1187 = vmatprep.subr.bf16.mxu1 %v1277_v30  ;;  %v706_v40 = vsel %vm703_vm0, %v704_v38, 0.0  ;;  %v1131_v52 = vld [vmem:[%s489_s11] ss:$0 sm:$0xff] }
 0x60b   : > { %1180 = vmatpush3.bf16.msra.mxu0 %v1241_v24  ;;  %v705_v39 = vld [vmem:[#allocation2 + $0x8] sm:$0xff]  ;;  %708 = vadd.xlane.f32.xlu0 %v706_v40  ;;  %v1155_v3 = vld [vmem:[%s1483_s0] sm:$0xff] (%p886_p6)  }
 0x60c   : > { %v707_v41 = vsel %vm703_vm0, %v705_v39, 0.0  ;;  %v1156_v6 = vunpack.c.l.bf16 (%p886_p6), %v1155_v3  ;;  %v1157_v7 = vunpack.c.h.bf16 (%p886_p6), %v1155_v3 }
 0x60d   : > { %1188 = vmatpush3.bf16.msra.mxu1 %v1244_v32 }
 0x60e   : > { %1182 = vmatmul.mubr.msk.bf16.vlgmr.msra.gmra.mxu0 %vm742_vm15, %v1242_v31  ;;  %1189 = vmatprep.subr.bf16.mxu1 %v1277_v30  ;;  %v1139_v31 = vld [vmem:[%s1491_s8] ss:$0 sm:$0xff] (%p886_p6) }
 0x60f   : > { %710 = vadd.xlane.f32.xlu0 %v707_v41 }
 0x611   : > { %1190 = vmatpush3.bf16.msra.mxu1 %v1245_v33 }
 0x612   : > { %1191 = vmatprep.subr.bf16.mxu1 %v1277_v30  ;;  %v1138_v30 = vld [vmem:[%s1490_s7] ss:$0 sm:$0xff] (%p886_p6) }
 0x615   : > { %1192 = vmatpush3.bf16.msra.mxu1 %v1246_v34 }
 0x694   : > { %v709_v53 = vpop.xlane.xlu0 %708 }
 0x698   : > { %v711_v60 = vpop.xlane.xlu0 %710 }
 0x6ce   : > { %v780_v43 = vpop.f32.mrf.mxu0 }
 0x6cf   : > { %v781_v45 = vadd.f32 %v1126_v42, %v780_v43 }
 0x6d0   : > { %v1183_v44 = vpop.f32.mrf.mxu0 }
 0x6d1   : > { %v787_v49 = vmax.f32 %v781_v45, 0.0 }
 0x6d2   : > { %v783_v46 = vpop.f32.mrf.mxu0 }
 0x6d3   : > { %v784_v47 = vadd.f32 %v1126_v42, %v783_v46 }
 0x6d4   : > { %v1184_v48 = vpop.f32.mrf.mxu0 }
 0x6d5   : > { %v788_v50 = vmax.f32 %v784_v47, 0.0 }
 0x6d7   : > { %v789_v51 = vpack.c.bf16 %v788_v50, %v787_v49 }
 0x6d9   : > { %1194 = vmatmul.mubr.msk.bf16.vlgmr.msra.gmra.mxu1 %vm833_vm1, %v789_v51 }
 0x799   : > { %v871_v54 = vpop.f32.mrf.mxu1 }
 0x79a   : > { %v872_v55 = vadd.f32 %v1131_v52, %v871_v54 }
 0x79b   : > { %v1195_v56 = vpop.f32.mrf.mxu1 }
 0x79c   : > { %v880_v58 = vmul.f32 %v872_v55, %v709_v53 }
 0x79d   : > { %v874_v59 = vpop.f32.mrf.mxu1 }
 0x79e   : > { %v882_v61 = vadd.f32 %v880_v58, %v878_v57  ;;  %v875_v62 = vadd.f32 %v1131_v52, %v874_v59 }
 0x79f   : > { %v1196_v63 = vpop.f32.mrf.mxu1 }
 0x7a0   : > { %884 = vst.msk [vmem:[#allocation3] sm:$0xff] %vm742_vm15, %v882_v61  ;;  %v881_v1 = vmul.f32 %v875_v62, %v711_v60  ;;  %890 = sbr.rel (!%p886_p6) target bundleno = 2275 (0x8e3), region = 64 }
 0x7a2   : > { %v883_v2 = vadd.f32 %v881_v1, %v879_v0 }
 0x7a4   : > { %885 = vst.msk [vmem:[#allocation3 + $0x8] sm:$0xff] %vm742_vm15, %v883_v2 }
 0x7a7   : > { %v895_v4 = vld [vmem:[#allocation3] sm:$0xff] }
 0x7a8   : > { %v897_v8 = vadd.f32 %v1156_v6, %v895_v4 }
 0x7aa   : > { %v899_v10 = vsel %vm742_vm15, %v897_v8, 0.0 }
 0x7ab   : > { %v896_v5 = vld [vmem:[#allocation3 + $0x8] sm:$0xff]  ;;  %900 = vadd.xlane.f32.xlu0 %v899_v10 }
 0x7ac   : > { %v898_v9 = vadd.f32 %v1157_v7, %v896_v5 }
 0x7ae   : > { %v902_v11 = vsel %vm742_vm15, %v898_v9, 0.0 }
 0x7af   : > { %903 = vadd.xlane.f32.xlu0 %v902_v11 }
 0x834   : > { %v901_v12 = vpop.xlane.xlu0 %900 }
 0x835   : > { %v906_v13 = vmul.f32 0.03125, %v901_v12 }
 0x837   : > { %v908_v14 = vsub.f32 %v897_v8, %v906_v13 }
 0x838   : > { %v904_v15 = vpop.xlane.xlu0 %903 }
 0x839   : > { %v907_v16 = vmul.f32 0.03125, %v904_v15  ;;  %v910_v17 = vmul.f32 %v908_v14, %v908_v14  ;;  %v927_v24 = vmul.f32 %v1138_v30, %v908_v14 }
 0x83b   : > { %v909_v18 = vsub.f32 %v898_v9, %v907_v16  ;;  %v912_v19 = vsel %vm742_vm15, %v910_v17, 0.0 }
 0x83c   : > { %913 = vadd.xlane.f32.xlu1 %v912_v19 }
 0x83d   : > { %v911_v20 = vmul.f32 %v909_v18, %v909_v18  ;;  %v928_v33 = vmul.f32 %v1138_v30, %v909_v18 }
 0x83f   : > { %v915_v21 = vsel %vm742_vm15, %v911_v20, 0.0 }
 0x840   : > { %916 = vadd.xlane.f32.xlu1 %v915_v21 }
 0x8c5   : > { %v914_v23 = vpop.xlane.xlu1 %913 }
 0x8c6   : > { %v918_v25 = vmul.f32 0.03125, %v914_v23 }
 0x8c8   : > { %v929_v27 = vadd.f32 1e-05, %v918_v25 }
 0x8c9   : > { %v917_v28 = vpop.xlane.xlu1 %916 }
 0x8ca   : > { %1247 = vrsqrt.f32 %v929_v27  ;;  %v919_v22 = vmul.f32 0.03125, %v917_v28 }
 0x8cc   : > { %v930_v29 = vadd.f32 1e-05, %v919_v22 }
 0x8ce   : > { %1249 = vrsqrt.f32 %v930_v29 }
 0x8d7   : > { %v1248_v26 = vpop.eup %1247 }
 0x8d8   : > { %v933_v32 = vmul.f32 %v1248_v26, %v927_v24 }
 0x8da   : > { %v942_v34 = vadd.f32 %v1139_v31, %v933_v32 }
 0x8db   : > { %v1250_v35 = vpop.eup %1249 }
 0x8dc   : > { %v1152_v36 = vpack.c.bf16 %v942_v34, %v942_v34  ;;  %v934_v37 = vmul.f32 %v1250_v35, %v928_v33 }
 0x8de   : > { %953 = vst.msk [vmem:[%s1492_s9] sm:$0xf] %vm952_vm2, %v1152_v36  ;;  %v943_v38 = vadd.f32 %v1139_v31, %v934_v37 }
 0x8e0   : > { %v1153_v39 = vpack.c.bf16 %v943_v38, %v943_v38 }
 0x8e2   : > { %954 = vst.msk [vmem:[%s1492_s9 + $0x4] sm:$0xf] %vm952_vm2, %v1153_v39 }
 0x8e3 PF: > { %s21_s15 = sadd.s32 1, %s1273_s15   ;;  %s1495_s27 = sld [smem:[#allocation4_spill]] }
 0x8e4   : > { %p18_p7 = scmp.ge.s32.totalorder %s21_s15, 6   ;;  %s1496_s13 = smov %s1269_s14 }
 0x8e6   :  { %20 = sbr.rel (!%p18_p7) target bundleno = 2 (0x2), region = 118 }
 0x8e9   : > { %s1497_s14 = smov %s1495_s27 }

// kernel: forward.7
= control target key start
LH: loop header
LB: loop body
LE: loop exit
PB: predicated region body
PF: predicated region fallthrough
CT: control target
= control target key end

     0   :  { %s1894_s17 = smov 0   ;;  %s1896_s18 = smov 0   ;;  %s2167_s0 = inlined_call_operand.vmem [shape: bf16[2,8,32], index: 0, kind: input, shape index: {}, may-alias: {0,1}]   ;;  %s2168_s1 = inlined_call_operand.vmem [shape: bf16[2,8,32], index: 1, kind: input, shape index: {}, may-alias: {0,1}]   ;;  %s2169_s2 = inlined_call_operand.vmem [shape: f32[2,1,8], index: 2, kind: input, shape index: {}]   ;;  %s2170_s3 = inlined_call_operand.vmem [shape: bf16[32,32], index: 3, kind: input, shape index: {}]   ;;  %s2171_s4 = inlined_call_operand.vmem [shape: f32[1,32], index: 4, kind: input, shape index: {}]   ;;  %s2172_s5 = inlined_call_operand.vmem [shape: bf16[32,64], index: 5, kind: input, shape index: {}]   ;;  %s2173_s6 = inlined_call_operand.vmem [shape: f32[1,64], index: 6, kind: input, shape index: {}]   ;;  %s2174_s7 = inlined_call_operand.vmem [shape: bf16[32,32], index: 7, kind: input, shape index: {}]   ;;  %s2175_s8 = inlined_call_operand.vmem [shape: f32[1,32], index: 8, kind: input, shape index: {}]   ;;  %s2176_s9 = inlined_call_operand.vmem [shape: f32[1,32], index: 9, kind: input, shape index: {}]   ;;  %s2177_s10 = inlined_call_operand.vmem [shape: f32[1,32], index: 10, kind: input, shape index: {}]   ;;  %s2178_s11 = inlined_call_operand.vmem [shape: bf16[2,8,32], index: 11, kind: output, shape index: {}]  }
   0x1   :  { %s1898_s19 = smov 0  }
   0x2 LB: > { %s40_s20 = sadd.s32 1, %s1817_s18  ;;  %p1582_p0 = scmp.ge.s32.totalorder %s1821_s19, 1  ;;  %s1821_s19 = sphi %s1898_s19, %s21_s19   ;;  %s1817_s18 = sphi %s1896_s18, %s2180_s18   ;;  %s1813_s17 = sphi %s1894_s17, %s2179_s17  }
   0x3   : > { %p42_p1 = scmp.ge.s32.totalorder %s40_s20, 2  ;;  %p389_p2 = scmp.lt.s32.totalorder %s1821_s19, 3 }
   0x5   : > { %s2182_s20 = smov (%p42_p1, %s40_s20), 0  ;;  %p390_p3 = pnand %p1582_p0, %p389_p2 }
   0x6   : > { %p446_p4 = scmp.lt.s32.totalorder (!%p390_p3), %s1813_s17, 1  ;;  %s1825_s25 = smov (!%p390_p3), 112  }
   0x7   : > { %393 = sbr.rel (%p390_p3) target bundleno = 1638 (0x666), region = 64  ;;  %s1826_s26 = smov (!%p390_p3), 120  }
   0x8   : > { %s1827_s27 = smov (!%p390_p3), 104   ;;  %s1831_s14 = smov (!%p390_p3), 88  }
   0x9   : > { %s1832_s15 = smov (!%p390_p3), 80  }
   0xc   : > { %v1769_v0 = vld [vmem:[%s2170_s3 + $0x8] sm:$0xff]   ;;  %v1823_v1 = vmov 0.0   ;;  %v1771_v3 = vld [vmem:[%s2170_s3] sm:$0xff]   ;;  %vm1824_vm0 = vmmov 0   ;;  %s2184_s17 = smov (!%p446_p4, %s1813_s17), 1  ;;  %vm502_vm1 = vcmask 261120  }
   0xd   : > { %1644 = vmatprep.subr.bf16.mxu0 %v1823_v1  ;;  %1652 = vmatprep.subr.bf16.mxu1 %v1823_v1  ;;  %v1770_v2 = vld [vmem:[%s2172_s5 + $0x8] sm:$0xff]   ;;  %v1772_v4 = vld [vmem:[%s2172_s5] sm:$0xff]   ;;  %s1935_s29 = sshll.u32 %s2184_s17, 2  ;;  %vm577_vm2 = vcmask 64512   ;;  %vm548_vm3 = vcmask 60416   ;;  %s465_s12 = scalar_lea.vmem %s2169_s2, %s2184_s17  ;;  %vm568_vm4 = vcmask 7168  }
   0xe   : > { %1645 = vmatpush3.bf16.msra.mxu0 %v1769_v0  ;;  %1648 = vmatprep.mubr.msk.bf16.mxu0 %vm1824_vm0, %v1823_v1  ;;  %s1941_s13 = scalar_lea.vmem %s2167_s0, %s1935_s29  ;;  %s459_s16 = scalar_lea.vmem %s2168_s1, %s1935_s29  ;;  %578 = vst.msk [vmem:[#allocation5] sm:$0xff] %vm577_vm2, %v1823_v1  ;;  %579 = vst.msk [vmem:[#allocation5 + $0x8] sm:$0xff] %vm577_vm2, %v1823_v1  ;;  %v1586_v7 = vld [vmem:[%s2171_s4] ss:$0 sm:$0xff]  ;;  %v1828_v43 = vmov -1e+30  }
   0xf   : > { %1653 = vmatpush3.bf16.msra.mxu1 %v1770_v2  ;;  %1646 = vmatprep.subr.bf16.mxu0 %v1823_v1  ;;  %v478_v5 = vld [vmem:[%s1941_s13] sm:$0xf]  ;;  %580 = vst.msk [vmem:[#allocation5 + $0x10] sm:$0xff] %vm577_vm2, %v1823_v1  ;;  %581 = vst.msk [vmem:[#allocation5 + $0x18] sm:$0xff] %vm577_vm2, %v1823_v1  ;;  %v1829_v44 = vmov 0   ;;  %s1830_s17 = smov 96   ;;  %s472_s22 = scalar_lea.vmem %s2178_s11, %s1935_s29 }
  0x10   : > { %1654 = vmatprep.subr.bf16.mxu1 %v1823_v1  ;;  %1656 = vmatprep.mubr.msk.bf16.mxu1 %vm1824_vm0, %v1823_v1  ;;  %v582_v6 = vld [vmem:[%s459_s16] sm:$0xf]  ;;  %569 = vst.msk [vmem:[#allocation3] sm:$0xff] %vm568_vm4, %v1828_v43  ;;  %570 = vst.msk [vmem:[#allocation3 + $0x8] sm:$0xff] %vm568_vm4, %v1828_v43  ;;  %s1833_s16 = smov 72   ;;  %vm744_vm5 = vcmask 1043456  }
  0x11   : > { %v1591_v8 = vld [vmem:[%s2173_s6] ss:$0 sm:$0xff]  ;;  %571 = vst.msk [vmem:[#allocation3 + $0x10] sm:$0xff] %vm568_vm4, %v1828_v43  ;;  %572 = vst.msk [vmem:[#allocation3 + $0x18] sm:$0xff] %vm568_vm4, %v1828_v43  ;;  %1767 = vset.pattern.permute.xlu1 %v1829_v44  ;;  %1768 = vset.pattern.permute.xlu0 %v1829_v44  ;;  %vm1472_vm6 = vcmask 257024  }
  0x12   : > { %1647 = vmatpush3.bf16.msra.mxu0 %v1771_v3  ;;  %v1595_v36 = vld [vmem:[%s465_s12] ss:$0 sm:$0xff]  ;;  %573 = vst.msk [vmem:[#allocation4] sm:$0xff] %vm568_vm4, %v1823_v1  ;;  %574 = vst.msk [vmem:[#allocation4 + $0x8] sm:$0xff] %vm568_vm4, %v1823_v1 }
  0x13   : > { %1655 = vmatpush3.bf16.msra.mxu1 %v1772_v4  ;;  %1660 = vmatprep.subr.bf16.mxu0 %v1823_v1  ;;  %575 = vst.msk [vmem:[#allocation4 + $0x10] sm:$0xff] %vm568_vm4, %v1823_v1  ;;  %576 = vst.msk [vmem:[#allocation4 + $0x18] sm:$0xff] %vm568_vm4, %v1823_v1 }
  0x14   : > { %1666 = vmatprep.subr.bf16.mxu1 %v1823_v1 }
  0x15   : > { %1649 = vmatmul.mubr.msk.bf16.vlgmr.msra.gmra.mxu0 %vm502_vm1, %v478_v5 }
  0x16   : > { %1657 = vmatmul.mubr.msk.bf16.vlgmr.msra.gmra.mxu1 %vm502_vm1, %v582_v6  ;;  %1662 = vmatprep.mubr.msk.bf16.mxu0 %vm1824_vm0, %v1823_v1 }
  0x17   : > { %1668 = vmatprep.mubr.msk.bf16.mxu1 %vm1824_vm0, %v1823_v1  ;;  %v2026_v62 = vld [vmem:[#allocation3] sm:$0xff]  ;;  %v2036_v4 = vld [vmem:[#allocation3 + $0x8] sm:$0xff] }
  0xd5   : > { %v540_v9 = vpop.f32.mrf.mxu0 }
  0xd6   : > { %v541_v10 = vadd.f32 %v1586_v7, %v540_v9  ;;  %v644_v11 = vpop.f32.mrf.mxu1 }
  0xd7   : > { %v645_v12 = vadd.f32 %v1591_v8, %v644_v11  ;;  %v1650_v13 = vpop.f32.mrf.mxu0  ;;  %v2046_v8 = vld [vmem:[#allocation3 + $0x10] sm:$0xff] }
  0xd8   : > { %v546_v14 = vmul.f32 0.35355338, %v541_v10  ;;  %v1658_v15 = vpop.f32.mrf.mxu1 }
  0xd9   : > { %v1970_v16 = vpack.c.bf16 %v645_v12, %v645_v12  ;;  %v543_v17 = vpop.f32.mrf.mxu0  ;;  %v2056_v12 = vld [vmem:[#allocation3 + $0x18] sm:$0xff] }
  0xda   : > { %v547_v18 = vpack.c.bf16 %v546_v14, %v546_v14  ;;  %v647_v19 = vpop.f32.mrf.mxu1 }
  0xdb   : > { %v1651_v20 = vpop.f32.mrf.mxu0  ;;  %v664_v21 = vsel %vm577_vm2, %v1970_v16, 0 }
  0xdc   : > { %549 = vst.msk [vmem:[#allocation2] sm:$0xf] %vm548_vm3, %v547_v18  ;;  %v1659_v22 = vpop.f32.mrf.mxu1  ;;  %558 = vrot.lane.b32.xlu1 %v547_v18, %s1825_s25  ;;  %553 = vrot.lane.b32.xlu0 %v547_v18, %s1826_s26 }
  0xdd   : > { %1661 = vmatpush3.bf16.xpose.msra.mxu0 %v664_v21 }
  0xde   : > { %1672 = vmatprep.subr.bf16.mxu0 %v1823_v1 }
  0xe0   : > { %928 = vrot.lane.b32.xlu1 %v1970_v16, %s1825_s25  ;;  %793 = vrot.lane.b32.xlu0 %v1970_v16, %s1826_s26 }
  0xe3   : > { %v652_v23 = vld [vmem:[#allocation2] sm:$0xf] }
  0xe4   : > { %1063 = vrot.lane.b32.xlu1 %v1970_v16, %s1827_s27  ;;  %563 = vrot.lane.b32.xlu0 %v547_v18, %s1827_s27 }
  0xe5   : > { %1663 = vmatmul.mubr.msk.bf16.vlgmr.msra.gmra.mxu0 %vm577_vm2, %v652_v23 }
  0xe6   : > { %1674 = vmatprep.mubr.msk.bf16.mxu0 %vm1824_vm0, %v1823_v1 }
 0x14e   : > { %v559_v24 = vpop.permute.xlu1 %558  ;;  %v554_v25 = vpop.permute.xlu0 %553 }
 0x14f   : > { %562 = vst.msk [vmem:[#allocation2 + $0x8] sm:$0xf] %vm548_vm3, %v559_v24  ;;  %557 = vst.msk [vmem:[#allocation2 + $0x4] sm:$0xf] %vm548_vm3, %v554_v25 }
 0x152   : > { %v794_v26 = vpop.permute.xlu0 %793  ;;  %v929_v29 = vpop.permute.xlu1 %928 }
 0x153   : > { %v799_v27 = vsel %vm577_vm2, %v794_v26, 0  ;;  %v934_v31 = vsel %vm577_vm2, %v929_v29, 0 }
 0x154   : > { %1673 = vmatpush3.bf16.xpose.msra.mxu0 %v799_v27 }
 0x155   : > { %1684 = vmatprep.subr.bf16.mxu0 %v1823_v1 }
 0x156   : > { %v564_v28 = vpop.permute.xlu0 %563  ;;  %v792_v30 = vld [vmem:[#allocation2 + $0x4] sm:$0xf]  ;;  %v1064_v32 = vpop.permute.xlu1 %1063  ;;  %v927_v33 = vld [vmem:[#allocation2 + $0x8] sm:$0xf] }
 0x157   : > { %567 = vst.msk [vmem:[#allocation2 + $0xc] sm:$0xf] %vm548_vm3, %v564_v28  ;;  %v1069_v34 = vsel %vm577_vm2, %v1064_v32, 0 }
 0x15b   : > { %1675 = vmatmul.mubr.msk.bf16.vlgmr.msra.gmra.mxu0 %vm577_vm2, %v792_v30 }
 0x15c   : > { %1685 = vmatpush3.bf16.xpose.msra.mxu0 %v934_v31  ;;  %1686 = vmatprep.mubr.msk.bf16.mxu0 %vm1824_vm0, %v1823_v1 }
 0x15d   : > { %1696 = vmatprep.subr.bf16.mxu0 %v1823_v1 }
 0x15e   : > { %v1062_v35 = vld [vmem:[#allocation2 + $0xc] sm:$0xf] }
 0x163   : > { %1687 = vmatmul.mubr.msk.bf16.vlgmr.msra.gmra.mxu0 %vm577_vm2, %v927_v33 }
 0x164   : > { %1697 = vmatpush3.bf16.xpose.msra.mxu0 %v1069_v34  ;;  %1698 = vmatprep.mubr.msk.bf16.mxu0 %vm1824_vm0, %v1823_v1 }
 0x165   : > { %1708 = vmatprep.subr.bf16.mxu0 %v1823_v1 }
 0x16b   : > { %1699 = vmatmul.mubr.msk.bf16.vlgmr.msra.gmra.mxu0 %vm577_vm2, %v1062_v35 }
 0x16c   : > { %1710 = vmatprep.mubr.msk.bf16.mxu0 %vm1824_vm0, %v1823_v1 }
 0x1a5   : > { %v700_v37 = vpop.f32.mrf.mxu0 }
 0x1a6   : > { %v2004_v38 = vadd.f32 %v1595_v36, %v700_v37 }
 0x1a7   : > { %v1664_v39 = vpop.f32.mrf.mxu0 }
 0x1a8   : > { %v707_v40 = vsel %vm577_vm2, %v2004_v38, -inf }
 0x1a9   : > { %708 = vmax.xlane.f32.xlu0 %v707_v40  ;;  %v703_v41 = vpop.f32.mrf.mxu0 }
 0x1ab   : > { %v1665_v42 = vpop.f32.mrf.mxu0 }
 0x21b   : > { %v835_v45 = vpop.f32.mrf.mxu0 }
 0x21c   : > { %v836_v46 = vadd.f32 %v1595_v36, %v835_v45 }
 0x21d   : > { %v1676_v47 = vpop.f32.mrf.mxu0 }
 0x21e   : > { %v843_v48 = vsel %vm577_vm2, %v836_v46, -inf }
 0x21f   : > { %844 = vmax.xlane.f32.xlu1 %v843_v48  ;;  %v838_v49 = vpop.f32.mrf.mxu0 }
 0x221   : > { %v1677_v50 = vpop.f32.mrf.mxu0 }
 0x223   : > { %v970_v51 = vpop.f32.mrf.mxu0 }
 0x224   : > { %v971_v52 = vadd.f32 %v1595_v36, %v970_v51 }
 0x225   : > { %v1688_v53 = vpop.f32.mrf.mxu0 }
 0x226   : > { %v978_v54 = vsel %vm577_vm2, %v971_v52, -inf }
 0x227   : > { %979 = vmax.xlane.f32.xlu0 %v978_v54  ;;  %v973_v55 = vpop.f32.mrf.mxu0 }
 0x229   : > { %v1689_v56 = vpop.f32.mrf.mxu0 }
 0x22a   : > { %v722_v56 = vld [vmem:[#allocation4] sm:$0xff] }
 0x22b   : > { %v1105_v57 = vpop.f32.mrf.mxu0 }
 0x22c   : > { %v2022_v58 = vadd.f32 %v1595_v36, %v1105_v57 }
 0x22d   : > { %v1700_v59 = vpop.f32.mrf.mxu0 }
 0x22e   : > { %v1113_v60 = vsel %vm577_vm2, %v2022_v58, -inf }
 0x22f   : > { %1114 = vmax.xlane.f32.xlu0 %v1113_v60  ;;  %v1108_v61 = vpop.f32.mrf.mxu0 }
 0x230   : > { %v1210_v61 = vld [vmem:[%s2174_s7] sm:$0xf] }
 0x231   : > { %v1701_v63 = vpop.f32.mrf.mxu0 }
 0x232   : > { %v709_v0 = vpop.xlane.xlu0 %708 }
 0x233   : > { %v2029_v2 = vmax.f32 %v2026_v62, %v709_v0  ;;  %v859_v0 = vld [vmem:[#allocation4 + $0x8] sm:$0xff] }
 0x235   : > { %v711_v3 = vsub.f32 %v2026_v62, %v2029_v2  ;;  %790 = vst.msk [vmem:[#allocation3] sm:$0xff] %vm568_vm4, %v2029_v2  ;;  %716 = vperm.xlu1 %1767, %v2029_v2   ;;  %v1215_v62 = vsel %vm744_vm5, %v1210_v61, 0  ;;  %v1390_v61 = vld [vmem:[%s2174_s7 + $0xc] sm:$0xf] }
 0x236   : > { %1709 = vmatpush3.bf16.msra.mxu0 %v1215_v62 }
 0x237   : > { %v712_v41 = vmul.f32 1.442695, %v711_v3  ;;  %1720 = vmatprep.subr.bf16.mxu0 %v1823_v1 }
 0x2a8   : > { %v845_v5 = vpop.xlane.xlu1 %844 }
 0x2a9   : > { %v2039_v6 = vmax.f32 %v2036_v4, %v845_v5  ;;  %v994_v5 = vld [vmem:[#allocation4 + $0x10] sm:$0xff] }
 0x2ab   : > { %v847_v7 = vsub.f32 %v2036_v4, %v2039_v6  ;;  %925 = vst.msk [vmem:[#allocation3 + $0x8] sm:$0xff] %vm568_vm4, %v2039_v6  ;;  %852 = vperm.xlu0 %1768, %v2039_v6  }
 0x2ad   : > { %v848_v51 = vmul.f32 1.442695, %v847_v7 }
 0x2b0   : > { %v980_v9 = vpop.xlane.xlu0 %979  ;;  %v717_v17 = vpop.permute.xlu1 %716 }
 0x2b1   : > { %v2049_v10 = vmax.f32 %v2046_v8, %v980_v9  ;;  %v719_v18 = vsub.f32 %v2004_v38, %v717_v17 }
 0x2b3   : > { %v982_v11 = vsub.f32 %v2046_v8, %v2049_v10  ;;  %1060 = vst.msk [vmem:[#allocation3 + $0x10] sm:$0xff] %vm568_vm4, %v2049_v10  ;;  %987 = vperm.xlu1 %1767, %v2049_v10   ;;  %v720_v19 = vmul.f32 1.442695, %v719_v18  ;;  %v1129_v10 = vld [vmem:[#allocation4 + $0x18] sm:$0xff] }
 0x2b5   : > { %1773 = vpow2.f32 %v720_v19  ;;  %v983_v44 = vmul.f32 1.442695, %v982_v11 }
 0x2b7   : > { %739 = vrot.lane.b32.xlu1 %v1970_v16, %s1830_s17 }
 0x2b8   : > { %v1115_v13 = vpop.xlane.xlu0 %1114 }
 0x2b9   : > { %v2060_v14 = vmax.f32 %v2056_v12, %v1115_v13 }
 0x2bb   : > { %v1117_v15 = vsub.f32 %v2056_v12, %v2060_v14  ;;  %1195 = vst.msk [vmem:[#allocation3 + $0x18] sm:$0xff] %vm568_vm4, %v2060_v14  ;;  %1122 = vperm.xlu1 %1767, %v2060_v14  }
 0x2bd   : > { %v1118_v48 = vmul.f32 1.442695, %v1117_v15  ;;  %v1274_v15 = vld [vmem:[%s2174_s7 + $0x4] sm:$0xf] }
 0x2be   : > { %v1279_v17 = vsel %vm744_vm5, %v1274_v15, 0 }
 0x2bf   : > { %875 = vrot.lane.b32.xlu1 %v1970_v16, %s1831_s14 }
 0x2c2   : > { %v1774_v20 = vpop.eup %1773 }
 0x2c3   : > { %1010 = vrot.lane.b32.xlu1 %v1970_v16, %s1832_s15  ;;  %v724_v21 = vsel %vm577_vm2, %v1774_v20, 0.0  ;;  %v737_v29 = vpack.c.bf16 %v1774_v20, %v1774_v20 }
 0x2c7   : > { %1145 = vrot.lane.b32.xlu1 %v1970_v16, %s1833_s16 }
 0x2eb   : > { %725 = vadd.xlane.f32.xlu1 %v724_v21 }
 0x326   : > { %v853_v22 = vpop.permute.xlu0 %852 }
 0x327   : > { %v855_v23 = vsub.f32 %v836_v46, %v853_v22  ;;  %v730_v22 = vld [vmem:[#allocation5] sm:$0xff] }
 0x329   : > { %v856_v24 = vmul.f32 1.442695, %v855_v23 }
 0x32b   : > { %1775 = vpow2.f32 %v856_v24 }
 0x32e   : > { %v988_v25 = vpop.permute.xlu1 %987 }
 0x32f   : > { %v990_v26 = vsub.f32 %v971_v52, %v988_v25 }
 0x331   : > { %v991_v27 = vmul.f32 1.442695, %v990_v26 }
 0x332   : > { %v740_v28 = vpop.permute.xlu1 %739 }
 0x333   : > { %1777 = vpow2.f32 %v991_v27  ;;  %v746_v16 = vsel %vm744_vm5, %v740_v28, 0  ;;  %v867_v28 = vld [vmem:[#allocation5 + $0x8] sm:$0xff] }
 0x334   : > { %1667 = vmatpush3.bf16.msra.mxu1 %v746_v16 }
 0x335   : > { %1678 = vmatprep.subr.bf16.mxu1 %v1823_v1 }
 0x336   : > { %v1123_v30 = vpop.permute.xlu1 %1122 }
 0x337   : > { %v1125_v31 = vsub.f32 %v2022_v58, %v1123_v30  ;;  %1669 = vmatmul.mubr.msk.bf16.vlgmr.msra.gmra.mxu1 %vm577_vm2, %v737_v29 }
 0x338   : > { %v1776_v32 = vpop.eup %1775  ;;  %1680 = vmatprep.mubr.msk.bf16.mxu1 %vm1824_vm0, %v1823_v1 }
 0x339   : > { %v1126_v33 = vmul.f32 1.442695, %v1125_v31  ;;  %v861_v34 = vsel %vm577_vm2, %v1776_v32, 0.0  ;;  %v874_v37 = vpack.c.bf16 %v1776_v32, %v1776_v32 }
 0x33a   : > { %v876_v35 = vpop.permute.xlu1 %875  ;;  %862 = vadd.xlane.f32.xlu0 %v861_v34 }
 0x33b   : > { %1779 = vpow2.f32 %v1126_v33  ;;  %v881_v36 = vsel %vm744_vm5, %v876_v35, 0  ;;  %v1002_v35 = vld [vmem:[#allocation5 + $0x10] sm:$0xff] }
 0x33c   : > { %1679 = vmatpush3.bf16.msra.mxu1 %v881_v36  ;;  %1781 = vpow2.f32 %v712_v41 }
 0x33d   : > { %1690 = vmatprep.subr.bf16.mxu1 %v1823_v1  ;;  %1783 = vpow2.f32 %v983_v44  ;;  %v1332_v44 = vld [vmem:[%s2174_s7 + $0x8] sm:$0xf] }
 0x33e   : > { %v1011_v38 = vpop.permute.xlu1 %1010  ;;  %1785 = vpow2.f32 %v1118_v48 }
 0x33f   : > { %v1016_v39 = vsel %vm744_vm5, %v1011_v38, 0  ;;  %1681 = vmatmul.mubr.msk.bf16.vlgmr.msra.gmra.mxu1 %vm577_vm2, %v874_v37  ;;  %1787 = vpow2.f32 %v848_v51  ;;  %v1337_v51 = vsel %vm744_vm5, %v1332_v44, 0 }
 0x340   : > { %v1778_v40 = vpop.eup %1777  ;;  %1691 = vmatpush3.bf16.msra.mxu1 %v1016_v39  ;;  %1692 = vmatprep.mubr.msk.bf16.mxu1 %vm1824_vm0, %v1823_v1 }
 0x341   : > { %v996_v42 = vsel %vm577_vm2, %v1778_v40, 0.0  ;;  %1702 = vmatprep.subr.bf16.mxu1 %v1823_v1  ;;  %v1009_v45 = vpack.c.bf16 %v1778_v40, %v1778_v40 }
 0x342   : > { %997 = vadd.xlane.f32.xlu1 %v996_v42  ;;  %v1146_v43 = vpop.permute.xlu1 %1145 }
 0x343   : > { %v1151_v46 = vsel %vm744_vm5, %v1146_v43, 0 }
 0x347   : > { %1693 = vmatmul.mubr.msk.bf16.vlgmr.msra.gmra.mxu1 %vm577_vm2, %v1009_v45 }
 0x348   : > { %v1780_v47 = vpop.eup %1779  ;;  %1703 = vmatpush3.bf16.msra.mxu1 %v1151_v46  ;;  %1704 = vmatprep.mubr.msk.bf16.mxu1 %vm1824_vm0, %v1823_v1 }
 0x349   : > { %v1131_v49 = vsel %vm577_vm2, %v1780_v47, 0.0  ;;  %1714 = vmatprep.subr.bf16.mxu1 %v1823_v1  ;;  %v1144_v50 = vpack.c.bf16 %v1780_v47, %v1780_v47  ;;  %v1782_v52 = vpop.eup %1781  ;;  %v1137_v47 = vld [vmem:[#allocation5 + $0x18] sm:$0xff] }
 0x34a   : > { %1132 = vadd.xlane.f32.xlu0 %v1131_v49  ;;  %v1784_v53 = vpop.eup %1783  ;;  %v723_v57 = vmul.f32 %v1782_v52, %v722_v56 }
 0x34b   : > { %v1786_v54 = vpop.eup %1785  ;;  %v995_v6 = vmul.f32 %v1784_v53, %v994_v5 }
 0x34c   : > { %v1788_v55 = vpop.eup %1787  ;;  %v1130_v11 = vmul.f32 %v1786_v54, %v1129_v10 }
 0x34d   : > { %v860_v2 = vmul.f32 %v1788_v55, %v859_v0  ;;  %v1395_v0 = vsel %vm744_vm5, %v1390_v61, 0 }
 0x34f   : > { %1705 = vmatmul.mubr.msk.bf16.vlgmr.msra.gmra.mxu1 %vm577_vm2, %v1144_v50 }
 0x350   : > { %1716 = vmatprep.mubr.msk.bf16.mxu1 %vm1824_vm0, %v1823_v1  ;;  %1715 = vmatpush3.bf16.msra.mxu1 %v1279_v17 }
 0x351   : > { %1726 = vmatprep.subr.bf16.mxu1 %v1823_v1 }
 0x353   : > { %733 = vperm.xlu1 %1767, %v1782_v52  }
 0x357   : > { %1005 = vperm.xlu1 %1767, %v1784_v53  }
 0x35b   : > { %1140 = vperm.xlu1 %1767, %v1786_v54  }
 0x360   : > { %870 = vperm.xlu0 %1768, %v1788_v55  }
 0x374   : > { %v726_v58 = vpop.xlane.xlu1 %725 }
 0x375   : > { %v727_v59 = vadd.f32 %v726_v58, %v723_v57 }
 0x377   : > { %729 = vst.msk [vmem:[#allocation4] sm:$0xff] %vm568_vm4, %v727_v59 }
 0x37e   : > { %v1201_v60 = vld [vmem:[#allocation4] sm:$0xff] }
 0x37f   : > { %1789 = vrcp.f32 %v1201_v60 }
 0x38c   : > { %v1790_v63 = vpop.eup %1789 }
 0x38d   : > { %1205 = vperm.xlu0 %1768, %v1790_v63  }
 0x3c3   : > { %v863_v3 = vpop.xlane.xlu0 %862 }
 0x3c4   : > { %v864_v4 = vadd.f32 %v863_v3, %v860_v2 }
 0x3c6   : > { %865 = vst.msk [vmem:[#allocation4 + $0x8] sm:$0xff] %vm568_vm4, %v864_v4 }
 0x3cb   : > { %v998_v7 = vpop.xlane.xlu1 %997 }
 0x3cc   : > { %v999_v8 = vadd.f32 %v998_v7, %v995_v6 }
 0x3cd   : > { %v1265_v9 = vld [vmem:[#allocation4 + $0x8] sm:$0xff] }
 0x3ce   : > { %1000 = vst.msk [vmem:[#allocation4 + $0x10] sm:$0xff] %vm568_vm4, %v999_v8  ;;  %1791 = vrcp.f32 %v1265_v9 }
 0x3cf   : > { %v734_v23 = vpop.permute.xlu1 %733 }
 0x3d0   : > { %v736_v24 = vmul.f32 %v734_v23, %v730_v22  ;;  %v1438_v23 = vld [vmem:[%s1941_s13] sm:$0xf] }
 0x3d3   : > { %v1133_v12 = vpop.xlane.xlu0 %1132  ;;  %v1006_v36 = vpop.permute.xlu1 %1005 }
 0x3d4   : > { %v1134_v13 = vadd.f32 %v1133_v12, %v1130_v11  ;;  %v1008_v39 = vmul.f32 %v1006_v36, %v1002_v35 }
 0x3d5   : > { %v1323_v14 = vld [vmem:[#allocation4 + $0x10] sm:$0xff] }
 0x3d6   : > { %1135 = vst.msk [vmem:[#allocation4 + $0x18] sm:$0xff] %vm568_vm4, %v1134_v13  ;;  %1793 = vrcp.f32 %v1323_v14 }
 0x3d7   : > { %v1141_v48 = vpop.permute.xlu1 %1140 }
 0x3d8   : > { %v1143_v53 = vmul.f32 %v1141_v48, %v1137_v47 }
 0x3db   : > { %v1792_v18 = vpop.eup %1791  ;;  %v871_v16 = vpop.permute.xlu0 %870 }
 0x3dc   : > { %1269 = vperm.xlu1 %1767, %v1792_v18   ;;  %v873_v31 = vmul.f32 %v871_v16, %v867_v28  ;;  %v1605_v18 = vld [vmem:[%s2175_s8] ss:$0 sm:$0xff] }
 0x3dd   : > { %v1381_v19 = vld [vmem:[#allocation4 + $0x18] sm:$0xff] }
 0x3de   : > { %1795 = vrcp.f32 %v1381_v19 }
 0x3e3   : > { %v1794_v20 = vpop.eup %1793 }
 0x3e4   : > { %1327 = vperm.xlu0 %1768, %v1794_v20  }
 0x3eb   : > { %v1796_v21 = vpop.eup %1795 }
 0x3ec   : > { %1385 = vperm.xlu1 %1767, %v1796_v21  }
 0x3f7   : > { %v782_v25 = vpop.f32.mrf.mxu1 }
 0x3f8   : > { %v788_v26 = vadd.f32 %v782_v25, %v736_v24 }
 0x3f9   : > { %v1670_v27 = vpop.f32.mrf.mxu1 }
 0x3fa   : > { %789 = vst.msk [vmem:[#allocation5] sm:$0xff] %vm577_vm2, %v788_v26  ;;  %v1439_v27 = vunpack.c.l.bf16 %v1438_v23 }
 0x3fb   : > { %v785_v29 = vpop.f32.mrf.mxu1 }
 0x3fd   : > { %v1671_v30 = vpop.f32.mrf.mxu1 }
 0x3ff   : > { %v917_v32 = vpop.f32.mrf.mxu1 }
 0x400   : > { %v923_v33 = vadd.f32 %v917_v32, %v873_v31 }
 0x401   : > { %v1682_v34 = vpop.f32.mrf.mxu1  ;;  %v1200_v42 = vld [vmem:[#allocation5] sm:$0xff] }
 0x402   : > { %924 = vst.msk [vmem:[#allocation5 + $0x8] sm:$0xff] %vm577_vm2, %v923_v33 }
 0x403   : > { %v920_v37 = vpop.f32.mrf.mxu1 }
 0x405   : > { %v1683_v38 = vpop.f32.mrf.mxu1 }
 0x407   : > { %v1052_v40 = vpop.f32.mrf.mxu1 }
 0x408   : > { %v1058_v41 = vadd.f32 %v1052_v40, %v1008_v39  ;;  %v1206_v43 = vpop.permute.xlu0 %1205 }
 0x409   : > { %v1208_v45 = vmul.f32 %v1206_v43, %v1200_v42  ;;  %v1694_v46 = vpop.f32.mrf.mxu1  ;;  %v1264_v60 = vld [vmem:[#allocation5 + $0x8] sm:$0xff]  ;;  %v1609_v42 = vld [vmem:[%s2176_s9] ss:$0 sm:$0xff] }
 0x40a   : > { %1059 = vst.msk [vmem:[#allocation5 + $0x10] sm:$0xff] %vm577_vm2, %v1058_v41 }
 0x40b   : > { %v1209_v49 = vpack.c.bf16 %v1208_v45, %v1208_v45  ;;  %v1055_v50 = vpop.f32.mrf.mxu1  ;;  %v1610_v45 = vld [vmem:[%s2177_s10] ss:$0 sm:$0xff] }
 0x40d   : > { %v1695_v52 = vpop.f32.mrf.mxu1  ;;  %1711 = vmatmul.mubr.msk.bf16.vlgmr.msra.gmra.mxu0 %vm577_vm2, %v1209_v49 }
 0x40e   : > { %1721 = vmatpush3.bf16.msra.mxu0 %v1337_v51  ;;  %1722 = vmatprep.mubr.msk.bf16.mxu0 %vm1824_vm0, %v1823_v1 }
 0x40f   : > { %v1187_v54 = vpop.f32.mrf.mxu1 }
 0x410   : > { %v1193_v55 = vadd.f32 %v1187_v54, %v1143_v53 }
 0x411   : > { %v1706_v56 = vpop.f32.mrf.mxu1  ;;  %v1322_v2 = vld [vmem:[#allocation5 + $0x10] sm:$0xff] }
 0x412   : > { %1194 = vst.msk [vmem:[#allocation5 + $0x18] sm:$0xff] %vm577_vm2, %v1193_v55 }
 0x413   : > { %v1190_v57 = vpop.f32.mrf.mxu1 }
 0x415   : > { %v1707_v58 = vpop.f32.mrf.mxu1 }
 0x419   : > { %v1380_v6 = vld [vmem:[#allocation5 + $0x18] sm:$0xff] }
 0x457   : > { %v1270_v59 = vpop.permute.xlu1 %1269 }
 0x458   : > { %v1272_v62 = vmul.f32 %v1270_v59, %v1264_v60 }
 0x45a   : > { %v1273_v63 = vpack.c.bf16 %v1272_v62, %v1272_v62 }
 0x45c   : > { %1717 = vmatmul.mubr.msk.bf16.vlgmr.msra.gmra.mxu1 %vm577_vm2, %v1273_v63 }
 0x45d   : > { %1727 = vmatpush3.bf16.msra.mxu1 %v1395_v0  ;;  %1728 = vmatprep.mubr.msk.bf16.mxu1 %vm1824_vm0, %v1823_v1 }
 0x45f   : > { %v1328_v3 = vpop.permute.xlu0 %1327 }
 0x460   : > { %v1330_v4 = vmul.f32 %v1328_v3, %v1322_v2 }
 0x462   : > { %v1331_v5 = vpack.c.bf16 %v1330_v4, %v1330_v4 }
 0x464   : > { %1723 = vmatmul.mubr.msk.bf16.vlgmr.msra.gmra.mxu0 %vm577_vm2, %v1331_v5 }
 0x467   : > { %v1386_v7 = vpop.permute.xlu1 %1385 }
 0x468   : > { %v1388_v8 = vmul.f32 %v1386_v7, %v1380_v6 }
 0x46a   : > { %v1389_v9 = vpack.c.bf16 %v1388_v8, %v1388_v8 }
 0x46c   : > { %1729 = vmatmul.mubr.msk.bf16.vlgmr.msra.gmra.mxu1 %vm577_vm2, %v1389_v9 }
 0x4cd   : > { %v1251_v10 = vpop.f32.mrf.mxu0 }
 0x4ce   : > { %v1263_v21 = vadd.f32 %v1605_v18, %v1251_v10 }
 0x4cf   : > { %v1712_v11 = vpop.f32.mrf.mxu0 }
 0x4d1   : > { %v1254_v12 = vpop.f32.mrf.mxu0 }
 0x4d3   : > { %v1713_v13 = vpop.f32.mrf.mxu0 }
 0x51c   : > { %v1315_v14 = vpop.f32.mrf.mxu1 }
 0x51d   : > { %v1321_v24 = vadd.f32 %v1315_v14, %v1263_v21 }
 0x51e   : > { %v1718_v15 = vpop.f32.mrf.mxu1 }
 0x520   : > { %v1318_v1 = vpop.f32.mrf.mxu1 }
 0x522   : > { %v1719_v17 = vpop.f32.mrf.mxu1 }
 0x524   : > { %v1373_v19 = vpop.f32.mrf.mxu0 }
 0x525   : > { %v1379_v26 = vadd.f32 %v1373_v19, %v1321_v24 }
 0x526   : > { %v1724_v20 = vpop.f32.mrf.mxu0 }
 0x528   : > { %v1376_v22 = vpop.f32.mrf.mxu0 }
 0x52a   : > { %v1725_v25 = vpop.f32.mrf.mxu0 }
 0x52c   : > { %v1431_v28 = vpop.f32.mrf.mxu1 }
 0x52d   : > { %v1437_v16 = vadd.f32 %v1431_v28, %v1379_v26 }
 0x52e   : > { %v1730_v29 = vpop.f32.mrf.mxu1 }
 0x52f   : > { %v1440_v30 = vadd.f32 %v1439_v27, %v1437_v16 }
 0x530   : > { %v1434_v31 = vpop.f32.mrf.mxu1 }
 0x531   : > { %v1441_v32 = vsel %vm502_vm1, %v1440_v30, 0.0 }
 0x532   : > { %v1731_v33 = vpop.f32.mrf.mxu1  ;;  %1442 = vadd.xlane.f32.xlu0 %v1441_v32 }
 0x5bb   : > { %v1443_v34 = vpop.xlane.xlu0 %1442 }
 0x5bc   : > { %v1445_v35 = vmul.f32 0.03125, %v1443_v34 }
 0x5be   : > { %v1446_v36 = vsub.f32 %v1440_v30, %v1445_v35 }
 0x5c0   : > { %v1447_v37 = vmul.f32 %v1446_v36, %v1446_v36  ;;  %v1459_v43 = vmul.f32 %v1609_v42, %v1446_v36 }
 0x5c2   : > { %v1448_v38 = vsel %vm502_vm1, %v1447_v37, 0.0 }
 0x5c3   : > { %1449 = vadd.xlane.f32.xlu1 %v1448_v38 }
 0x64c   : > { %v1450_v39 = vpop.xlane.xlu1 %1449 }
 0x64d   : > { %v1451_v40 = vmul.f32 0.03125, %v1450_v39 }
 0x64f   : > { %v1460_v41 = vadd.f32 1e-05, %v1451_v40 }
 0x651   : > { %1797 = vrsqrt.f32 %v1460_v41 }
 0x65e   : > { %v1798_v44 = vpop.eup %1797 }
 0x65f   : > { %v1462_v46 = vmul.f32 %v1798_v44, %v1459_v43 }
 0x661   : > { %v1470_v47 = vadd.f32 %v1610_v45, %v1462_v46 }
 0x663   : > { %v1471_v48 = vpack.c.bf16 %v1470_v47, %v1470_v47 }
 0x665   : > { %1473 = vst.msk [vmem:[%s472_s22] sm:$0xf] %vm1472_vm6, %v1471_v48 }
 0x666 PF: > { %s21_s19 = sadd.s32 1, %s1821_s19   ;;  %s2179_s17 = smov %s1817_s18 }
 0x667   : > { %p18_p5 = scmp.ge.s32.totalorder %s21_s19, 4   ;;  %s2180_s18 = smov %s2182_s20 }
 0x669   :  { %20 = sbr.rel (!%p18_p5) target bundleno = 2 (0x2), region = 123 }

// kernel: forward.11
= control target key start
LH: loop header
LB: loop body
LE: loop exit
PB: predicated region body
PF: predicated region fallthrough
CT: control target
= control target key end

     0   :  { %v274_v0 = vmov 0.0   ;;  %vm275_vm0 = vmmov 0   ;;  %vm63_vm1 = vcmask 261120   ;;  %vm108_vm2 = vcmask 130048   ;;  %s363_s1 = inlined_call_operand.vmem [shape: bf16[32,16], index: 1, kind: input, shape index: {}]   ;;  %s364_s0 = inlined_call_operand.vmem [shape: bf16[16,32], index: 0, kind: input, shape index: {}]   ;;  %s365_s2 = inlined_call_operand.vmem [shape: f32[1,16], index: 2, kind: input, shape index: {}]   ;;  %s366_s5 = inlined_call_operand.vmem [shape: bf16[16,128], index: 5, kind: input, shape index: {}]   ;;  %s367_s3 = inlined_call_operand.vmem [shape: f32[1,16], index: 3, kind: input, shape index: {}]   ;;  %s368_s4 = inlined_call_operand.vmem [shape: f32[1,16], index: 4, kind: input, shape index: {}]   ;;  %s369_s7 = inlined_call_operand.vmem [shape: bf16[16,128], index: 7, kind: input, shape index: {}]   ;;  %s370_s6 = inlined_call_operand.vmem [shape: f32[1,128], index: 6, kind: input, shape index: {}]   ;;  %s371_s8 = inlined_call_operand.vmem [shape: f32[16,128], index: 8, kind: output, shape index: {}]  }
   0x1   :  { %249 = vmatprep.subr.bf16.mxu0 %v274_v0  ;;  %v266_v1 = vld [vmem:[%s363_s1 + $0x8] sm:$0xff]   ;;  %253 = vmatprep.mubr.msk.bf16.mxu0 %vm275_vm0, %v274_v0  ;;  %v267_v2 = vld [vmem:[%s363_s1] sm:$0xff]   ;;  %v276_v45 = vmov 0  }
   0x2   :  { %257 = vmatprep.subr.bf16.mxu1 %v274_v0  ;;  %259 = vmatprep.mubr.msk.bf16.mxu1 %vm275_vm0, %v274_v0  ;;  %v268_v3 = vld [vmem:[%s364_s0] sm:$0xff]  }
   0x3   :  { %250 = vmatpush3.bf16.msra.mxu0 %v266_v1  ;;  %v234_v4 = vld [vmem:[%s365_s2] ss:$0 sm:$0xff]  ;;  %v217_v44 = vld [vmem:[%s369_s7 + $0x4] sm:$0xf] }
   0x4   :  { %251 = vmatprep.subr.bf16.mxu0 %v274_v0  ;;  %v269_v23 = vld [vmem:[%s366_s5] sm:$0xff]   ;;  %vm219_vm4 = vcmp.gt.bf16.partialorder %v217_v44, 1056980736 }
   0x5   :  { %258 = vmatpush3.bf16.msra.mxu1 %v269_v23  ;;  %v239_v30 = vld [vmem:[%s367_s3] ss:$0 sm:$0xff]  ;;  %v221_v48 = vsel %vm219_vm4, 65537, %v276_v45 }
   0x6   :  { %v240_v34 = vld [vmem:[%s368_s4] ss:$0 sm:$0xff]  ;;  %v223_v51 = vunpack.c.l.b16 %v221_v48 }
   0x7   :  { %252 = vmatpush3.bf16.msra.mxu0 %v267_v2  ;;  %v216_v43 = vld [vmem:[%s369_s7] sm:$0xf] }
   0x8   :  { %vm218_vm3 = vcmp.gt.bf16.partialorder %v216_v43, 1056980736  ;;  %v241_v49 = vld [vmem:[%s370_s6] ss:$0 sm:$0xff]  ;;  %vm225_vm6 = vcmp.ne.s32.totalorder %v223_v51, 0 }
   0x9   :  { %v220_v46 = vsel %vm218_vm3, 65537, %v276_v45 }
   0xa   :  { %254 = vmatmul.mubr.msk.bf16.vlgmr.msra.gmra.mxu0 %vm63_vm1, %v268_v3  ;;  %v222_v47 = vunpack.c.l.b16 %v220_v46 }
   0xc   :  { %vm224_vm5 = vcmp.ne.s32.totalorder %v222_v47, 0 }
  0xca   :  { %v101_v5 = vpop.f32.mrf.mxu0 }
  0xcb   :  { %v102_v6 = vadd.f32 %v234_v4, %v101_v5 }
  0xcc   :  { %v255_v7 = vpop.f32.mrf.mxu0 }
  0xcd   :  { %v109_v8 = vsel %vm108_vm2, %v102_v6, 0.0 }
  0xce   :  { %110 = vadd.xlane.f32.xlu0 %v109_v8  ;;  %v104_v9 = vpop.f32.mrf.mxu0 }
  0xcf   :  { %v105_v10 = vadd.f32 %v234_v4, %v104_v9 }
  0xd0   :  { %v256_v11 = vpop.f32.mrf.mxu0 }
  0xd1   :  { %v112_v12 = vsel %vm108_vm2, %v105_v10, 0.0 }
  0xd2   :  { %113 = vadd.xlane.f32.xlu0 %v112_v12 }
 0x157   :  { %v111_v13 = vpop.xlane.xlu0 %110 }
 0x158   :  { %v116_v14 = vmul.f32 0.0625, %v111_v13 }
 0x15a   :  { %v118_v15 = vsub.f32 %v102_v6, %v116_v14 }
 0x15b   :  { %v114_v16 = vpop.xlane.xlu0 %113 }
 0x15c   :  { %v117_v17 = vmul.f32 0.0625, %v114_v16  ;;  %v120_v18 = vmul.f32 %v118_v15, %v118_v15  ;;  %v137_v31 = vmul.f32 %v239_v30, %v118_v15 }
 0x15e   :  { %v119_v19 = vsub.f32 %v105_v10, %v117_v17  ;;  %v122_v20 = vsel %vm108_vm2, %v120_v18, 0.0 }
 0x15f   :  { %123 = vadd.xlane.f32.xlu1 %v122_v20 }
 0x160   :  { %v121_v21 = vmul.f32 %v119_v19, %v119_v19  ;;  %v138_v35 = vmul.f32 %v239_v30, %v119_v19 }
 0x162   :  { %v125_v22 = vsel %vm108_vm2, %v121_v21, 0.0 }
 0x163   :  { %126 = vadd.xlane.f32.xlu1 %v125_v22 }
 0x1e8   :  { %v124_v24 = vpop.xlane.xlu1 %123 }
 0x1e9   :  { %v128_v25 = vmul.f32 0.0625, %v124_v24 }
 0x1eb   :  { %v139_v26 = vadd.f32 1e-05, %v128_v25 }
 0x1ec   :  { %v127_v27 = vpop.xlane.xlu1 %126 }
 0x1ed   :  { %270 = vrsqrt.f32 %v139_v26  ;;  %v129_v28 = vmul.f32 0.0625, %v127_v27 }
 0x1ef   :  { %v140_v29 = vadd.f32 1e-05, %v129_v28 }
 0x1f1   :  { %272 = vrsqrt.f32 %v140_v29 }
 0x1fa   :  { %v271_v32 = vpop.eup %270 }
 0x1fb   :  { %v143_v33 = vmul.f32 %v271_v32, %v137_v31 }
 0x1fd   :  { %v152_v38 = vadd.f32 %v240_v34, %v143_v33 }
 0x1fe   :  { %v273_v36 = vpop.eup %272 }
 0x1ff   :  { %v144_v37 = vmul.f32 %v273_v36, %v138_v35  ;;  %v154_v40 = vmax.f32 %v152_v38, 0.0 }
 0x201   :  { %v153_v39 = vadd.f32 %v240_v34, %v144_v37 }
 0x203   :  { %v155_v41 = vmax.f32 %v153_v39, 0.0 }
 0x205   :  { %v156_v42 = vpack.c.bf16 %v155_v41, %v154_v40 }
 0x207   :  { %260 = vmatmul.mubr.msk.bf16.vlgmr.msra.gmra.mxu1 %vm108_vm2, %v156_v42 }
 0x2c7   :  { %v209_v50 = vpop.f32.mrf.mxu1 }
 0x2c8   :  { %v210_v52 = vadd.f32 %v241_v49, %v209_v50 }
 0x2c9   :  { %v261_v53 = vpop.f32.mrf.mxu1 }
 0x2ca   :  { %v226_v54 = vsel %vm224_vm5, %v210_v52, -60000.0 }
 0x2cb   :  { %228 = vst [vmem:[%s371_s8] sm:$0xff] %v226_v54  ;;  %v212_v55 = vpop.f32.mrf.mxu1 }
 0x2cc   :  { %v213_v56 = vadd.f32 %v241_v49, %v212_v55 }
 0x2cd   :  { %v262_v57 = vpop.f32.mrf.mxu1 }
 0x2ce   :  { %v227_v58 = vsel %vm225_vm6, %v213_v56, -60000.0 }
 0x2cf   :  { %229 = vst [vmem:[%s371_s8 + $0x8] sm:$0xff] %v227_v58 }

</bundles_post_ra>
